<compile_context>
chip_gen: v7x
topology: tpu7x:2x2x1
jax: 0.10.0
libtpu: 0.0.40
codegen_flags: <defaults>
</compile_context>

<pallas_src>
import jax
import jax.numpy as jnp
from jax.experimental import pallas as pl
from jax.experimental.pallas import tpu as pltpu

H_GCN = 16                     # GCN hidden channels
H_LSTM = (4 * H_GCN) // 2      # JK-LSTM hidden = (num_layers * channels)//2 = 32
PAD_OUT = 128                  # lane-dense padded output width


def gcn_jknet_kernel(ahat_ref, x_ref,
                     w1_ref, b1_ref, w2_ref, b2_ref,
                     wl1_ref, wl2_ref, bl_ref,
                     watt2_ref, batt_ref,
                     wlin_pad_ref, blin_pad_ref,
                     out_ref):
    f32, bf16 = jnp.float32, jnp.bfloat16
    H = H_LSTM
    ahat = ahat_ref[...]                 # bf16 (N, N)
    x = x_ref[...]                       # bf16 (N, F_in)

    # ---- GCNConv1 (reassociated): relu((Ahat @ x) @ W1 + b1) ----
    ax = jnp.dot(ahat, x, preferred_element_type=f32)                        # (N, F_in)
    x1 = jnp.maximum(
        jnp.dot(ax.astype(bf16), w1_ref[...], preferred_element_type=f32)
        + b1_ref[...], 0.0)

    # ---- GCNConv2: relu(Ahat @ (x1 @ W2) + b2) ----
    xw2 = jnp.dot(x1.astype(bf16), w2_ref[...], preferred_element_type=f32)
    x2 = jnp.maximum(
        jnp.dot(ahat, xw2.astype(bf16), preferred_element_type=f32)
        + b2_ref[...], 0.0)

    # ---- JumpingKnowledge(mode='lstm'): bi-LSTM over the 2-step sequence [x1, x2] ----
    # Both directions fused per timestep via block-diagonal weights (wrapper-built).
    # Gate column layout: [i_f i_b | f_f f_b | g_f g_b | o_f o_b], each block 32 wide.
    bl = bl_ref[...]

    # step 1: fwd sees x1, bwd sees x2; zero initial state (f*c_prev term vanishes).
    g1 = jnp.dot(jnp.concatenate([x1, x2], axis=-1).astype(bf16), wl1_ref[...],
                 preferred_element_type=f32) + bl                            # (N, 256)
    s1 = jax.nn.sigmoid(g1)                                                  # lane-dense EUP
    gg1 = jnp.tanh(g1[:, 4 * H:6 * H])
    c0 = s1[:, 0:2 * H] * gg1                                                # [cf0 | cb1]
    h0 = s1[:, 6 * H:8 * H] * jnp.tanh(c0)                                   # [hf0 | hb1]

    # step 2: fwd sees x2 + hf0/cf0, bwd sees x1 + hb1/cb1.
    g2 = jnp.dot(jnp.concatenate([x2, x1, h0], axis=-1).astype(bf16), wl2_ref[...],
                 preferred_element_type=f32) + bl                            # (N, 256)
    s2 = jax.nn.sigmoid(g2)
    gg2 = jnp.tanh(g2[:, 4 * H:6 * H])
    c1 = s2[:, 2 * H:4 * H] * c0 + s2[:, 0:2 * H] * gg2                      # [cf1 | cb0]
    h1 = s2[:, 6 * H:8 * H] * jnp.tanh(c1)                                   # [hf1 | hb0]

    # attention scores for both timesteps in ONE lane-dense (N,128)@(128,2) matmul
    hcat = jnp.concatenate([h0, h1], axis=-1)                                # [hf0|hb1|hf1|hb0]
    a01 = jnp.dot(hcat.astype(bf16), watt2_ref[...],
                  preferred_element_type=f32) + batt_ref[...]                # (N, 2)

    # 2-way softmax over the layer axis, done directly on (N,2)
    m = jnp.max(a01, axis=-1, keepdims=True)
    e = jnp.exp(a01 - m)
    inv = pl.reciprocal(jnp.sum(e, axis=-1, keepdims=True), approx=True)     # denom in [1,2]
    wgt = e * inv
    xjk = wgt[:, 0:1] * x1 + wgt[:, 1:2] * x2                                # (N, 16)

    # ---- APPNP(K=1, alpha=0): propagate the 16-wide xjk, then padded classifier ----
    # wlin_pad columns >= C are exactly zero; blin_pad = -1e9 there so the pad lanes
    # vanish under log_softmax. Output store is a full 128-lane dense tile.
    xp = jnp.dot(ahat, xjk.astype(bf16), preferred_element_type=f32)         # (N, 16)
    logits = jnp.dot(xp.astype(bf16), wlin_pad_ref[...],
                     preferred_element_type=f32) + blin_pad_ref[...]         # (N, 128)
    mm = jnp.max(logits, axis=-1, keepdims=True)
    z = logits - mm
    out_ref[...] = z - jnp.log(jnp.sum(jnp.exp(z), axis=-1, keepdims=True))


def _gate_blocks(w, H):
    return [w[:, g * H:(g + 1) * H] for g in range(4)]


def gcn_jknet_forward(ahat, x, p):
    n = x.shape[0]
    c = p["wlin"].shape[1]
    H = H_LSTM
    f_in = p["wih_f"].shape[0]
    bf16 = jnp.bfloat16

    wih_f = _gate_blocks(p["wih_f"], H)
    wih_b = _gate_blocks(p["wih_b"], H)
    whh_f = _gate_blocks(p["whh_f"], H)
    whh_b = _gate_blocks(p["whh_b"], H)
    bf_ = _gate_blocks(p["bf"], H)
    bb_ = _gate_blocks(p["bb"], H)
    zf = jnp.zeros((f_in, H), jnp.float32)
    zh = jnp.zeros((H, H), jnp.float32)

    # step-1 fused weight: rows [x1(fwd) | x2(bwd)], cols [i_f i_b f_f f_b g_f g_b o_f o_b]
    wl1 = jnp.concatenate([
        jnp.concatenate([jnp.concatenate([wih_f[g], zf], 1),
                         jnp.concatenate([zf, wih_b[g]], 1)], 0)
        for g in range(4)], axis=1)                                          # (32, 256)
    # step-2 fused weight: rows [x2(fwd) | x1(bwd) | hf0(fwd) | hb1(bwd)]
    wl2 = jnp.concatenate([
        jnp.concatenate([jnp.concatenate([wih_f[g], zf], 1),
                         jnp.concatenate([zf, wih_b[g]], 1),
                         jnp.concatenate([whh_f[g], zh], 1),
                         jnp.concatenate([zh, whh_b[g]], 1)], 0)
        for g in range(4)], axis=1)                                          # (96, 256)
    bl = jnp.concatenate([jnp.concatenate([bf_[g], bb_[g]], 1)
                          for g in range(4)], axis=1)                        # (1, 256)

    # attention weight for hcat = [hf0 | hb1 | hf1 | hb0]:
    #   col 0 -> a0 = hf0 @ wf + hb0 @ wb ; col 1 -> a1 = hf1 @ wf + hb1 @ wb
    wf_, wb_ = p["watt"][:H], p["watt"][H:]
    z1 = jnp.zeros((H, 1), jnp.float32)
    watt2 = jnp.concatenate(
        [jnp.concatenate([wf_, z1, z1, wb_], axis=0),
         jnp.concatenate([z1, wb_, wf_, z1], axis=0)], axis=1)               # (128, 2)

    # lane-dense padded classifier (pad weight cols exactly 0, pad bias = -1e9)
    wlin_pad = jnp.zeros((H_GCN, PAD_OUT), jnp.float32).at[:, :c].set(p["wlin"])
    blin_pad = jnp.full((1, PAD_OUT), -1e9, jnp.float32).at[:, :c].set(p["blin"])

    args = (ahat.astype(bf16), x.astype(bf16),
            p["w1"].astype(bf16), p["b1"], p["w2"].astype(bf16), p["b2"],
            wl1.astype(bf16), wl2.astype(bf16), bl,
            watt2.astype(bf16), p["batt"],
            wlin_pad.astype(bf16), blin_pad)
    vmem = lambda: pl.BlockSpec(memory_space=pltpu.MemorySpace.VMEM)
    out = pl.pallas_call(
        gcn_jknet_kernel,
        out_shape=jax.ShapeDtypeStruct((n, PAD_OUT), jnp.float32),
        in_specs=[vmem() for _ in args],
        out_specs=vmem(),
    )(*args)
    return out[:, :c]


# ----------------------- pure-JAX reference (same math, f32) -----------------------
def gcn_jknet_ref(ahat, x, p):
    H = H_LSTM
    x1 = jax.nn.relu(ahat @ (x @ p["w1"]) + p["b1"])
    x2 = jax.nn.relu(ahat @ (x1 @ p["w2"]) + p["b2"])

    def cell(xin, h, c, wih, whh, b):
        g = xin @ wih + h @ whh + b
        i, f, gg, o = g[:, :H], g[:, H:2 * H], g[:, 2 * H:3 * H], g[:, 3 * H:]
        c = jax.nn.sigmoid(f) * c + jax.nn.sigmoid(i) * jnp.tanh(gg)
        return jax.nn.sigmoid(o) * jnp.tanh(c), c

    z = jnp.zeros((x.shape[0], H), jnp.float32)
    hf0, cf0 = cell(x1, z, z, p["wih_f"], p["whh_f"], p["bf"])
    hf1, _ = cell(x2, hf0, cf0, p["wih_f"], p["whh_f"], p["bf"])
    hb1, cb1 = cell(x2, z, z, p["wih_b"], p["whh_b"], p["bb"])
    hb0, _ = cell(x1, hb1, cb1, p["wih_b"], p["whh_b"], p["bb"])
    a0 = jnp.concatenate([hf0, hb0], -1) @ p["watt"] + p["batt"]
    a1 = jnp.concatenate([hf1, hb1], -1) @ p["watt"] + p["batt"]
    w = jax.nn.softmax(jnp.concatenate([a0, a1], -1), axis=-1)
    xjk = w[:, 0:1] * x1 + w[:, 1:2] * x2
    logits = (ahat @ xjk) @ p["wlin"] + p["blin"]
    return jax.nn.log_softmax(logits, axis=-1)


if __name__ == "__main__":
    N, F_IN, C = 128, 8, 4   # nodes, num_features, num_classes
    key = jax.random.PRNGKey(0)
    ks = jax.random.split(key, 16)

    # node features
    x = jax.random.normal(ks[0], (N, F_IN), jnp.float32)

    # synthetic graph -> dense symmetric-normalized adjacency with self loops
    a = (jax.random.uniform(ks[1], (N, N)) < 0.05).astype(jnp.float32)
    a = jnp.maximum(a, a.T)
    a = a * (1.0 - jnp.eye(N, dtype=jnp.float32)) + jnp.eye(N, dtype=jnp.float32)
    deg = jnp.sum(a, axis=1)
    dinv = 1.0 / jnp.sqrt(deg)
    ahat = dinv[:, None] * a * dinv[None, :]

    s = 0.1
    params = {
        "w1":    s * jax.random.normal(ks[2],  (F_IN, H_GCN), jnp.float32),
        "b1":    s * jax.random.normal(ks[3],  (1, H_GCN), jnp.float32),
        "w2":    s * jax.random.normal(ks[4],  (H_GCN, H_GCN), jnp.float32),
        "b2":    s * jax.random.normal(ks[5],  (1, H_GCN), jnp.float32),
        # bi-LSTM (input=16, hidden=32); biases store b_ih + b_hh combined
        "wih_f": s * jax.random.normal(ks[6],  (H_GCN, 4 * H_LSTM), jnp.float32),
        "whh_f": s * jax.random.normal(ks[7],  (H_LSTM, 4 * H_LSTM), jnp.float32),
        "bf":    s * jax.random.normal(ks[8],  (1, 4 * H_LSTM), jnp.float32),
        "wih_b": s * jax.random.normal(ks[9],  (H_GCN, 4 * H_LSTM), jnp.float32),
        "whh_b": s * jax.random.normal(ks[10], (H_LSTM, 4 * H_LSTM), jnp.float32),
        "bb":    s * jax.random.normal(ks[11], (1, 4 * H_LSTM), jnp.float32),
        # JK attention Linear(64 -> 1)
        "watt":  s * jax.random.normal(ks[12], (2 * H_LSTM, 1), jnp.float32),
        "batt":  s * jax.random.normal(ks[13], (1, 1), jnp.float32),
        # lin1: Linear(16 -> num_classes)
        "wlin":  s * jax.random.normal(ks[14], (H_GCN, C), jnp.float32),
        "blin":  s * jax.random.normal(ks[15], (1, C), jnp.float32),
    }

    out = jax.block_until_ready(gcn_jknet_forward(ahat, x, params))
    ref = jax.block_until_ready(gcn_jknet_ref(ahat, x, params))
    assert out.shape == (N, C)
    assert bool(jnp.all(jnp.isfinite(out)))
    # tolerance covers bf16 MXU operands (~2^-9 relative) against the f32 reference
    assert bool(jnp.allclose(out, ref, atol=3e-3, rtol=3e-3))
    print("KERNEL_OK")
</pallas_src>

<mosaic_0001>
module attributes {stable_mosaic.version = 11 : i64} {
  func.func @gcn_jknet_kernel(%arg0: memref<128x128xbf16, #tpu.memory_space<vmem>>, %arg1: memref<128x8xbf16, #tpu.memory_space<vmem>>, %arg2: memref<8x16xbf16, #tpu.memory_space<vmem>>, %arg3: memref<1x16xf32, #tpu.memory_space<vmem>>, %arg4: memref<16x16xbf16, #tpu.memory_space<vmem>>, %arg5: memref<1x16xf32, #tpu.memory_space<vmem>>, %arg6: memref<32x256xbf16, #tpu.memory_space<vmem>>, %arg7: memref<96x256xbf16, #tpu.memory_space<vmem>>, %arg8: memref<1x256xf32, #tpu.memory_space<vmem>>, %arg9: memref<128x2xbf16, #tpu.memory_space<vmem>>, %arg10: memref<1x1xf32, #tpu.memory_space<vmem>>, %arg11: memref<16x128xbf16, #tpu.memory_space<vmem>>, %arg12: memref<1x128xf32, #tpu.memory_space<vmem>>, %arg13: memref<128x128xf32, #tpu.memory_space<vmem>>) attributes {dimension_semantics = [], scalar_prefetch = 0 : i64, scratch_operands = 0 : i64, tpu.core_type = #tpu.core_type<tc>} {
    %c0 = arith.constant 0 : index
    %c0_0 = arith.constant 0 : index
    %0 = vector.load %arg0[%c0, %c0_0] : memref<128x128xbf16, #tpu.memory_space<vmem>>, vector<128x128xbf16>
    %c0_1 = arith.constant 0 : index
    %c0_2 = arith.constant 0 : index
    %1 = vector.load %arg1[%c0_1, %c0_2] : memref<128x8xbf16, #tpu.memory_space<vmem>>, vector<128x8xbf16>
    %cst = arith.constant dense<0.000000e+00> : vector<128x8xf32>
    %2 = tpu.matmul %0, %1, %cst {dimension_numbers = #tpu.dot_dimension_numbers<[1], [0], [0], [1], [0, 0, 1, 1], [], []>} : vector<128x128xbf16>, vector<128x8xbf16>, vector<128x8xf32> -> vector<128x8xf32>
    %3 = arith.truncf %2 : vector<128x8xf32> to vector<128x8xbf16>
    %c0_3 = arith.constant 0 : index
    %c0_4 = arith.constant 0 : index
    %4 = vector.load %arg2[%c0_3, %c0_4] : memref<8x16xbf16, #tpu.memory_space<vmem>>, vector<8x16xbf16>
    %cst_5 = arith.constant dense<0.000000e+00> : vector<128x16xf32>
    %5 = tpu.matmul %3, %4, %cst_5 {dimension_numbers = #tpu.dot_dimension_numbers<[1], [0], [0], [1], [0, 0, 1, 1], [], []>} : vector<128x8xbf16>, vector<8x16xbf16>, vector<128x16xf32> -> vector<128x16xf32>
    %c0_6 = arith.constant 0 : index
    %c0_7 = arith.constant 0 : index
    %6 = vector.load %arg3[%c0_6, %c0_7] : memref<1x16xf32, #tpu.memory_space<vmem>>, vector<1x16xf32>
    %7 = vector.broadcast %6 : vector<1x16xf32> to vector<128x16xf32>
    %8 = arith.addf %5, %7 : vector<128x16xf32>
    %cst_8 = arith.constant 0.000000e+00 : f32
    %9 = vector.broadcast %cst_8 : f32 to vector<128x16xf32>
    %10 = arith.maximumf %8, %9 : vector<128x16xf32>
    %11 = arith.truncf %10 : vector<128x16xf32> to vector<128x16xbf16>
    %c0_9 = arith.constant 0 : index
    %c0_10 = arith.constant 0 : index
    %12 = vector.load %arg4[%c0_9, %c0_10] : memref<16x16xbf16, #tpu.memory_space<vmem>>, vector<16x16xbf16>
    %cst_11 = arith.constant dense<0.000000e+00> : vector<128x16xf32>
    %13 = tpu.matmul %11, %12, %cst_11 {dimension_numbers = #tpu.dot_dimension_numbers<[1], [0], [0], [1], [0, 0, 1, 1], [], []>} : vector<128x16xbf16>, vector<16x16xbf16>, vector<128x16xf32> -> vector<128x16xf32>
    %14 = arith.truncf %13 : vector<128x16xf32> to vector<128x16xbf16>
    %cst_12 = arith.constant dense<0.000000e+00> : vector<128x16xf32>
    %15 = tpu.matmul %0, %14, %cst_12 {dimension_numbers = #tpu.dot_dimension_numbers<[1], [0], [0], [1], [0, 0, 1, 1], [], []>} : vector<128x128xbf16>, vector<128x16xbf16>, vector<128x16xf32> -> vector<128x16xf32>
    %c0_13 = arith.constant 0 : index
    %c0_14 = arith.constant 0 : index
    %16 = vector.load %arg5[%c0_13, %c0_14] : memref<1x16xf32, #tpu.memory_space<vmem>>, vector<1x16xf32>
    %17 = vector.broadcast %16 : vector<1x16xf32> to vector<128x16xf32>
    %18 = arith.addf %15, %17 : vector<128x16xf32>
    %cst_15 = arith.constant 0.000000e+00 : f32
    %19 = vector.broadcast %cst_15 : f32 to vector<128x16xf32>
    %20 = arith.maximumf %18, %19 : vector<128x16xf32>
    %c0_16 = arith.constant 0 : index
    %c0_17 = arith.constant 0 : index
    %21 = vector.load %arg8[%c0_16, %c0_17] : memref<1x256xf32, #tpu.memory_space<vmem>>, vector<1x256xf32>
    %22 = tpu.concatenate %10, %20 in 1 : vector<128x16xf32>, vector<128x16xf32> -> vector<128x32xf32>
    %23 = arith.truncf %22 : vector<128x32xf32> to vector<128x32xbf16>
    %c0_18 = arith.constant 0 : index
    %c0_19 = arith.constant 0 : index
    %24 = vector.load %arg6[%c0_18, %c0_19] : memref<32x256xbf16, #tpu.memory_space<vmem>>, vector<32x256xbf16>
    %cst_20 = arith.constant dense<0.000000e+00> : vector<128x256xf32>
    %25 = tpu.matmul %23, %24, %cst_20 {dimension_numbers = #tpu.dot_dimension_numbers<[1], [0], [0], [1], [0, 0, 1, 1], [], []>} : vector<128x32xbf16>, vector<32x256xbf16>, vector<128x256xf32> -> vector<128x256xf32>
    %26 = vector.broadcast %21 : vector<1x256xf32> to vector<128x256xf32>
    %27 = arith.addf %25, %26 : vector<128x256xf32>
    %28 = arith.negf %27 : vector<128x256xf32>
    %29 = math.exp %28 : vector<128x256xf32>
    %cst_21 = arith.constant 1.000000e+00 : f32
    %30 = vector.broadcast %cst_21 : f32 to vector<128x256xf32>
    %31 = arith.addf %30, %29 : vector<128x256xf32>
    %32 = arith.divf %30, %31 : vector<128x256xf32>
    %33 = vector.extract_strided_slice %27 {offsets = [0, 128], sizes = [128, 64], strides = [1, 1]} : vector<128x256xf32> to vector<128x64xf32>
    %34 = math.tanh %33 : vector<128x64xf32>
    %35 = vector.extract_strided_slice %32 {offsets = [0, 0], sizes = [128, 64], strides = [1, 1]} : vector<128x256xf32> to vector<128x64xf32>
    %36 = arith.mulf %35, %34 : vector<128x64xf32>
    %37 = vector.extract_strided_slice %32 {offsets = [0, 192], sizes = [128, 64], strides = [1, 1]} : vector<128x256xf32> to vector<128x64xf32>
    %38 = math.tanh %36 : vector<128x64xf32>
    %39 = arith.mulf %37, %38 : vector<128x64xf32>
    %40 = tpu.concatenate %20, %10, %39 in 1 : vector<128x16xf32>, vector<128x16xf32>, vector<128x64xf32> -> vector<128x96xf32>
    %41 = arith.truncf %40 : vector<128x96xf32> to vector<128x96xbf16>
    %c0_22 = arith.constant 0 : index
    %c0_23 = arith.constant 0 : index
    %42 = vector.load %arg7[%c0_22, %c0_23] : memref<96x256xbf16, #tpu.memory_space<vmem>>, vector<96x256xbf16>
    %cst_24 = arith.constant dense<0.000000e+00> : vector<128x256xf32>
    %43 = tpu.matmul %41, %42, %cst_24 {dimension_numbers = #tpu.dot_dimension_numbers<[1], [0], [0], [1], [0, 0, 1, 1], [], []>} : vector<128x96xbf16>, vector<96x256xbf16>, vector<128x256xf32> -> vector<128x256xf32>
    %44 = vector.broadcast %21 : vector<1x256xf32> to vector<128x256xf32>
    %45 = arith.addf %43, %44 : vector<128x256xf32>
    %46 = arith.negf %45 : vector<128x256xf32>
    %47 = math.exp %46 : vector<128x256xf32>
    %cst_25 = arith.constant 1.000000e+00 : f32
    %48 = vector.broadcast %cst_25 : f32 to vector<128x256xf32>
    %49 = arith.addf %48, %47 : vector<128x256xf32>
    %50 = arith.divf %48, %49 : vector<128x256xf32>
    %51 = vector.extract_strided_slice %45 {offsets = [0, 128], sizes = [128, 64], strides = [1, 1]} : vector<128x256xf32> to vector<128x64xf32>
    %52 = math.tanh %51 : vector<128x64xf32>
    %53 = vector.extract_strided_slice %50 {offsets = [0, 64], sizes = [128, 64], strides = [1, 1]} : vector<128x256xf32> to vector<128x64xf32>
    %54 = arith.mulf %53, %36 : vector<128x64xf32>
    %55 = vector.extract_strided_slice %50 {offsets = [0, 0], sizes = [128, 64], strides = [1, 1]} : vector<128x256xf32> to vector<128x64xf32>
    %56 = arith.mulf %55, %52 : vector<128x64xf32>
    %57 = arith.addf %54, %56 : vector<128x64xf32>
    %58 = vector.extract_strided_slice %50 {offsets = [0, 192], sizes = [128, 64], strides = [1, 1]} : vector<128x256xf32> to vector<128x64xf32>
    %59 = math.tanh %57 : vector<128x64xf32>
    %60 = arith.mulf %58, %59 : vector<128x64xf32>
    %61 = tpu.concatenate %39, %60 in 1 : vector<128x64xf32>, vector<128x64xf32> -> vector<128x128xf32>
    %62 = arith.truncf %61 : vector<128x128xf32> to vector<128x128xbf16>
    %c0_26 = arith.constant 0 : index
    %c0_27 = arith.constant 0 : index
    %63 = vector.load %arg9[%c0_26, %c0_27] : memref<128x2xbf16, #tpu.memory_space<vmem>>, vector<128x2xbf16>
    %cst_28 = arith.constant dense<0.000000e+00> : vector<128x2xf32>
    %64 = tpu.matmul %62, %63, %cst_28 {dimension_numbers = #tpu.dot_dimension_numbers<[1], [0], [0], [1], [0, 0, 1, 1], [], []>} : vector<128x128xbf16>, vector<128x2xbf16>, vector<128x2xf32> -> vector<128x2xf32>
    %c0_29 = arith.constant 0 : index
    %c0_30 = arith.constant 0 : index
    %65 = vector.load %arg10[%c0_29, %c0_30] : memref<1x1xf32, #tpu.memory_space<vmem>>, vector<1x1xf32>
    %66 = vector.broadcast %65 : vector<1x1xf32> to vector<128x2xf32>
    %67 = arith.addf %64, %66 : vector<128x2xf32>
    %cst_31 = arith.constant dense<0xFF800000> : vector<128xf32>
    %68 = vector.multi_reduction <maximumf>, %67, %cst_31 [1] : vector<128x2xf32> to vector<128xf32>
    %69 = vector.shape_cast %68 : vector<128xf32> to vector<128x1xf32>
    %70 = vector.broadcast %69 : vector<128x1xf32> to vector<128x2xf32>
    %71 = arith.subf %67, %70 : vector<128x2xf32>
    %72 = math.exp %71 : vector<128x2xf32>
    %cst_32 = arith.constant dense<0.000000e+00> : vector<128xf32>
    %73 = vector.multi_reduction <add>, %72, %cst_32 [1] : vector<128x2xf32> to vector<128xf32>
    %74 = vector.shape_cast %73 : vector<128xf32> to vector<128x1xf32>
    %75 = tpu.reciprocal %74 {approx = true} : vector<128x1xf32> -> vector<128x1xf32>
    %76 = vector.broadcast %75 : vector<128x1xf32> to vector<128x2xf32>
    %77 = arith.mulf %72, %76 : vector<128x2xf32>
    %78 = vector.extract_strided_slice %77 {offsets = [0, 0], sizes = [128, 1], strides = [1, 1]} : vector<128x2xf32> to vector<128x1xf32>
    %79 = vector.broadcast %78 : vector<128x1xf32> to vector<128x16xf32>
    %80 = arith.mulf %79, %10 : vector<128x16xf32>
    %81 = vector.extract_strided_slice %77 {offsets = [0, 1], sizes = [128, 1], strides = [1, 1]} : vector<128x2xf32> to vector<128x1xf32>
    %82 = vector.broadcast %81 : vector<128x1xf32> to vector<128x16xf32>
    %83 = arith.mulf %82, %20 : vector<128x16xf32>
    %84 = arith.addf %80, %83 : vector<128x16xf32>
    %85 = arith.truncf %84 : vector<128x16xf32> to vector<128x16xbf16>
    %cst_33 = arith.constant dense<0.000000e+00> : vector<128x16xf32>
    %86 = tpu.matmul %0, %85, %cst_33 {dimension_numbers = #tpu.dot_dimension_numbers<[1], [0], [0], [1], [0, 0, 1, 1], [], []>} : vector<128x128xbf16>, vector<128x16xbf16>, vector<128x16xf32> -> vector<128x16xf32>
    %87 = arith.truncf %86 : vector<128x16xf32> to vector<128x16xbf16>
    %c0_34 = arith.constant 0 : index
    %c0_35 = arith.constant 0 : index
    %88 = vector.load %arg11[%c0_34, %c0_35] : memref<16x128xbf16, #tpu.memory_space<vmem>>, vector<16x128xbf16>
    %cst_36 = arith.constant dense<0.000000e+00> : vector<128x128xf32>
    %89 = tpu.matmul %87, %88, %cst_36 {dimension_numbers = #tpu.dot_dimension_numbers<[1], [0], [0], [1], [0, 0, 1, 1], [], []>} : vector<128x16xbf16>, vector<16x128xbf16>, vector<128x128xf32> -> vector<128x128xf32>
    %c0_37 = arith.constant 0 : index
    %c0_38 = arith.constant 0 : index
    %90 = vector.load %arg12[%c0_37, %c0_38] : memref<1x128xf32, #tpu.memory_space<vmem>>, vector<1x128xf32>
    %91 = vector.broadcast %90 : vector<1x128xf32> to vector<128x128xf32>
    %92 = arith.addf %89, %91 : vector<128x128xf32>
    %cst_39 = arith.constant dense<0xFF800000> : vector<128xf32>
    %93 = vector.multi_reduction <maximumf>, %92, %cst_39 [1] : vector<128x128xf32> to vector<128xf32>
    %94 = vector.shape_cast %93 : vector<128xf32> to vector<128x1xf32>
    %95 = vector.broadcast %94 : vector<128x1xf32> to vector<128x128xf32>
    %96 = arith.subf %92, %95 : vector<128x128xf32>
    %97 = math.exp %96 : vector<128x128xf32>
    %cst_40 = arith.constant dense<0.000000e+00> : vector<128xf32>
    %98 = vector.multi_reduction <add>, %97, %cst_40 [1] : vector<128x128xf32> to vector<128xf32>
    %99 = vector.shape_cast %98 : vector<128xf32> to vector<128x1xf32>
    %100 = math.log %99 : vector<128x1xf32>
    %101 = vector.broadcast %100 : vector<128x1xf32> to vector<128x128xf32>
    %102 = arith.subf %96, %101 : vector<128x128xf32>
    %c0_41 = arith.constant 0 : index
    %c0_42 = arith.constant 0 : index
    %103 = vector.load %arg13[%c0_41, %c0_42] : memref<128x128xf32, #tpu.memory_space<vmem>>, vector<128x128xf32>
    tpu.vector_store %arg13[%c0_41, %c0_42], %102 {strides = array<i32>} : memref<128x128xf32, #tpu.memory_space<vmem>>, vector<128x128xf32>,
    return
  }
}

</mosaic_0001>

<bundles_post_ra>
// kernel: tpu_custom_call.1
= control target key start
LH: loop header
LB: loop body
LE: loop exit
PB: predicated region body
PF: predicated region fallthrough
CT: control target
= control target key end

     0   :  { %s5930_s0 = inlined_call_operand.vmem [shape: bf16[128,128], index: 0, kind: input, shape index: {}]   ;;  %s5931_s1 = inlined_call_operand.vmem [shape: bf16[128,8], index: 1, kind: input, shape index: {}]   ;;  %s5932_s2 = inlined_call_operand.hbm [shape: bf16[8,16], index: 2, kind: input, shape index: {}]   ;;  %s5933_s3 = inlined_call_operand.hbm [shape: f32[1,16], index: 3, kind: input, shape index: {}]   ;;  %s5934_s4 = inlined_call_operand.hbm [shape: bf16[16,16], index: 4, kind: input, shape index: {}]   ;;  %s5935_s5 = inlined_call_operand.hbm [shape: f32[1,16], index: 5, kind: input, shape index: {}]   ;;  %s5936_s6 = inlined_call_operand.hbm [shape: bf16[32,256], index: 6, kind: input, shape index: {}]   ;;  %s5937_s7 = inlined_call_operand.vmem [shape: bf16[96,256], index: 7, kind: input, shape index: {}]   ;;  %s5938_s8 = inlined_call_operand.vmem [shape: f32[1,256], index: 8, kind: input, shape index: {}]   ;;  %s5939_s9 = inlined_call_operand.vmem [shape: bf16[128,2], index: 9, kind: input, shape index: {}]   ;;  %s5940_s10 = inlined_call_operand.<no memory space> [shape: f32[1,1], index: 10, kind: input, shape index: {}]   ;;  %s5941_s11 = inlined_call_operand.vmem [shape: bf16[16,128], index: 11, kind: input, shape index: {}]   ;;  %s5942_s12 = inlined_call_operand.vmem [shape: f32[1,128], index: 12, kind: input, shape index: {}]   ;;  %s5943_s13 = inlined_call_operand.hbm [shape: f32[128,128], index: 13, kind: output, shape index: {}]  }
   0x1   :  { %v18_v0 = vstv %s5940_s10 }
   0x2   :  { %19 = vst [vmem:[#allocation2] sm:$0x1] %v18_v0 }
   0x3   :  { %20 = vsyncpa [#allocation4], 0 }
   0x4   :  { %21 = vsyncpa [#allocation7], 0 }
   0x5   :  { %22 = vsyncpa [#allocation10], 0 }
   0x6   :  { %23 = vsyncpa [#allocation5], 0  ;;  %s4524_s27 = smov [#allocation6]   ;;  %s4525_s29 = smov [#allocation9]  }
   0x7   :  { %s44_s28 = sshll.u32 %s4524_s27, 4  ;;  %s66_s30 = sshll.u32 %s4525_s29, 4  ;;  %s45_s28 = int_to_ptr.vmem [resolvable:$true] %s44_s28  ;;  %s67_s30 = int_to_ptr.vmem [resolvable:$true] %s66_s30 }
   0x8   :  { %s4384_s16 = scalar_lea.hbm %s5933_s3, 16 }
   0x9   :  { %p4385_p0 = scmp.ne.s32.totalorder %s5933_s3, %s4384_s16  ;;  %p4388_p1 = scmp.lt.u32.totalorder %s4384_s16, %s5933_s3 }
   0xb   :  { %p4390_p2 = pnand %p4388_p1, %p4385_p0 }
   0xd   :  { %4393 = shalt.err (!%p4390_p2)
}
   0xe   :  { %s4394_s20 = scalar_lea.vmem %s45_s28, 16  ;;  %s4398_s21 = scalar_lea.vmem %s45_s28, 32 }
   0xf   :  { %p4395_p3 = scmp.ne.s32.totalorder %s45_s28, %s4394_s20  ;;  %p4399_p4 = scmp.lt.s32.totalorder %s45_s28, %s45_s28 }
  0x10   :  { %p4400_p5 = scmp.lt.s32.totalorder %s4398_s21, %s4394_s20 }
  0x12   :  { %p4401_p6 = por %p4400_p5, %p4399_p4 }
  0x14   :  { %p4402_p7 = pnand %p4401_p6, %p4395_p3 }
  0x16   :  { %4405 = shalt.err (!%p4402_p7)
}
  0x17   :  { %47 = dma.hbm_to_vmem [thread:$0]  %s5933_s3, 16, %s45_s28, [#allocation7]  }
  0x18   :  { %s4406_s26 = scalar_lea.hbm %s5935_s5, 16 }
  0x19   :  { %p4407_p8 = scmp.ne.s32.totalorder %s5935_s5, %s4406_s26  ;;  %p4410_p9 = scmp.lt.u32.totalorder %s4406_s26, %s5935_s5 }
  0x1b   :  { %p4412_p10 = pnand %p4410_p9, %p4407_p8 }
  0x1d   :  { %4415 = shalt.err (!%p4412_p10)
}
  0x1e   :  { %s4416_s16 = scalar_lea.vmem %s67_s30, 16  ;;  %s4420_s17 = scalar_lea.vmem %s67_s30, 32 }
  0x1f   :  { %p4417_p11 = scmp.ne.s32.totalorder %s67_s30, %s4416_s16  ;;  %p4421_p12 = scmp.lt.s32.totalorder %s67_s30, %s67_s30 }
  0x20   :  { %p4422_p13 = scmp.lt.s32.totalorder %s4420_s17, %s4416_s16 }
  0x22   :  { %p4423_p0 = por %p4422_p13, %p4421_p12 }
  0x24   :  { %p4424_p1 = pnand %p4423_p0, %p4417_p11 }
  0x26   :  { %4427 = shalt.err (!%p4424_p1)
}
  0x27   :  { %69 = dma.hbm_to_vmem [thread:$0]  %s5935_s5, 16, %s67_s30, [#allocation10]  }
  0x28   :  { %s4526_s18 = smov [#allocation3]   ;;  %s4527_s19 = smov [#allocation8]  }
  0x29   :  { %s34_s10 = sshll.u32 %s4526_s18, 4  ;;  %s53_s20 = sshll.u32 %s4527_s19, 4  ;;  %s35_s10 = int_to_ptr.vmem [resolvable:$true] %s34_s10  ;;  %s4635_s20 = int_to_ptr.vmem [resolvable:$true] %s53_s20 }
  0x2a   :  { %s4428_s23 = scalar_lea.hbm %s5932_s2, 64 }
  0x2b   :  { %p4429_p2 = scmp.ne.s32.totalorder %s5932_s2, %s4428_s23  ;;  %p4432_p3 = scmp.lt.u32.totalorder %s4428_s23, %s5932_s2 }
  0x2d   :  { %p4434_p4 = pnand %p4432_p3, %p4429_p2 }
  0x2f   :  { %4437 = shalt.err (!%p4434_p4)
}
  0x30   :  { %s4438_s5 = scalar_lea.vmem %s35_s10, 64  ;;  %p4443_p6 = scmp.lt.s32.totalorder %s35_s10, %s35_s10 }
  0x31   :  { %p4439_p5 = scmp.ne.s32.totalorder %s35_s10, %s4438_s5  ;;  %p4444_p7 = scmp.lt.s32.totalorder %s4438_s5, %s4438_s5 }
  0x33   :  { %p4445_p8 = por %p4444_p7, %p4443_p6 }
  0x35   :  { %p4446_p9 = pnand %p4445_p8, %p4439_p5 }
  0x37   :  { %4449 = shalt.err (!%p4446_p9)
}
  0x38   :  { %37 = dma.hbm_to_vmem [thread:$0]  %s5932_s2, 64, %s35_s10, [#allocation4]  }
  0x39   :  { %s4450_s16 = scalar_lea.hbm %s5934_s4, 128 }
  0x3a   :  { %p4451_p10 = scmp.ne.s32.totalorder %s5934_s4, %s4450_s16  ;;  %p4454_p11 = scmp.lt.u32.totalorder %s4450_s16, %s5934_s4 }
  0x3c   :  { %p4456_p12 = pnand %p4454_p11, %p4451_p10 }
  0x3e   :  { %4459 = shalt.err (!%p4456_p12)
}
  0x3f   :  { %s4460_s19 = scalar_lea.vmem %s4635_s20, 128  ;;  %p4465_p0 = scmp.lt.s32.totalorder %s4635_s20, %s4635_s20 }
  0x40   :  { %p4461_p13 = scmp.ne.s32.totalorder %s4635_s20, %s4460_s19  ;;  %p4466_p1 = scmp.lt.s32.totalorder %s4460_s19, %s4460_s19 }
  0x42   :  { %p4467_p2 = por %p4466_p1, %p4465_p0 }
  0x44   :  { %p4468_p3 = pnand %p4467_p2, %p4461_p13 }
  0x46   :  { %4471 = shalt.err (!%p4468_p3)
}
  0x47   :  { %s4528_s2 = smov 64   ;;  %s4529_s10 = smov 4  }
  0x48   :  { %59 = dma.hbm_to_vmem [thread:$0]  %s5934_s4, 128, %s4635_s20, [#allocation7], %s4528_s2, %s4528_s2, %s4529_s10  }
  0x49   :  { %s4530_s23 = smov [#allocation11]   ;;  %s4472_s27 = scalar_lea.hbm %s5936_s6, 512 }
  0x4a   :  { %s75_s24 = sshll.u32 %s4530_s23, 4  ;;  %p4473_p4 = scmp.ne.s32.totalorder %s5936_s6, %s4472_s27  ;;  %s76_s24 = int_to_ptr.vmem [resolvable:$true] %s75_s24 }
  0x4b   :  { %p4476_p5 = scmp.lt.u32.totalorder %s4472_s27, %s5936_s6 }
  0x4d   :  { %p4478_p6 = pnand %p4476_p5, %p4473_p4 }
  0x4f   :  { %4481 = shalt.err (!%p4478_p6)
}
  0x50   :  { %s4482_s15 = scalar_lea.vmem %s76_s24, 512  ;;  %p4487_p8 = scmp.lt.s32.totalorder %s76_s24, %s76_s24 }
  0x51   :  { %p4483_p7 = scmp.ne.s32.totalorder %s76_s24, %s4482_s15  ;;  %p4488_p9 = scmp.lt.s32.totalorder %s4482_s15, %s4482_s15 }
  0x53   :  { %p4489_p10 = por %p4488_p9, %p4487_p8 }
  0x55   :  { %p4490_p11 = pnand %p4489_p10, %p4483_p7 }
  0x57   :  { %4493 = shalt.err (!%p4490_p11)
}
  0x58   :  { %s4531_s4 = smov 128   ;;  %s4532_s20 = smov 8  }
  0x59   :  { %81 = dma.hbm_to_vmem [thread:$0]  %s5936_s6, 512, %s76_s24, [#allocation10], %s4531_s4, %s4531_s4, %s4532_s20  }
  0x5a   :  { %4516 = dma.done.wait [#allocation4], 64  }
  0x5b   :  { %4517 = vsyncadd [#allocation4], 4294967232 }
  0x5c   :  { %4518 = dma.done.wait [#allocation7], 144  }
  0x5d   :  { %4519 = vsyncadd [#allocation7], 4294967152 }
  0x5e   :  { %4520 = dma.done.wait [#allocation10], 528  }
  0x5f   :  { %4521 = vsyncadd [#allocation10], 4294966768  ;;  %v3814_v1 = vld [vmem:[%s5931_s1] sm:$0xff]   ;;  %v3815_v2 = vld [vmem:[%s5931_s1 + $0x8] sm:$0xff]   ;;  %vm376_vm0 = vcmask 1043456   ;;  %vm351_vm1 = vcmask 64512  }
  0x60   :  { %3433 = vmatprep.subr.bf16.mxu0 %v3814_v1  ;;  %v3816_v3 = vld [vmem:[%s5931_s1 + $0x10] sm:$0xff]   ;;  %v3817_v4 = vld [vmem:[%s5931_s1 + $0x18] sm:$0xff]   ;;  %v3822_v5 = vld [vmem:[%s5930_s0] sm:$0xff]   ;;  %vm509_vm2 = vcmask 130048   ;;  %s4534_s26 = smov 16   ;;  %vm883_vm3 = vcmask 261120  }
  0x61   :  { %3434 = vmatpush3.bf16.msra.mxu0 %v3814_v1  ;;  %3449 = vmatprep.mubr.bf16.mxu0 %v3822_v5  ;;  %v3818_v6 = vld [vmem:[%s5931_s1 + $0x20] sm:$0xff]   ;;  %v3819_v7 = vld [vmem:[%s5931_s1 + $0x28] sm:$0xff]   ;;  %v3820_v8 = vld [vmem:[%s5931_s1 + $0x30] sm:$0xff]   ;;  %vm1581_vm4 = vcmask 785408   ;;  %vm2183_vm5 = vcmask 523264   ;;  %vm2379_vm6 = vcmask 15360  }
  0x62   :  { %3435 = vmatprep.subr.bf16.mxu0 %v3815_v2  ;;  %v3821_v9 = vld [vmem:[%s5931_s1 + $0x38] sm:$0xff]   ;;  %v4713_v10 = vld [vmem:[%s5930_s0 + $0x8] sm:$0xff]   ;;  %v4718_v11 = vld [vmem:[%s5930_s0 + $0x10] sm:$0xff]  }
  0x63   :  { %v4725_v12 = vld [vmem:[%s5930_s0 + $0x18] sm:$0xff]   ;;  %v4730_v13 = vld [vmem:[%s5930_s0 + $0x20] sm:$0xff]   ;;  %v4737_v14 = vld [vmem:[%s5930_s0 + $0x28] sm:$0xff]  }
  0x64   :  { %v4742_v15 = vld [vmem:[%s5930_s0 + $0x30] sm:$0xff]   ;;  %v4749_v16 = vld [vmem:[%s5930_s0 + $0x38] sm:$0xff]   ;;  %v343_v17 = vld [vmem:[#allocation3] sm:$0xf] }
  0x65   :  { %3436 = vmatpush3.bf16.msra.mxu0 %v3815_v2  ;;  %3615 = vmatprep.subr.msk.bf16.mxu1 %vm376_vm0, %v343_v17  ;;  %v378_v18 = vsel %vm376_vm0, %v343_v17, 0  ;;  %v3830_v19 = vld [vmem:[#allocation8] sm:$0xff]   ;;  %v3208_v44 = vld [vmem:[#allocation6] ss:$0 sm:$0xff] }
  0x66   :  { %3437 = vmatprep.subr.bf16.mxu0 %v3816_v3  ;;  %3466 = vmatpush3.bf16.msra.mxu1 %v378_v18 }
  0x67   :  { %3483 = vmatprep.subr.bf16.mxu1 %v3830_v19 }
  0x69   :  { %3438 = vmatpush3.bf16.msra.mxu0 %v3816_v3 }
  0x6a   :  { %3439 = vmatprep.subr.bf16.mxu0 %v3817_v4 }
  0x6d   :  { %3440 = vmatpush3.bf16.msra.mxu0 %v3817_v4 }
  0x6e   :  { %3441 = vmatprep.subr.bf16.mxu0 %v3818_v6 }
  0x71   :  { %3442 = vmatpush3.bf16.msra.mxu0 %v3818_v6 }
  0x72   :  { %3443 = vmatprep.subr.bf16.mxu0 %v3819_v7 }
  0x75   :  { %3444 = vmatpush3.bf16.msra.mxu0 %v3819_v7 }
  0x76   :  { %3445 = vmatprep.subr.bf16.mxu0 %v3820_v8 }
  0x79   :  { %3446 = vmatpush3.bf16.msra.mxu0 %v3820_v8 }
  0x7a   :  { %3447 = vmatprep.subr.bf16.mxu0 %v3821_v9 }
  0x7d   :  { %3448 = vmatpush3.bf16.msra.mxu0 %v3821_v9 }
  0x80   :  { %3450 = vmatmul.mubr.bf16.vlgmr.msra.gmra.mrb[0].mxu0 %v4713_v10 }
  0x81   :  { %3453 = vmatprep.mubr.bf16.mxu0 %v4718_v11 }
  0x88   :  { %3454 = vmatmul.mubr.bf16.gmra.mrb[4].mxu0 %v4725_v12 }
  0x89   :  { %3457 = vmatprep.mubr.bf16.mxu0 %v4730_v13 }
  0x90   :  { %3458 = vmatmul.mubr.bf16.gmra.mrb[8].mxu0 %v4737_v14 }
  0x91   :  { %3461 = vmatprep.mubr.bf16.mxu0 %v4742_v15 }
  0x98   :  { %3462 = vmatmul.mubr.bf16.gmra.mrb[12].mxu0 %v4749_v16 }
  0x99   :  { %3517 = vmatprep.mubr.bf16.mxu0 %v3822_v5 }
 0x153   :  { %v3451_v20 = vpop.f32.mrb[0].mxu0 }
 0x154   :  { %v272_v21 = vpop.f32.mrb[1].mxu0 }
 0x155   :  { %v3452_v22 = vpop.f32.mrb[2].mxu0 }
 0x156   :  { %v336_v23 = vpack.c.bf16 %v3452_v22, %v3451_v20  ;;  %v275_v24 = vpop.f32.mrb[3].mxu0 }
 0x157   :  { %v335_v25 = vpack.c.bf16 %v275_v24, %v272_v21 }
 0x159   :  { %3467 = vmatprep.mubr.msk.bf16.mxu1 %vm351_vm1, %v335_v25 }
 0x15a   :  { %3468 = vmatmul.mubr.msk.bf16.vlgmr.msra.gmra.mrb[0].mxu1 %vm351_vm1, %v336_v23 }
 0x15b   :  { %v3455_v26 = vpop.f32.mrb[4].mxu0  ;;  %3484 = vmatpush3.bf16.msra.mxu1 %v3830_v19 }
 0x15c   :  { %v288_v27 = vpop.f32.mrb[5].mxu0 }
 0x15d   :  { %v3456_v28 = vpop.f32.mrb[6].mxu0 }
 0x15e   :  { %v338_v29 = vpack.c.bf16 %v3456_v28, %v3455_v26  ;;  %v291_v30 = vpop.f32.mrb[7].mxu0 }
 0x15f   :  { %v337_v31 = vpack.c.bf16 %v291_v30, %v288_v27 }
 0x161   :  { %3471 = vmatprep.mubr.msk.bf16.mxu1 %vm351_vm1, %v337_v31 }
 0x162   :  { %3472 = vmatmul.mubr.msk.bf16.gmra.mrb[4].mxu1 %vm351_vm1, %v338_v29 }
 0x163   :  { %v3459_v32 = vpop.f32.mrb[8].mxu0 }
 0x164   :  { %v304_v33 = vpop.f32.mrb[9].mxu0 }
 0x165   :  { %v3460_v34 = vpop.f32.mrb[10].mxu0 }
 0x166   :  { %v340_v35 = vpack.c.bf16 %v3460_v34, %v3459_v32  ;;  %v307_v36 = vpop.f32.mrb[11].mxu0 }
 0x167   :  { %v339_v37 = vpack.c.bf16 %v307_v36, %v304_v33 }
 0x169   :  { %3475 = vmatprep.mubr.msk.bf16.mxu1 %vm351_vm1, %v339_v37 }
 0x16a   :  { %3476 = vmatmul.mubr.msk.bf16.gmra.mrb[8].mxu1 %vm351_vm1, %v340_v35 }
 0x16b   :  { %v3463_v38 = vpop.f32.mrb[12].mxu0 }
 0x16c   :  { %v320_v39 = vpop.f32.mrb[13].mxu0 }
 0x16d   :  { %v3464_v40 = vpop.f32.mrb[14].mxu0 }
 0x16e   :  { %v342_v41 = vpack.c.bf16 %v3464_v40, %v3463_v38  ;;  %v323_v42 = vpop.f32.mrb[15].mxu0 }
 0x16f   :  { %v341_v43 = vpack.c.bf16 %v323_v42, %v320_v39 }
 0x171   :  { %3479 = vmatprep.mubr.msk.bf16.mxu1 %vm351_vm1, %v341_v43 }
 0x172   :  { %3480 = vmatmul.mubr.msk.bf16.gmra.mrb[12].mxu1 %vm351_vm1, %v342_v41 }
 0x22d   :  { %v3469_v45 = vpop.f32.mrb[0].mxu1 }
 0x22e   :  { %v414_v46 = vpop.f32.mrb[1].mxu1  ;;  %v423_v49 = vadd.f32 %v3469_v45, %v3208_v44 }
 0x22f   :  { %v415_v47 = vadd.f32 %v3208_v44, %v414_v46  ;;  %v3470_v48 = vpop.f32.mrb[2].mxu1 }
 0x230   :  { %v426_v50 = vadd.f32 %v3470_v48, %v3208_v44  ;;  %v417_v51 = vpop.f32.mrb[3].mxu1  ;;  %v4766_v56 = vmax.f32 %v423_v49, 0.0 }
 0x231   :  { %v418_v52 = vadd.f32 %v3208_v44, %v417_v51  ;;  %v4762_v54 = vmax.f32 %v415_v47, 0.0 }
 0x232   :  { %v4760_v53 = vmax.f32 %v426_v50, 0.0  ;;  %5991 = vst [vmem:[#allocation20_spill] sm:$0xff] %v4766_v56 }
 0x233   :  { %5989 = vst [vmem:[#allocation18_spill] sm:$0xff] %v4762_v54  ;;  %v4764_v55 = vmax.f32 %v418_v52, 0.0 }
 0x234   :  { %5988 = vst [vmem:[#allocation17_spill] sm:$0xff] %v4760_v53  ;;  %v494_v59 = vpack.c.bf16 %v4760_v53, %v4766_v56 }
 0x235   :  { %5990 = vst [vmem:[#allocation19_spill] sm:$0xff] %v4764_v55  ;;  %v3473_v57 = vpop.f32.mrb[4].mxu1  ;;  %v493_v58 = vpack.c.bf16 %v4764_v55, %v4762_v54 }
 0x236   :  { %v430_v60 = vpop.f32.mrb[5].mxu1  ;;  %v439_v63 = vadd.f32 %v3473_v57, %v3208_v44 }
 0x237   :  { %v431_v61 = vadd.f32 %v3208_v44, %v430_v60  ;;  %v3474_v62 = vpop.f32.mrb[6].mxu1  ;;  %3485 = vmatprep.mubr.msk.bf16.mxu1 %vm509_vm2, %v493_v58 }
 0x238   :  { %v442_v0 = vadd.f32 %v3474_v62, %v3208_v44  ;;  %v433_v1 = vpop.f32.mrb[7].mxu1  ;;  %3486 = vmatmul.mubr.msk.bf16.vlgmr.msra.gmra.mrb[16].mxu1 %vm509_vm2, %v494_v59  ;;  %v4780_v6 = vmax.f32 %v439_v63, 0.0 }
 0x239   :  { %v434_v2 = vadd.f32 %v3208_v44, %v433_v1  ;;  %v4776_v4 = vmax.f32 %v431_v61, 0.0 }
 0x23a   :  { %v4774_v3 = vmax.f32 %v442_v0, 0.0  ;;  %5995 = vst [vmem:[#allocation24_spill] sm:$0xff] %v4780_v6 }
 0x23b   :  { %5993 = vst [vmem:[#allocation22_spill] sm:$0xff] %v4776_v4  ;;  %v4778_v5 = vmax.f32 %v434_v2, 0.0 }
 0x23c   :  { %5992 = vst [vmem:[#allocation21_spill] sm:$0xff] %v4774_v3  ;;  %v496_v17 = vpack.c.bf16 %v4774_v3, %v4780_v6 }
 0x23d   :  { %5994 = vst [vmem:[#allocation23_spill] sm:$0xff] %v4778_v5  ;;  %v3477_v7 = vpop.f32.mrb[8].mxu1  ;;  %v495_v8 = vpack.c.bf16 %v4778_v5, %v4776_v4 }
 0x23e   :  { %v446_v9 = vpop.f32.mrb[9].mxu1  ;;  %v455_v20 = vadd.f32 %v3477_v7, %v3208_v44 }
 0x23f   :  { %v447_v18 = vadd.f32 %v3208_v44, %v446_v9  ;;  %v3478_v19 = vpop.f32.mrb[10].mxu1  ;;  %3489 = vmatprep.mubr.msk.bf16.mxu1 %vm509_vm2, %v495_v8 }
 0x240   :  { %v458_v21 = vadd.f32 %v3478_v19, %v3208_v44  ;;  %v449_v22 = vpop.f32.mrb[11].mxu1  ;;  %3490 = vmatmul.mubr.msk.bf16.gmra.mrb[20].mxu1 %vm509_vm2, %v496_v17  ;;  %v4794_v27 = vmax.f32 %v455_v20, 0.0  ;;  %v3831_v19 = vld [vmem:[#allocation11] ss:$8 sps:$4 sm:$0xff]   ;;  %v3833_v20 = vld [vmem:[#allocation11 + $0x4] ss:$8 sps:$4 sm:$0xff]  }
 0x241   :  { %v450_v23 = vadd.f32 %v3208_v44, %v449_v22  ;;  %v4790_v25 = vmax.f32 %v447_v18, 0.0  ;;  %908 = vmatprep.subr.bf16.mxu1 %v3833_v20  ;;  %v3834_v22 = vld [vmem:[#allocation11 + $0x10] ss:$8 sps:$4 sm:$0xff]  }
 0x242   :  { %v4788_v24 = vmax.f32 %v458_v21, 0.0  ;;  %5999 = vst [vmem:[#allocation28_spill] sm:$0xff] %v4794_v27  ;;  %v3836_v21 = vld [vmem:[#allocation11 + $0x14] ss:$8 sps:$4 sm:$0xff]   ;;  %909 = vmatpush1.bf16.msra.mxu1 %v3831_v19 }
 0x243   :  { %5997 = vst [vmem:[#allocation26_spill] sm:$0xff] %v4790_v25  ;;  %v4792_v26 = vmax.f32 %v450_v23, 0.0  ;;  %910 = vmatprep.subr.bf16.mxu1 %v3836_v21  ;;  %v5944_v23 = vmov 0  }
 0x244   :  { %5996 = vst [vmem:[#allocation25_spill] sm:$0xff] %v4788_v24  ;;  %v498_v31 = vpack.c.bf16 %v4788_v24, %v4794_v27  ;;  %3790 = vset.pattern.permute.xlu0 %v5944_v23  ;;  %3792 = vset.pattern.permute.xlu1 %v5944_v23 }
 0x245   :  { %5998 = vst [vmem:[#allocation27_spill] sm:$0xff] %v4792_v26  ;;  %v3481_v28 = vpop.f32.mrb[12].mxu1  ;;  %v497_v29 = vpack.c.bf16 %v4792_v26, %v4790_v25 }
 0x246   :  { %v462_v30 = vpop.f32.mrb[13].mxu1  ;;  %v471_v34 = vadd.f32 %v3481_v28, %v3208_v44  ;;  %911 = vmatpush1.bf16.msra.mxu1 %v3834_v22 }
 0x247   :  { %v463_v32 = vadd.f32 %v3208_v44, %v462_v30  ;;  %v3482_v33 = vpop.f32.mrb[14].mxu1  ;;  %3493 = vmatprep.mubr.msk.bf16.mxu1 %vm509_vm2, %v497_v29 }
 0x248   :  { %v474_v35 = vadd.f32 %v3482_v33, %v3208_v44  ;;  %v465_v36 = vpop.f32.mrb[15].mxu1  ;;  %3494 = vmatmul.mubr.msk.bf16.gmra.mrb[24].mxu1 %vm509_vm2, %v498_v31  ;;  %v4808_v41 = vmax.f32 %v471_v34, 0.0 }
 0x249   :  { %v466_v37 = vadd.f32 %v3208_v44, %v465_v36  ;;  %v4804_v39 = vmax.f32 %v463_v32, 0.0 }
 0x24a   :  { %v4802_v38 = vmax.f32 %v474_v35, 0.0  ;;  %6003 = vst [vmem:[#allocation32_spill] sm:$0xff] %v4808_v41 }
 0x24b   :  { %6001 = vst [vmem:[#allocation30_spill] sm:$0xff] %v4804_v39  ;;  %v4806_v40 = vmax.f32 %v466_v37, 0.0 }
 0x24c   :  { %6000 = vst [vmem:[#allocation29_spill] sm:$0xff] %v4802_v38  ;;  %v500_v43 = vpack.c.bf16 %v4802_v38, %v4808_v41 }
 0x24d   :  { %6002 = vst [vmem:[#allocation31_spill] sm:$0xff] %v4806_v40  ;;  %v499_v42 = vpack.c.bf16 %v4806_v40, %v4804_v39 }
 0x24f   :  { %3497 = vmatprep.mubr.msk.bf16.mxu1 %vm509_vm2, %v499_v42 }
 0x250   :  { %3498 = vmatmul.mubr.msk.bf16.gmra.mrb[28].mxu1 %vm509_vm2, %v500_v43 }
 0x251   :  { %940 = vmatprep.mubr.bf16.mxu1 %v5944_v23 }
 0x30b   :  { %v3487_v45 = vpop.f32.mrb[16].mxu1 }
 0x30c   :  { %v568_v44 = vpop.f32.mrb[17].mxu1 }
 0x30d   :  { %v3488_v46 = vpop.f32.mrb[18].mxu1 }
 0x30e   :  { %v632_v47 = vpack.c.bf16 %v3488_v46, %v3487_v45  ;;  %v571_v48 = vpop.f32.mrb[19].mxu1 }
 0x30f   :  { %v631_v49 = vpack.c.bf16 %v571_v48, %v568_v44 }
 0x311   :  { %3501 = vmatprep.subr.bf16.mxu0 %v631_v49 }
 0x312   :  { %3502 = vmatpush3.bf16.msra.mxu0 %v631_v49 }
 0x313   :  { %v3491_v50 = vpop.f32.mrb[20].mxu1  ;;  %3503 = vmatprep.subr.bf16.mxu0 %v632_v47 }
 0x314   :  { %v584_v51 = vpop.f32.mrb[21].mxu1 }
 0x315   :  { %v3492_v52 = vpop.f32.mrb[22].mxu1 }
 0x316   :  { %v634_v57 = vpack.c.bf16 %v3492_v52, %v3491_v50  ;;  %v587_v58 = vpop.f32.mrb[23].mxu1  ;;  %3504 = vmatpush3.bf16.msra.mxu0 %v632_v47 }
 0x317   :  { %v633_v59 = vpack.c.bf16 %v587_v58, %v584_v51 }
 0x319   :  { %3505 = vmatprep.subr.bf16.mxu0 %v633_v59 }
 0x31a   :  { %3506 = vmatpush3.bf16.msra.mxu0 %v633_v59 }
 0x31b   :  { %v3495_v60 = vpop.f32.mrb[24].mxu1  ;;  %3507 = vmatprep.subr.bf16.mxu0 %v634_v57 }
 0x31c   :  { %v600_v61 = vpop.f32.mrb[25].mxu1 }
 0x31d   :  { %v3496_v62 = vpop.f32.mrb[26].mxu1 }
 0x31e   :  { %v636_v63 = vpack.c.bf16 %v3496_v62, %v3495_v60  ;;  %v603_v0 = vpop.f32.mrb[27].mxu1  ;;  %3508 = vmatpush3.bf16.msra.mxu0 %v634_v57 }
 0x31f   :  { %v635_v1 = vpack.c.bf16 %v603_v0, %v600_v61 }
 0x321   :  { %3509 = vmatprep.subr.bf16.mxu0 %v635_v1 }
 0x322   :  { %3510 = vmatpush3.bf16.msra.mxu0 %v635_v1 }
 0x323   :  { %v3499_v2 = vpop.f32.mrb[28].mxu1  ;;  %3511 = vmatprep.subr.bf16.mxu0 %v636_v63 }
 0x324   :  { %v616_v7 = vpop.f32.mrb[29].mxu1 }
 0x325   :  { %v3500_v8 = vpop.f32.mrb[30].mxu1 }
 0x326   :  { %v638_v9 = vpack.c.bf16 %v3500_v8, %v3499_v2  ;;  %v619_v17 = vpop.f32.mrb[31].mxu1  ;;  %3512 = vmatpush3.bf16.msra.mxu0 %v636_v63 }
 0x327   :  { %v637_v18 = vpack.c.bf16 %v619_v17, %v616_v7 }
 0x329   :  { %3513 = vmatprep.subr.bf16.mxu0 %v637_v18 }
 0x32a   :  { %3514 = vmatpush3.bf16.msra.mxu0 %v637_v18 }
 0x32b   :  { %3515 = vmatprep.subr.bf16.mxu0 %v638_v9 }
 0x32e   :  { %3516 = vmatpush3.bf16.msra.mxu0 %v638_v9 }
 0x331   :  { %3518 = vmatmul.mubr.bf16.vlgmr.msra.gmra.mrb[16].mxu0 %v4713_v10  ;;  %v4823_v10 = vld [vmem:[#allocation9] ss:$0 sm:$0xff] }
 0x332   :  { %3521 = vmatprep.mubr.bf16.mxu0 %v4718_v11 }
 0x339   :  { %3522 = vmatmul.mubr.bf16.gmra.mrb[20].mxu0 %v4725_v12 }
 0x33a   :  { %3525 = vmatprep.mubr.bf16.mxu0 %v4730_v13 }
 0x341   :  { %3526 = vmatmul.mubr.bf16.gmra.mrb[24].mxu0 %v4737_v14 }
 0x342   :  { %3529 = vmatprep.mubr.bf16.mxu0 %v4742_v15 }
 0x349   :  { %3530 = vmatmul.mubr.bf16.gmra.mrb[28].mxu0 %v4749_v16 }
 0x34a   :  { %1638 = vmatprep.mubr.bf16.mxu0 %v5944_v23 }
 0x404   :  { %v3519_v11 = vpop.f32.mrb[16].mxu0 }
 0x405   :  { %v680_v12 = vpop.f32.mrb[17].mxu0  ;;  %v689_v29 = vadd.f32 %v3519_v11, %v4823_v10 }
 0x406   :  { %v681_v13 = vadd.f32 %v4823_v10, %v680_v12  ;;  %v3520_v14 = vpop.f32.mrb[18].mxu0 }
 0x407   :  { %v683_v15 = vpop.f32.mrb[19].mxu0  ;;  %v692_v16 = vadd.f32 %v3520_v14, %v4823_v10  ;;  %v4841_v36 = vmax.f32 %v689_v29, 0.0 }
 0x408   :  { %v684_v28 = vadd.f32 %v4823_v10, %v683_v15  ;;  %v4833_v30 = vmax.f32 %v681_v13, 0.0 }
 0x409   :  { %v4837_v32 = vmax.f32 %v692_v16, 0.0  ;;  %6005 = vst [vmem:[#allocation34_spill] sm:$0xff] %v4841_v36 }
 0x40a   :  { %v4835_v31 = vmax.f32 %v684_v28, 0.0 }
 0x40b   :  { %v3635_v48 = vpack.i.bf16 %v4837_v32, %v4841_v36 }
 0x40c   :  { %6004 = vst [vmem:[#allocation33_spill] sm:$0xff] %v4835_v31  ;;  %v3523_v33 = vpop.f32.mrb[20].mxu0  ;;  %v3630_v34 = vpack.i.bf16 %v4835_v31, %v4833_v30 }
 0x40d   :  { %v696_v35 = vpop.f32.mrb[21].mxu0  ;;  %v705_v37 = vadd.f32 %v3523_v33, %v4823_v10 }
 0x40e   :  { %v697_v42 = vadd.f32 %v4823_v10, %v696_v35  ;;  %v3524_v43 = vpop.f32.mrb[22].mxu0  ;;  %3631 = vrot.lane.b32.xlu0 %v3630_v34, %s4534_s26 }
 0x40f   :  { %v708_v45 = vadd.f32 %v3524_v43, %v4823_v10  ;;  %v699_v44 = vpop.f32.mrb[23].mxu0  ;;  %v4852_v49 = vmax.f32 %v705_v37, 0.0 }
 0x410   :  { %v4847_v46 = vmax.f32 %v697_v42, 0.0  ;;  %v700_v47 = vadd.f32 %v4823_v10, %v699_v44 }
 0x411   :  { %6007 = vst [vmem:[#allocation36_spill] sm:$0xff] %v4852_v49  ;;  %v4854_v50 = vmax.f32 %v708_v45, 0.0 }
 0x412   :  { %6006 = vst [vmem:[#allocation35_spill] sm:$0xff] %v4847_v46  ;;  %v4856_v51 = vmax.f32 %v700_v47, 0.0  ;;  %3636 = vrot.lane.b32.xlu0 %v3635_v48, %s4534_s26 }
 0x413   :  { %6008 = vst [vmem:[#allocation37_spill] sm:$0xff] %v4854_v50  ;;  %v3645_v62 = vpack.i.bf16 %v4854_v50, %v4852_v49 }
 0x414   :  { %6009 = vst [vmem:[#allocation38_spill] sm:$0xff] %v4856_v51  ;;  %v3527_v52 = vpop.f32.mrb[24].mxu0  ;;  %v3640_v57 = vpack.i.bf16 %v4856_v51, %v4847_v46 }
 0x415   :  { %v721_v58 = vadd.f32 %v3527_v52, %v4823_v10  ;;  %v712_v59 = vpop.f32.mrb[25].mxu0 }
 0x416   :  { %v713_v60 = vadd.f32 %v4823_v10, %v712_v59  ;;  %v3528_v61 = vpop.f32.mrb[26].mxu0  ;;  %3641 = vrot.lane.b32.xlu1 %v3640_v57, %s4534_s26 }
 0x417   :  { %v4866_v63 = vmax.f32 %v721_v58, 0.0  ;;  %v724_v0 = vadd.f32 %v3528_v61, %v4823_v10  ;;  %v715_v1 = vpop.f32.mrb[27].mxu0 }
 0x418   :  { %v4869_v2 = vmax.f32 %v713_v60, 0.0  ;;  %v716_v7 = vadd.f32 %v4823_v10, %v715_v1 }
 0x419   :  { %6010 = vst [vmem:[#allocation39_spill] sm:$0xff] %v4866_v63  ;;  %v4872_v8 = vmax.f32 %v724_v0, 0.0 }
 0x41a   :  { %6011 = vst [vmem:[#allocation40_spill] sm:$0xff] %v4869_v2  ;;  %v4874_v9 = vmax.f32 %v716_v7, 0.0  ;;  %3646 = vrot.lane.b32.xlu1 %v3645_v62, %s4534_s26 }
 0x41b   :  { %6012 = vst [vmem:[#allocation41_spill] sm:$0xff] %v4872_v8  ;;  %v3655_v17 = vpack.i.bf16 %v4872_v8, %v4866_v63 }
 0x41c   :  { %6013 = vst [vmem:[#allocation42_spill] sm:$0xff] %v4874_v9  ;;  %v3531_v18 = vpop.f32.mrb[28].mxu0  ;;  %v3650_v19 = vpack.i.bf16 %v4874_v9, %v4869_v2 }
 0x41d   :  { %v737_v20 = vadd.f32 %v3531_v18, %v4823_v10  ;;  %v728_v21 = vpop.f32.mrb[29].mxu0 }
 0x41e   :  { %v729_v22 = vadd.f32 %v4823_v10, %v728_v21  ;;  %v3532_v11 = vpop.f32.mrb[30].mxu0  ;;  %3656 = vrot.lane.b32.xlu1 %v3655_v17, %s4534_s26  ;;  %3651 = vrot.lane.b32.xlu0 %v3650_v19, %s4534_s26 }
 0x41f   :  { %v4885_v12 = vmax.f32 %v737_v20, 0.0  ;;  %v740_v13 = vadd.f32 %v3532_v11, %v4823_v10  ;;  %v731_v14 = vpop.f32.mrb[31].mxu0 }
 0x420   :  { %v4888_v15 = vmax.f32 %v729_v22, 0.0  ;;  %v732_v16 = vadd.f32 %v4823_v10, %v731_v14 }
 0x421   :  { %6014 = vst [vmem:[#allocation43_spill] sm:$0xff] %v4885_v12  ;;  %v4891_v28 = vmax.f32 %v740_v13, 0.0 }
 0x422   :  { %6015 = vst [vmem:[#allocation44_spill] sm:$0xff] %v4888_v15  ;;  %v4893_v29 = vmax.f32 %v732_v16, 0.0 }
 0x423   :  { %6016 = vst [vmem:[#allocation45_spill] sm:$0xff] %v4891_v28  ;;  %v3665_v33 = vpack.i.bf16 %v4891_v28, %v4885_v12 }
 0x424   :  { %6017 = vst [vmem:[#allocation46_spill] sm:$0xff] %v4893_v29  ;;  %v3660_v34 = vpack.i.bf16 %v4893_v29, %v4888_v15 }
 0x425   :  { %3666 = vrot.lane.b32.xlu1 %v3665_v33, %s4534_s26 }
 0x426   :  { %3661 = vrot.lane.b32.xlu0 %v3660_v34, %s4534_s26 }
 0x480   :  { %v3632_v35 = vpop.permute.xlu0 %3631 }
 0x481   :  { %v3634_v37 = vunpack.i.h.bf16 %v3632_v35  ;;  %v3633_v42 = vunpack.i.l.bf16 %v3632_v35 }
 0x483   :  { %v825_v10 = vsel %vm509_vm2, %v4764_v55, %v3634_v37  ;;  %v824_v43 = vsel %vm509_vm2, %v4762_v54, %v3633_v42 }
 0x484   :  { %v840_v45 = vpack.c.bf16 %v825_v10, %v824_v43  ;;  %v3637_v44 = vpop.permute.xlu0 %3636 }
 0x485   :  { %v3639_v47 = vunpack.i.h.bf16 %v3637_v44  ;;  %v3638_v48 = vunpack.i.l.bf16 %v3637_v44 }
 0x486   :  { %3231 = vmatmul.mubr.msk.bf16.vlgmr.msra.gmra.mrb[32].mxu1 %vm883_vm3, %v840_v45 }
 0x487   :  { %950 = vmatprep.mubr.bf16.mxu1 %v5944_v23  ;;  %v827_v52 = vsel %vm509_vm2, %v4760_v53, %v3639_v47  ;;  %v826_v57 = vsel %vm509_vm2, %v4766_v56, %v3638_v48 }
 0x488   :  { %v3642_v58 = vpop.permute.xlu1 %3641  ;;  %v841_v59 = vpack.c.bf16 %v827_v52, %v826_v57 }
 0x489   :  { %v3644_v60 = vunpack.i.h.bf16 %v3642_v58  ;;  %v3643_v61 = vunpack.i.l.bf16 %v3642_v58 }
 0x48b   :  { %v829_v62 = vsel %vm509_vm2, %v4778_v5, %v3644_v60  ;;  %v828_v0 = vsel %vm509_vm2, %v4776_v4, %v3643_v61 }
 0x48c   :  { %v3647_v1 = vpop.permute.xlu1 %3646  ;;  %v842_v7 = vpack.c.bf16 %v829_v62, %v828_v0 }
 0x48d   :  { %v3649_v17 = vunpack.i.h.bf16 %v3647_v1  ;;  %v3648_v18 = vunpack.i.l.bf16 %v3647_v1  ;;  %v853_v1 = vlaneseq }
 0x48e   :  { %3232 = vmatmul.mubr.msk.bf16.gmra.mrb[36].mxu1 %vm883_vm3, %v841_v59 }
 0x48f   :  { %960 = vmatprep.mubr.bf16.mxu1 %v5944_v23  ;;  %v831_v19 = vsel %vm509_vm2, %v4774_v3, %v3649_v17  ;;  %v830_v20 = vsel %vm509_vm2, %v4780_v6, %v3648_v18  ;;  %v759_v18 = vld [vmem:[%s5938_s8] sm:$0x3] }
 0x490   :  { %v3652_v21 = vpop.permute.xlu0 %3651  ;;  %v843_v22 = vpack.c.bf16 %v831_v19, %v830_v20  ;;  %v3657_v33 = vpop.permute.xlu1 %3656 }
 0x491   :  { %v3654_v11 = vunpack.i.h.bf16 %v3652_v21  ;;  %v3653_v13 = vunpack.i.l.bf16 %v3652_v21  ;;  %v3659_v35 = vunpack.i.h.bf16 %v3657_v33  ;;  %v3658_v37 = vunpack.i.l.bf16 %v3657_v33 }
 0x493   :  { %v833_v14 = vsel %vm509_vm2, %v4792_v26, %v3654_v11  ;;  %v832_v16 = vsel %vm509_vm2, %v4790_v25, %v3653_v13  ;;  %v835_v42 = vsel %vm509_vm2, %v4788_v24, %v3659_v35  ;;  %v834_v10 = vsel %vm509_vm2, %v4794_v27, %v3658_v37 }
 0x494   :  { %v844_v34 = vpack.c.bf16 %v833_v14, %v832_v16  ;;  %v845_v45 = vpack.c.bf16 %v835_v42, %v834_v10 }
 0x496   :  { %3233 = vmatmul.mubr.msk.bf16.gmra.mrb[40].mxu1 %vm883_vm3, %v842_v7  ;;  %v854_v7 = vshrl.u32 %v853_v1, 7 }
 0x497   :  { %970 = vmatprep.mubr.bf16.mxu1 %v5944_v23  ;;  %v3667_v57 = vpop.permute.xlu1 %3666 }
 0x498   :  { %v3662_v43 = vpop.permute.xlu0 %3661  ;;  %v3669_v59 = vunpack.i.h.bf16 %v3667_v57  ;;  %v3668_v60 = vunpack.i.l.bf16 %v3667_v57  ;;  %v855_v17 = vsub.s32 0, %v854_v7  ;;  %v859_v33 = vsub.s32 1, %v854_v7 }
 0x499   :  { %v3664_v44 = vunpack.i.h.bf16 %v3662_v43  ;;  %v3663_v47 = vunpack.i.l.bf16 %v3662_v43 }
 0x49a   :  { %v839_v61 = vsel %vm509_vm2, %v4802_v38, %v3669_v59  ;;  %v838_v62 = vsel %vm509_vm2, %v4808_v41, %v3668_v60  ;;  %v4951_v19 = vrot.slane %v759_v18, %v855_v17  ;;  %v4955_v37 = vrot.slane %v759_v18, %v859_v33 }
 0x49b   :  { %v837_v48 = vsel %vm509_vm2, %v4806_v40, %v3664_v44  ;;  %v836_v52 = vsel %vm509_vm2, %v4804_v39, %v3663_v47  ;;  %v847_v0 = vpack.c.bf16 %v839_v61, %v838_v62 }
 0x49c   :  { %v846_v58 = vpack.c.bf16 %v837_v48, %v836_v52  ;;  %6018 = vst [vmem:[#allocation47_spill] sm:$0xff] %v4951_v19 }
 0x49e   :  { %3234 = vmatmul.mubr.msk.bf16.gmra.mrb[44].mxu1 %vm883_vm3, %v843_v22 }
 0x49f   :  { %980 = vmatprep.mubr.bf16.mxu1 %v5944_v23 }
 0x4a6   :  { %3235 = vmatmul.mubr.msk.bf16.gmra.mrb[48].mxu1 %vm883_vm3, %v844_v34 }
 0x4a7   :  { %990 = vmatprep.mubr.bf16.mxu1 %v5944_v23 }
 0x4ae   :  { %3236 = vmatmul.mubr.msk.bf16.gmra.mrb[52].mxu1 %vm883_vm3, %v845_v45 }
 0x4af   :  { %1000 = vmatprep.mubr.bf16.mxu1 %v5944_v23 }
 0x4b6   :  { %3237 = vmatmul.mubr.msk.bf16.gmra.mrb[56].mxu1 %vm883_vm3, %v846_v58 }
 0x4b7   :  { %1010 = vmatprep.mubr.bf16.mxu1 %v5944_v23 }
 0x4be   :  { %3238 = vmatmul.mubr.msk.bf16.gmra.mrb[60].mxu1 %vm883_vm3, %v847_v0 }
 0x559   :  { %v942_v20 = vpop.f32.mrb[32].mxu1 }
 0x55a   :  { %v943_v21 = vadd.f32 %v942_v20, %v4951_v19  ;;  %v944_v22 = vpop.f32.mrb[33].mxu1 }
 0x55b   :  { %v946_v11 = vpop.f32.mrb[34].mxu1  ;;  %v4960_v48 = vadd.f32 %v944_v22, %v4955_v37 }
 0x55c   :  { %v3239_v13 = vmul.f32 -1.442695, %v943_v21  ;;  %v947_v14 = vadd.f32 %v946_v11, %v4951_v19  ;;  %v948_v16 = vpop.f32.mrb[35].mxu1 }
 0x55d   :  { %v4963_v58 = vadd.f32 %v948_v16, %v4955_v37 }
 0x55e   :  { %3864 = vpow2.f32 %v3239_v13  ;;  %v3241_v34 = vmul.f32 -1.442695, %v947_v14 }
 0x560   :  { %3866 = vpow2.f32 %v3241_v34 }
 0x561   :  { %v952_v35 = vpop.f32.mrb[36].mxu1 }
 0x562   :  { %v953_v42 = vadd.f32 %v952_v35, %v4951_v19  ;;  %v954_v10 = vpop.f32.mrb[37].mxu1 }
 0x563   :  { %v956_v43 = vpop.f32.mrb[38].mxu1  ;;  %v4970_v21 = vadd.f32 %v954_v10, %v4955_v37 }
 0x564   :  { %v3243_v45 = vmul.f32 -1.442695, %v953_v42  ;;  %v957_v44 = vadd.f32 %v956_v43, %v4951_v19  ;;  %v958_v47 = vpop.f32.mrb[39].mxu1 }
 0x565   :  { %v4973_v13 = vadd.f32 %v958_v47, %v4955_v37 }
 0x566   :  { %3868 = vpow2.f32 %v3243_v45  ;;  %v3245_v52 = vmul.f32 -1.442695, %v957_v44 }
 0x568   :  { %v3865_v57 = vpop.eup %3864  ;;  %3870 = vpow2.f32 %v3245_v52 }
 0x569   :  { %v1117_v59 = vadd.f32 1.0, %v3865_v57  ;;  %v962_v60 = vpop.f32.mrb[40].mxu1  ;;  %3872 = vtanh.f32 %v4960_v48 }
 0x56a   :  { %v3867_v61 = vpop.eup %3866  ;;  %v963_v62 = vadd.f32 %v962_v60, %v4951_v19  ;;  %v964_v0 = vpop.f32.mrb[41].mxu1 }
 0x56b   :  { %3874 = vrcp.f32 %v1117_v59  ;;  %v1119_v1 = vadd.f32 1.0, %v3867_v61  ;;  %v966_v7 = vpop.f32.mrb[42].mxu1  ;;  %v4982_v61 = vadd.f32 %v964_v0, %v4955_v37 }
 0x56c   :  { %3876 = vtanh.f32 %v4963_v58  ;;  %v3247_v17 = vmul.f32 -1.442695, %v963_v62  ;;  %v967_v18 = vadd.f32 %v966_v7, %v4951_v19  ;;  %v968_v20 = vpop.f32.mrb[43].mxu1 }
 0x56d   :  { %3878 = vrcp.f32 %v1119_v1  ;;  %v4987_v7 = vadd.f32 %v968_v20, %v4955_v37 }
 0x56e   :  { %v3249_v22 = vmul.f32 -1.442695, %v967_v18  ;;  %3880 = vpow2.f32 %v3247_v17 }
 0x56f   :  { %3882 = vtanh.f32 %v4970_v21 }
 0x570   :  { %v3869_v11 = vpop.eup %3868  ;;  %3884 = vpow2.f32 %v3249_v22 }
 0x571   :  { %v1121_v14 = vadd.f32 1.0, %v3869_v11  ;;  %v972_v16 = vpop.f32.mrb[44].mxu1 }
 0x572   :  { %v3871_v33 = vpop.eup %3870  ;;  %v973_v34 = vadd.f32 %v972_v16, %v4951_v19  ;;  %v974_v35 = vpop.f32.mrb[45].mxu1 }
 0x573   :  { %3886 = vrcp.f32 %v1121_v14  ;;  %v1123_v42 = vadd.f32 1.0, %v3871_v33  ;;  %v976_v43 = vpop.f32.mrb[46].mxu1  ;;  %v3873_v10 = vpop.eup %3872 }
 0x574   :  { %3888 = vtanh.f32 %v4973_v13  ;;  %v978_v45 = vpop.f32.mrb[47].mxu1  ;;  %v3251_v47 = vmul.f32 -1.442695, %v973_v34  ;;  %v977_v57 = vadd.f32 %v976_v43, %v4951_v19 }
 0x575   :  { %v3875_v44 = vpop.eup %3874  ;;  %3890 = vrcp.f32 %v1123_v42 }
 0x576   :  { %v3877_v52 = vpop.eup %3876  ;;  %v4979_v59 = vmul.f32 %v3875_v44, %v3873_v10  ;;  %3892 = vpow2.f32 %v3251_v47  ;;  %v3253_v22 = vmul.f32 -1.442695, %v977_v57 }
 0x577   :  { %v3879_v60 = vpop.eup %3878  ;;  %3894 = vtanh.f32 %v4982_v61 }
 0x578   :  { %v4984_v62 = vmul.f32 %v3879_v60, %v3877_v52  ;;  %v3881_v1 = vpop.eup %3880  ;;  %v4998_v60 = vadd.f32 %v974_v35, %v4955_v37 }
 0x579   :  { %v982_v17 = vpop.f32.mrb[48].mxu1  ;;  %v1125_v18 = vadd.f32 1.0, %v3881_v1  ;;  %v3883_v16 = vpop.eup %3882 }
 0x57a   :  { %v983_v11 = vadd.f32 %v982_v17, %v4951_v19  ;;  %v984_v14 = vpop.f32.mrb[49].mxu1  ;;  %v3885_v34 = vpop.eup %3884 }
 0x57b   :  { %v986_v33 = vpop.f32.mrb[50].mxu1  ;;  %3896 = vrcp.f32 %v1125_v18  ;;  %v1127_v43 = vadd.f32 1.0, %v3885_v34 }
 0x57c   :  { %v988_v0 = vpop.f32.mrb[51].mxu1  ;;  %3898 = vtanh.f32 %v4987_v7  ;;  %v3255_v10 = vmul.f32 -1.442695, %v983_v11  ;;  %v987_v52 = vadd.f32 %v986_v33, %v4951_v19  ;;  %v5003_v33 = vadd.f32 %v978_v45, %v4955_v37 }
 0x57d   :  { %v3887_v42 = vpop.eup %3886  ;;  %3900 = vpow2.f32 %v3253_v22 }
 0x57e   :  { %v3889_v20 = vpop.eup %3888  ;;  %v4992_v44 = vmul.f32 %v3887_v42, %v3883_v16  ;;  %3902 = vrcp.f32 %v1127_v43  ;;  %v3257_v12 = vmul.f32 -1.442695, %v987_v52 }
 0x57f   :  { %v3891_v47 = vpop.eup %3890  ;;  %3904 = vpow2.f32 %v3255_v10 }
 0x580   :  { %v4995_v57 = vmul.f32 %v3891_v47, %v3889_v20  ;;  %v3893_v18 = vpop.eup %3892  ;;  %3906 = vtanh.f32 %v4998_v60 }
 0x581   :  { %v992_v1 = vpop.f32.mrb[52].mxu1  ;;  %v1129_v23 = vadd.f32 1.0, %v3893_v18  ;;  %v3895_v16 = vpop.eup %3894 }
 0x582   :  { %v994_v17 = vpop.f32.mrb[53].mxu1  ;;  %v993_v22 = vadd.f32 %v992_v1, %v4951_v19  ;;  %v5009_v1 = vadd.f32 %v984_v14, %v4955_v37  ;;  %v5016_v14 = vadd.f32 %v988_v0, %v4955_v37 }
 0x583   :  { %v996_v34 = vpop.f32.mrb[54].mxu1  ;;  %3908 = vrcp.f32 %v1129_v23 }
 0x584   :  { %v998_v11 = vpop.f32.mrb[55].mxu1  ;;  %3910 = vpow2.f32 %v3257_v12  ;;  %v3259_v10 = vmul.f32 -1.442695, %v993_v22  ;;  %v997_v28 = vadd.f32 %v996_v34, %v4951_v19 }
 0x585   :  { %v3897_v42 = vpop.eup %3896  ;;  %3912 = vtanh.f32 %v5003_v33  ;;  %v5032_v9 = vadd.f32 %v998_v11, %v4955_v37 }
 0x586   :  { %v3899_v35 = vpop.eup %3898  ;;  %v5005_v43 = vmul.f32 %v3897_v42, %v3895_v16  ;;  %v3261_v22 = vmul.f32 -1.442695, %v997_v28 }
 0x587   :  { %v3901_v20 = vpop.eup %3900 }
 0x588   :  { %v3903_v47 = vpop.eup %3902  ;;  %v1131_v18 = vadd.f32 1.0, %v3901_v20 }
 0x589   :  { %v1002_v52 = vpop.f32.mrb[56].mxu1  ;;  %v5012_v15 = vmul.f32 %v3903_v47, %v3899_v35  ;;  %v3905_v16 = vpop.eup %3904 }
 0x58a   :  { %v1004_v23 = vpop.f32.mrb[57].mxu1  ;;  %3914 = vrcp.f32 %v1131_v18  ;;  %v1133_v12 = vadd.f32 1.0, %v3905_v16  ;;  %v3907_v20 = vpop.eup %3906  ;;  %v1003_v47 = vadd.f32 %v1002_v52, %v4951_v19  ;;  %v5022_v16 = vadd.f32 %v994_v17, %v4955_v37 }
 0x58b   :  { %v1006_v45 = vpop.f32.mrb[58].mxu1  ;;  %3916 = vpow2.f32 %v3259_v10 }
 0x58c   :  { %v1008_v42 = vpop.f32.mrb[59].mxu1  ;;  %3918 = vtanh.f32 %v5009_v1 }
 0x58d   :  { %3920 = vrcp.f32 %v1133_v12  ;;  %v3909_v29 = vpop.eup %3908 }
 0x58e   :  { %v5018_v34 = vmul.f32 %v3909_v29, %v3907_v20  ;;  %v3911_v35 = vpop.eup %3910  ;;  %3922 = vpow2.f32 %v3261_v22  ;;  %v3263_v20 = vmul.f32 -1.442695, %v1003_v47  ;;  %v1007_v22 = vadd.f32 %v1006_v45, %v4951_v19 }
 0x58f   :  { %v1135_v10 = vadd.f32 1.0, %v3911_v35  ;;  %3924 = vtanh.f32 %v4979_v59  ;;  %v3913_v12 = vpop.eup %3912 }
 0x590   :  { %3926 = vtanh.f32 %v5016_v14  ;;  %v3265_v49 = vmul.f32 -1.442695, %v1007_v22 }
 0x591   :  { %v1012_v63 = vpop.f32.mrb[60].mxu1  ;;  %3928 = vrcp.f32 %v1135_v10 }
 0x592   :  { %v1014_v18 = vpop.f32.mrb[61].mxu1  ;;  %3930 = vtanh.f32 %v5022_v16 }
 0x593   :  { %v1016_v28 = vpop.f32.mrb[62].mxu1  ;;  %3932 = vtanh.f32 %v4984_v62 }
 0x594   :  { %v1018_v0 = vpop.f32.mrb[63].mxu1  ;;  %v3915_v8 = vpop.eup %3914 }
 0x595   :  { %v3917_v29 = vpop.eup %3916  ;;  %v5027_v2 = vmul.f32 %v3915_v8, %v3913_v12  ;;  %v1013_v8 = vadd.f32 %v1012_v63, %v4951_v19 }
 0x596   :  { %v1137_v52 = vadd.f32 1.0, %v3917_v29  ;;  %v3919_v17 = vpop.eup %3918 }
 0x597   :  { %v3921_v35 = vpop.eup %3920  ;;  %v3267_v22 = vmul.f32 -1.442695, %v1013_v8 }
 0x598   :  { %3934 = vrcp.f32 %v1137_v52  ;;  %v5034_v10 = vmul.f32 %v3921_v35, %v3919_v17  ;;  %v3923_v47 = vpop.eup %3922  ;;  %v5043_v17 = vadd.f32 %v1004_v23, %v4955_v37  ;;  %v1017_v35 = vadd.f32 %v1016_v28, %v4951_v19 }
 0x599   :  { %3936 = vpow2.f32 %v3263_v20  ;;  %v3925_v50 = vpop.eup %3924  ;;  %v1139_v45 = vadd.f32 1.0, %v3923_v47 }
 0x59a   :  { %3938 = vtanh.f32 %v5032_v9  ;;  %v3927_v12 = vpop.eup %3926  ;;  %1277 = vrot.lane.b32.xlu0 %v3925_v50, %s4528_s2  ;;  %v3269_v8 = vmul.f32 -1.442695, %v1017_v35  ;;  %v5065_v35 = vadd.f32 %v1018_v0, %v4955_v37 }
 0x59b   :  { %3940 = vpow2.f32 %v3265_v49  ;;  %v3929_v29 = vpop.eup %3928 }
 0x59c   :  { %3942 = vrcp.f32 %v1139_v45  ;;  %v5040_v11 = vmul.f32 %v3929_v29, %v3927_v12  ;;  %v3931_v20 = vpop.eup %3930  ;;  %v5051_v45 = vadd.f32 %v1008_v42, %v4955_v37  ;;  %v5059_v42 = vadd.f32 %v1014_v18, %v4955_v37 }
 0x59d   :  { %3944 = vtanh.f32 %v4992_v44  ;;  %v3933_v52 = vpop.eup %3932 }
 0x59e   :  { %1279 = vrot.lane.b32.xlu1 %v3933_v52, %s4528_s2  ;;  %3946 = vtanh.f32 %v4995_v57 }
 0x59f   :  { %3948 = vpow2.f32 %v3267_v22 }
 0x5a0   :  { %3950 = vtanh.f32 %v5043_v17 }
 0x5a2   :  { %v3935_v47 = vpop.eup %3934 }
 0x5a3   :  { %v3937_v63 = vpop.eup %3936  ;;  %v5048_v49 = vmul.f32 %v3935_v47, %v3931_v20 }
 0x5a4   :  { %v1141_v50 = vadd.f32 1.0, %v3937_v63  ;;  %v3939_v23 = vpop.eup %3938 }
 0x5a5   :  { %v3941_v12 = vpop.eup %3940 }
 0x5a6   :  { %3952 = vrcp.f32 %v1141_v50  ;;  %v3943_v28 = vpop.eup %3942  ;;  %v1143_v29 = vadd.f32 1.0, %v3941_v12 }
 0x5a7   :  { %3954 = vtanh.f32 %v5051_v45  ;;  %v3945_v52 = vpop.eup %3944  ;;  %v5055_v19 = vmul.f32 %v3943_v28, %v3939_v23 }
 0x5a8   :  { %3956 = vpow2.f32 %v3269_v8  ;;  %1281 = vrot.lane.b32.xlu0 %v3945_v52, %s4528_s2  ;;  %v3947_v20 = vpop.eup %3946 }
 0x5a9   :  { %3958 = vrcp.f32 %v1143_v29  ;;  %v3949_v22 = vpop.eup %3948  ;;  %1283 = vrot.lane.b32.xlu1 %v3947_v20, %s4528_s2 }
 0x5aa   :  { %3960 = vtanh.f32 %v5005_v43  ;;  %v3951_v47 = vpop.eup %3950  ;;  %v1145_v63 = vadd.f32 1.0, %v3949_v22 }
 0x5ab   :  { %3962 = vtanh.f32 %v5059_v42 }
 0x5ac   :  { %3964 = vtanh.f32 %v5012_v15 }
 0x5ad   :  { %3966 = vtanh.f32 %v5018_v34 }
 0x5ae   :  { %3968 = vrcp.f32 %v1145_v63 }
 0x5af   :  { %3970 = vtanh.f32 %v5065_v35 }
 0x5b0   :  { %v3953_v50 = vpop.eup %3952  ;;  %3972 = vtanh.f32 %v5027_v2 }
 0x5b1   :  { %v5069_v18 = vmul.f32 %v3953_v50, %v3951_v47  ;;  %v3955_v8 = vpop.eup %3954  ;;  %3974 = vtanh.f32 %v5034_v10 }
 0x5b2   :  { %v3957_v23 = vpop.eup %3956  ;;  %3976 = vtanh.f32 %v5040_v11 }
 0x5b3   :  { %v3959_v12 = vpop.eup %3958  ;;  %v1147_v28 = vadd.f32 1.0, %v3957_v23 }
 0x5b4   :  { %v3961_v0 = vpop.eup %3960  ;;  %v5075_v29 = vmul.f32 %v3959_v12, %v3955_v8 }
 0x5b5   :  { %3978 = vrcp.f32 %v1147_v28  ;;  %1285 = vrot.lane.b32.xlu0 %v3961_v0, %s4528_s2  ;;  %v3963_v52 = vpop.eup %3962 }
 0x5b6   :  { %3980 = vtanh.f32 %v5048_v49  ;;  %v3965_v20 = vpop.eup %3964 }
 0x5b7   :  { %3982 = vtanh.f32 %v5055_v19  ;;  %v3967_v22 = vpop.eup %3966  ;;  %1287 = vrot.lane.b32.xlu1 %v3965_v20, %s4528_s2 }
 0x5b8   :  { %3984 = vtanh.f32 %v5069_v18  ;;  %v3969_v47 = vpop.eup %3968 }
 0x5b9   :  { %1289 = vrot.lane.b32.xlu0 %v3967_v22, %s4528_s2  ;;  %v3971_v63 = vpop.eup %3970  ;;  %v5083_v50 = vmul.f32 %v3969_v47, %v3963_v52  ;;  %3986 = vtanh.f32 %v5075_v29 }
 0x5ba   :  { %v3973_v8 = vpop.eup %3972 }
 0x5bb   :  { %v3975_v23 = vpop.eup %3974  ;;  %1291 = vrot.lane.b32.xlu1 %v3973_v8, %s4528_s2  ;;  %3988 = vtanh.f32 %v5083_v50 }
 0x5bc   :  { %v3977_v12 = vpop.eup %3976 }
 0x5bd   :  { %1293 = vrot.lane.b32.xlu0 %v3975_v23, %s4528_s2  ;;  %v3670_v23 = vpack.i.bf16 %v4764_v55, %v4762_v54 }
 0x5bf   :  { %v3979_v28 = vpop.eup %3978  ;;  %1295 = vrot.lane.b32.xlu1 %v3977_v12, %s4528_s2  ;;  %v3680_v12 = vpack.i.bf16 %v4760_v53, %v4766_v56 }
 0x5c0   :  { %v3981_v0 = vpop.eup %3980  ;;  %v5089_v20 = vmul.f32 %v3979_v28, %v3971_v63  ;;  %v3690_v28 = vpack.i.bf16 %v4778_v5, %v4776_v4 }
 0x5c1   :  { %v3983_v22 = vpop.eup %3982  ;;  %1297 = vrot.lane.b32.xlu0 %v3981_v0, %s4528_s2  ;;  %v3700_v0 = vpack.i.bf16 %v4774_v3, %v4780_v6 }
 0x5c2   :  { %3990 = vtanh.f32 %v5089_v20  ;;  %v3985_v52 = vpop.eup %3984 }
 0x5c3   :  { %1299 = vrot.lane.b32.xlu1 %v3983_v22, %s4528_s2  ;;  %v3987_v47 = vpop.eup %3986  ;;  %v3710_v22 = vpack.i.bf16 %v4792_v26, %v4790_v25 }
 0x5c5   :  { %1301 = vrot.lane.b32.xlu0 %v3985_v52, %s4528_s2  ;;  %v3989_v8 = vpop.eup %3988  ;;  %v3720_v52 = vpack.i.bf16 %v4788_v24, %v4794_v27 }
 0x5c7   :  { %1303 = vrot.lane.b32.xlu1 %v3987_v47, %s4528_s2  ;;  %v3730_v47 = vpack.i.bf16 %v4806_v40, %v4804_v39 }
 0x5c9   :  { %1305 = vrot.lane.b32.xlu0 %v3989_v8, %s4528_s2  ;;  %v3740_v8 = vpack.i.bf16 %v4802_v38, %v4808_v41 }
 0x5cc   :  { %v3991_v63 = vpop.eup %3990 }
 0x5cd   :  { %1307 = vrot.lane.b32.xlu1 %v3991_v63, %s4528_s2  ;;  %3671 = vrot.lane.b32.xlu0 %v3670_v23, %s4534_s26  ;;  %v3837_v63 = vld [vmem:[%s5937_s7] ss:$8 sps:$4 sm:$0xff]   ;;  %v3839_v23 = vld [vmem:[%s5937_s7 + $0x4] ss:$8 sps:$4 sm:$0xff]  }
 0x5ce   :  { %1606 = vmatprep.subr.bf16.mxu0 %v3839_v23 }
 0x5cf   :  { %1607 = vmatpush1.bf16.msra.mxu0 %v3837_v63  ;;  %v3851_v63 = vld [vmem:[%s5937_s7 + $0x44] ss:$8 sps:$4 sm:$0xff]  }
 0x5d1   :  { %3681 = vrot.lane.b32.xlu0 %v3680_v12, %s4534_s26  ;;  %v3840_v12 = vld [vmem:[%s5937_s7 + $0x10] ss:$8 sps:$4 sm:$0xff]  }
 0x5d5   :  { %3691 = vrot.lane.b32.xlu0 %v3690_v28, %s4534_s26  ;;  %v3842_v28 = vld [vmem:[%s5937_s7 + $0x14] ss:$8 sps:$4 sm:$0xff]  }
 0x5d6   :  { %1608 = vmatprep.subr.bf16.mxu0 %v3842_v28 }
 0x5d7   :  { %1609 = vmatpush1.bf16.msra.mxu0 %v3840_v12 }
 0x5d9   :  { %3701 = vrot.lane.b32.xlu0 %v3700_v0, %s4534_s26  ;;  %v3843_v0 = vld [vmem:[%s5937_s7 + $0x20] ss:$8 sps:$4 sm:$0xff]  }
 0x5dd   :  { %3711 = vrot.lane.b32.xlu0 %v3710_v22, %s4534_s26  ;;  %v3845_v22 = vld [vmem:[%s5937_s7 + $0x24] ss:$8 sps:$4 sm:$0xff]  }
 0x5de   :  { %1610 = vmatprep.subr.bf16.mxu0 %v3845_v22  ;;  %v3852_v22 = vld [vmem:[%s5937_s7 + $0x50] ss:$8 sps:$4 sm:$0xff]  }
 0x5df   :  { %1611 = vmatpush1.bf16.msra.mxu0 %v3843_v0 }
 0x5e1   :  { %3721 = vrot.lane.b32.xlu0 %v3720_v52, %s4534_s26  ;;  %v3240_v52 = vmul.f32 -1.442695, %v4960_v48  ;;  %v3849_v48 = vld [vmem:[%s5937_s7 + $0x40] ss:$8 sps:$4 sm:$0xff]  }
 0x5e3   :  { %3992 = vpow2.f32 %v3240_v52 }
 0x5e5   :  { %3731 = vrot.lane.b32.xlu0 %v3730_v47, %s4534_s26  ;;  %v3242_v47 = vmul.f32 -1.442695, %v4963_v58  ;;  %v3244_v58 = vmul.f32 -1.442695, %v4970_v21  ;;  %v3250_v21 = vmul.f32 -1.442695, %v4987_v7 }
 0x5e7   :  { %3994 = vpow2.f32 %v3242_v47  ;;  %v3254_v47 = vmul.f32 -1.442695, %v5003_v33  ;;  %v3260_v33 = vmul.f32 -1.442695, %v5022_v16 }
 0x5e8   :  { %3996 = vpow2.f32 %v3244_v58 }
 0x5e9   :  { %3741 = vrot.lane.b32.xlu0 %v3740_v8, %s4534_s26  ;;  %v3848_v8 = vld [vmem:[%s5937_s7 + $0x34] ss:$8 sps:$4 sm:$0xff]  }
 0x5ea   :  { %1612 = vmatprep.subr.bf16.mxu0 %v3848_v8  ;;  %v3256_v8 = vmul.f32 -1.442695, %v5009_v1 }
 0x5ed   :  { %1943 = vrot.lane.b32.xlu0 %v4979_v59, %s4528_s2  ;;  %v3846_v59 = vld [vmem:[%s5937_s7 + $0x30] ss:$8 sps:$4 sm:$0xff]  }
 0x5ee   :  { %1613 = vmatpush1.bf16.msra.mxu0 %v3846_v59 }
 0x5ef   :  { %1614 = vmatprep.subr.bf16.mxu0 %v3851_v63 }
 0x5f1   :  { %1947 = vrot.lane.b32.xlu0 %v4992_v44, %s4528_s2  ;;  %v3246_v44 = vmul.f32 -1.442695, %v4973_v13 }
 0x5f2   :  { %1615 = vmatpush1.bf16.msra.mxu0 %v3849_v48  ;;  %v3258_v48 = vmul.f32 -1.442695, %v5016_v14  ;;  %v3264_v14 = vmul.f32 -1.442695, %v5043_v17  ;;  %v3270_v17 = vmul.f32 -1.442695, %v5065_v35 }
 0x5f3   :  { %3998 = vpow2.f32 %v3246_v44 }
 0x5f5   :  { %1951 = vrot.lane.b32.xlu0 %v5005_v43, %s4528_s2  ;;  %v3993_v43 = vpop.eup %3992 }
 0x5f6   :  { %v3995_v23 = vpop.eup %3994  ;;  %v1118_v12 = vadd.f32 1.0, %v3993_v43 }
 0x5f7   :  { %v1120_v28 = vadd.f32 1.0, %v3995_v23  ;;  %v3997_v0 = vpop.eup %3996 }
 0x5f8   :  { %4000 = vrcp.f32 %v1118_v12  ;;  %v1122_v52 = vadd.f32 1.0, %v3997_v0  ;;  %v3262_v12 = vmul.f32 -1.442695, %v5032_v9  ;;  %v3266_v0 = vmul.f32 -1.442695, %v5051_v45 }
 0x5f9   :  { %1955 = vrot.lane.b32.xlu0 %v5018_v34, %s4528_s2  ;;  %4002 = vrcp.f32 %v1120_v28  ;;  %v3248_v34 = vmul.f32 -1.442695, %v4982_v61 }
 0x5fb   :  { %4004 = vpow2.f32 %v3248_v34 }
 0x5fc   :  { %4006 = vpow2.f32 %v3250_v21 }
 0x5fd   :  { %1959 = vrot.lane.b32.xlu0 %v5034_v10, %s4528_s2  ;;  %v3252_v10 = vmul.f32 -1.442695, %v4998_v60  ;;  %v3999_v13 = vpop.eup %3998 }
 0x5fe   :  { %v1124_v61 = vadd.f32 1.0, %v3999_v13 }
 0x5ff   :  { %4008 = vpow2.f32 %v3252_v10 }
 0x600   :  { %4010 = vrcp.f32 %v1122_v52 }
 0x601   :  { %1963 = vrot.lane.b32.xlu0 %v5048_v49, %s4528_s2  ;;  %v3854_v49 = vld [vmem:[%s5937_s7 + $0x54] ss:$8 sps:$4 sm:$0xff]   ;;  %4012 = vpow2.f32 %v3254_v47  ;;  %s4535_s7 = smov 96  }
 0x602   :  { %1616 = vmatprep.subr.bf16.mxu0 %v3854_v49  ;;  %v4001_v59 = vpop.eup %4000  ;;  %4014 = vrcp.f32 %v1124_v61  ;;  %v3268_v49 = vmul.f32 -1.442695, %v5059_v42 }
 0x603   :  { %1617 = vmatpush1.bf16.msra.mxu0 %v3852_v22  ;;  %v4003_v60 = vpop.eup %4002  ;;  %4016 = vpow2.f32 %v3256_v8 }
 0x604   :  { %4018 = vpow2.f32 %v3258_v48 }
 0x605   :  { %v4005_v23 = vpop.eup %4004  ;;  %4020 = vpow2.f32 %v3260_v33 }
 0x606   :  { %v4007_v1 = vpop.eup %4006  ;;  %v1126_v28 = vadd.f32 1.0, %v4005_v23  ;;  %4022 = vpow2.f32 %v3262_v12 }
 0x607   :  { %v1128_v21 = vadd.f32 1.0, %v4007_v1 }
 0x608   :  { %4024 = vrcp.f32 %v1126_v28 }
 0x609   :  { %v4009_v34 = vpop.eup %4008  ;;  %4026 = vpow2.f32 %v3264_v14 }
 0x60a   :  { %v4011_v16 = vpop.eup %4010  ;;  %v1130_v13 = vadd.f32 1.0, %v4009_v34  ;;  %4028 = vpow2.f32 %v3266_v0 }
 0x60b   :  { %v4013_v10 = vpop.eup %4012  ;;  %4030 = vrcp.f32 %v1128_v21 }
 0x60c   :  { %v1278_v7 = vpop.permute.xlu0 %1277  ;;  %v4015_v22 = vpop.eup %4014  ;;  %4032 = vrcp.f32 %v1130_v13 }
 0x60d   :  { %v1325_v58 = vmul.f32 %v4001_v59, %v1278_v7  ;;  %v4017_v45 = vpop.eup %4016  ;;  %4034 = vpow2.f32 %v3268_v49 }
 0x60e   :  { %v4019_v7 = vpop.eup %4018  ;;  %4036 = vpow2.f32 %v3270_v17 }
 0x60f   :  { %v4021_v42 = vpop.eup %4020  ;;  %v1136_v35 = vadd.f32 1.0, %v4019_v7 }
 0x610   :  { %v1280_v63 = vpop.permute.xlu1 %1279  ;;  %v4023_v8 = vpop.eup %4022 }
 0x611   :  { %v1326_v44 = vmul.f32 %v4003_v60, %v1280_v63  ;;  %v1134_v60 = vadd.f32 1.0, %v4017_v45 }
 0x612   :  { %v4025_v63 = vpop.eup %4024 }
 0x613   :  { %v3675_v43 = vpack.i.bf16 %v1326_v44, %v1325_v58  ;;  %v4027_v48 = vpop.eup %4026  ;;  %v1140_v58 = vadd.f32 1.0, %v4023_v8 }
 0x614   :  { %v1142_v1 = vadd.f32 1.0, %v4027_v48 }
 0x615   :  { %3751 = vrot.lane.b32.xlu0 %v3675_v43, %s4528_s2  ;;  %3676 = vrot.lane.b32.xlu1 %v3675_v43, %s4535_s7  ;;  %v4029_v43 = vpop.eup %4028 }
 0x616   :  { %v4031_v23 = vpop.eup %4030  ;;  %v1144_v0 = vadd.f32 1.0, %v4029_v43 }
 0x617   :  { %v4033_v12 = vpop.eup %4032 }
 0x618   :  { %v4035_v14 = vpop.eup %4034 }
 0x619   :  { %1967 = vrot.lane.b32.xlu0 %v5069_v18, %s4528_s2  ;;  %v1132_v18 = vadd.f32 1.0, %v4013_v10  ;;  %v4037_v21 = vpop.eup %4036 }
 0x61a   :  { %v1282_v9 = vpop.permute.xlu0 %1281  ;;  %v1148_v17 = vadd.f32 1.0, %v4037_v21 }
 0x61b   :  { %v1284_v52 = vpop.permute.xlu1 %1283  ;;  %v1327_v47 = vmul.f32 %v4011_v16, %v1282_v9  ;;  %4038 = vrcp.f32 %v1132_v18 }
 0x61c   :  { %v1328_v61 = vmul.f32 %v4015_v22, %v1284_v52  ;;  %4040 = vrcp.f32 %v1134_v60  ;;  %v1146_v22 = vadd.f32 1.0, %v4035_v14 }
 0x61d   :  { %1971 = vrot.lane.b32.xlu0 %v5083_v50, %s4528_s2  ;;  %v1138_v50 = vadd.f32 1.0, %v4021_v42  ;;  %4042 = vrcp.f32 %v1136_v35 }
 0x61e   :  { %v5193_v59 = vpack.i.bf16 %v1328_v61, %v1327_v47 }
 0x61f   :  { %4044 = vrcp.f32 %v1138_v50 }
 0x620   :  { %3686 = vrot.lane.b32.xlu1 %v5193_v59, %s4535_s7  ;;  %4046 = vrcp.f32 %v1140_v58 }
 0x621   :  { %4048 = vrcp.f32 %v1142_v1 }
 0x622   :  { %4050 = vrcp.f32 %v1144_v0 }
 0x623   :  { %4052 = vrcp.f32 %v1146_v22 }
 0x624   :  { %4054 = vrcp.f32 %v1148_v17 }
 0x625   :  { %v4039_v10 = vpop.eup %4038 }
 0x626   :  { %v4041_v61 = vpop.eup %4040 }
 0x627   :  { %v1286_v44 = vpop.permute.xlu0 %1285  ;;  %v4043_v18 = vpop.eup %4042 }
 0x628   :  { %v1329_v28 = vmul.f32 %v4025_v63, %v1286_v44 }
 0x629   :  { %v1288_v33 = vpop.permute.xlu1 %1287  ;;  %v4045_v8 = vpop.eup %4044 }
 0x62a   :  { %v1330_v34 = vmul.f32 %v4031_v23, %v1288_v33  ;;  %v4047_v50 = vpop.eup %4046 }
 0x62b   :  { %v1290_v16 = vpop.permute.xlu0 %1289  ;;  %v4049_v23 = vpop.eup %4048 }
 0x62c   :  { %v3695_v9 = vpack.i.bf16 %v1330_v34, %v1329_v28  ;;  %v1331_v49 = vmul.f32 %v4033_v12, %v1290_v16  ;;  %v4051_v12 = vpop.eup %4050 }
 0x62d   :  { %v1292_v13 = vpop.permute.xlu1 %1291  ;;  %v4053_v0 = vpop.eup %4052 }
 0x62e   :  { %3761 = vrot.lane.b32.xlu0 %v3695_v9, %s4528_s2  ;;  %3696 = vrot.lane.b32.xlu1 %v3695_v9, %s4535_s7  ;;  %v1332_v52 = vmul.f32 %v4039_v10, %v1292_v13  ;;  %v4055_v21 = vpop.eup %4054 }
 0x62f   :  { %v1294_v47 = vpop.permute.xlu0 %1293 }
 0x630   :  { %v3705_v45 = vpack.i.bf16 %v1332_v52, %v1331_v49  ;;  %v1333_v60 = vmul.f32 %v4041_v61, %v1294_v47  ;;  %v6019_v47 = vmov 0  }
 0x631   :  { %v1296_v7 = vpop.permute.xlu1 %1295 }
 0x632   :  { %3706 = vrot.lane.b32.xlu1 %v3705_v45, %s4535_s7  ;;  %v1334_v42 = vmul.f32 %v4043_v18, %v1296_v7 }
 0x633   :  { %v1298_v35 = vpop.permute.xlu0 %1297 }
 0x634   :  { %v5200_v63 = vpack.i.bf16 %v1334_v42, %v1333_v60  ;;  %v1335_v58 = vmul.f32 %v4045_v8, %v1298_v35 }
 0x635   :  { %v1300_v48 = vpop.permute.xlu1 %1299 }
 0x636   :  { %3716 = vrot.lane.b32.xlu1 %v5200_v63, %s4535_s7  ;;  %v1336_v44 = vmul.f32 %v4047_v50, %v1300_v48 }
 0x637   :  { %v1302_v43 = vpop.permute.xlu0 %1301 }
 0x638   :  { %v5204_v33 = vpack.i.bf16 %v1336_v44, %v1335_v58  ;;  %v1337_v28 = vmul.f32 %v4049_v23, %v1302_v43 }
 0x639   :  { %v1304_v1 = vpop.permute.xlu1 %1303 }
 0x63a   :  { %3726 = vrot.lane.b32.xlu1 %v5204_v33, %s4535_s7  ;;  %v1338_v34 = vmul.f32 %v4051_v12, %v1304_v1 }
 0x63b   :  { %v1306_v14 = vpop.permute.xlu0 %1305 }
 0x63c   :  { %v5208_v16 = vpack.i.bf16 %v1338_v34, %v1337_v28  ;;  %v1339_v10 = vmul.f32 %v4053_v0, %v1306_v14 }
 0x63e   :  { %3736 = vrot.lane.b32.xlu1 %v5208_v16, %s4535_s7 }
 0x63f   :  { %v1308_v9 = vpop.permute.xlu1 %1307 }
 0x640   :  { %v1340_v13 = vmul.f32 %v4055_v21, %v1308_v9 }
 0x642   :  { %v5212_v22 = vpack.i.bf16 %v1340_v13, %v1339_v10 }
 0x644   :  { %3746 = vrot.lane.b32.xlu1 %v5212_v22, %s4535_s7 }
 0x648   :  { %1945 = vrot.lane.b32.xlu1 %v4984_v62, %s4528_s2 }
 0x64c   :  { %1949 = vrot.lane.b32.xlu1 %v4995_v57, %s4528_s2 }
 0x650   :  { %1953 = vrot.lane.b32.xlu1 %v5012_v15, %s4528_s2  ;;  %v3672_v15 = vpop.permute.xlu0 %3671 }
 0x651   :  { %v3674_v62 = vunpack.i.h.bf16 %v3672_v15 }
 0x654   :  { %1957 = vrot.lane.b32.xlu1 %v5027_v2, %s4528_s2  ;;  %v3673_v2 = vunpack.i.l.bf16 %v3672_v15  ;;  %v3682_v17 = vpop.permute.xlu0 %3681 }
 0x655   :  { %v3684_v61 = vunpack.i.h.bf16 %v3682_v17 }
 0x657   :  { %v1472_v42 = vsel %vm509_vm2, %v4837_v32, %v3684_v61 }
 0x658   :  { %1961 = vrot.lane.b32.xlu1 %v5040_v11, %s4528_s2  ;;  %v3692_v58 = vpop.permute.xlu0 %3691 }
 0x659   :  { %v3694_v44 = vunpack.i.h.bf16 %v3692_v58  ;;  %v3693_v43 = vunpack.i.l.bf16 %v3692_v58 }
 0x65b   :  { %v1474_v34 = vsel %vm509_vm2, %v4856_v51, %v3694_v44  ;;  %v1473_v14 = vsel %vm509_vm2, %v4847_v46, %v3693_v43 }
 0x65c   :  { %1965 = vrot.lane.b32.xlu1 %v5055_v19, %s4528_s2  ;;  %v1470_v19 = vsel %vm509_vm2, %v4835_v31, %v3674_v62  ;;  %v3702_v23 = vpop.permute.xlu0 %3701 }
 0x65d   :  { %v3704_v0 = vunpack.i.h.bf16 %v3702_v23  ;;  %v3703_v21 = vunpack.i.l.bf16 %v3702_v23 }
 0x660   :  { %3756 = vrot.lane.b32.xlu1 %v5193_v59, %s4528_s2  ;;  %v1469_v59 = vsel %vm509_vm2, %v4833_v30, %v3673_v2 }
 0x664   :  { %1969 = vrot.lane.b32.xlu1 %v5075_v29, %s4528_s2 }
 0x668   :  { %1973 = vrot.lane.b32.xlu1 %v5089_v20, %s4528_s2 }
 0x66c   :  { %3766 = vrot.lane.b32.xlu1 %v3705_v45, %s4528_s2  ;;  %v3683_v45 = vunpack.i.l.bf16 %v3682_v17 }
 0x66e   :  { %v1471_v35 = vsel %vm509_vm2, %v4841_v36, %v3683_v45 }
 0x687   :  { %v3677_v57 = vpop.permute.xlu1 %3676 }
 0x688   :  { %v3679_v49 = vunpack.i.h.bf16 %v3677_v57  ;;  %v3678_v11 = vunpack.i.l.bf16 %v3677_v57  ;;  %v6020_v57 = vld [vmem:[#allocation37_spill] sm:$0xff] }
 0x68a   :  { %v1485_v52 = vsel %vm883_vm3, %v1469_v59, %v3678_v11  ;;  %v1486_v29 = vsel %vm883_vm3, %v1470_v19, %v3679_v49  ;;  %v1476_v49 = vsel %vm509_vm2, %v6020_v57, %v3704_v0  ;;  %v6021_v11 = vld [vmem:[#allocation36_spill] sm:$0xff]  ;;  %v3712_v59 = vpop.permute.xlu0 %3711  ;;  %v6025_v0 = vld [vmem:[#allocation39_spill] sm:$0xff] }
 0x68b   :  { %v1501_v20 = vpack.c.bf16 %v1486_v29, %v1485_v52  ;;  %v1475_v19 = vsel %vm509_vm2, %v6021_v11, %v3703_v21  ;;  %v3714_v17 = vunpack.i.h.bf16 %v3712_v59  ;;  %v3713_v61 = vunpack.i.l.bf16 %v3712_v59 }
 0x68d   :  { %3283 = vmatmul.mubr.msk.bf16.vlgmr.msra.gmra.mrb[32].mxu0 %vm1581_vm4, %v1501_v20 }
 0x68e   :  { %1648 = vmatprep.mubr.bf16.mxu0 %v6019_v47 }
 0x692   :  { %v3687_v18 = vpop.permute.xlu1 %3686 }
 0x693   :  { %v3689_v7 = vunpack.i.h.bf16 %v3687_v18  ;;  %v3688_v60 = vunpack.i.l.bf16 %v3687_v18 }
 0x695   :  { %v1487_v8 = vsel %vm883_vm3, %v1471_v35, %v3688_v60  ;;  %v1488_v50 = vsel %vm883_vm3, %v1472_v42, %v3689_v7  ;;  %v6022_v60 = vld [vmem:[#allocation42_spill] sm:$0xff]  ;;  %v6023_v35 = vld [vmem:[#allocation40_spill] sm:$0xff] }
 0x696   :  { %v1502_v48 = vpack.c.bf16 %v1488_v50, %v1487_v8  ;;  %v1478_v42 = vsel %vm509_vm2, %v6022_v60, %v3714_v17  ;;  %v1477_v8 = vsel %vm509_vm2, %v6023_v35, %v3713_v61  ;;  %v3722_v50 = vpop.permute.xlu0 %3721 }
 0x697   :  { %v3724_v43 = vunpack.i.h.bf16 %v3722_v50  ;;  %v3723_v23 = vunpack.i.l.bf16 %v3722_v50 }
 0x698   :  { %3284 = vmatmul.mubr.msk.bf16.gmra.mrb[36].mxu0 %vm1581_vm4, %v1502_v48 }
 0x699   :  { %1658 = vmatprep.mubr.bf16.mxu0 %v6019_v47  ;;  %v1479_v21 = vsel %vm509_vm2, %v6025_v0, %v3723_v23  ;;  %v6029_v23 = vld [vmem:[#allocation43_spill] sm:$0xff] }
 0x6a0   :  { %v3697_v12 = vpop.permute.xlu1 %3696 }
 0x6a1   :  { %v3699_v1 = vunpack.i.h.bf16 %v3697_v12  ;;  %v3698_v28 = vunpack.i.l.bf16 %v3697_v12 }
 0x6a3   :  { %v1489_v9 = vsel %vm883_vm3, %v1473_v14, %v3698_v28  ;;  %v1490_v10 = vsel %vm883_vm3, %v1474_v34, %v3699_v1  ;;  %v6024_v34 = vld [vmem:[#allocation41_spill] sm:$0xff] }
 0x6a4   :  { %v1503_v13 = vpack.c.bf16 %v1490_v10, %v1489_v9  ;;  %v3707_v15 = vpop.permute.xlu1 %3706  ;;  %v1480_v14 = vsel %vm509_vm2, %v6024_v34, %v3724_v43  ;;  %v3732_v9 = vpop.permute.xlu0 %3731 }
 0x6a5   :  { %v3709_v62 = vunpack.i.h.bf16 %v3707_v15  ;;  %v3708_v2 = vunpack.i.l.bf16 %v3707_v15 }
 0x6a6   :  { %3285 = vmatmul.mubr.msk.bf16.gmra.mrb[40].mxu0 %vm1581_vm4, %v1503_v13 }
 0x6a7   :  { %v1491_v52 = vsel %vm883_vm3, %v1475_v19, %v3708_v2  ;;  %v1492_v29 = vsel %vm883_vm3, %v1476_v49, %v3709_v62  ;;  %1668 = vmatprep.mubr.bf16.mxu0 %v6019_v47  ;;  %v3734_v62 = vunpack.i.h.bf16 %v3732_v9  ;;  %v3733_v2 = vunpack.i.l.bf16 %v3732_v9  ;;  %v3855_v9 = vld [vmem:[%s5939_s9] sm:$0xff]  }
 0x6a8   :  { %v3717_v20 = vpop.permute.xlu1 %3716  ;;  %v1504_v45 = vpack.c.bf16 %v1492_v29, %v1491_v52  ;;  %v6026_v52 = vld [vmem:[#allocation46_spill] sm:$0xff]  ;;  %v3742_v61 = vpop.permute.xlu0 %3741  ;;  %3533 = vmatprep.subr.bf16.mxu1 %v3855_v9 }
 0x6a9   :  { %v3719_v18 = vunpack.i.h.bf16 %v3717_v20  ;;  %v3718_v7 = vunpack.i.l.bf16 %v3717_v20  ;;  %v1482_v29 = vsel %vm509_vm2, %v6026_v52, %v3734_v62  ;;  %v6027_v20 = vld [vmem:[#allocation44_spill] sm:$0xff]  ;;  %3534 = vmatpush3.bf16.msra.mxu1 %v3855_v9 }
 0x6aa   :  { %v1481_v17 = vsel %vm509_vm2, %v6027_v20, %v3733_v2  ;;  %v6030_v2 = vld [vmem:[#allocation47_spill] sm:$0xff] }
 0x6ab   :  { %v1493_v48 = vsel %vm883_vm3, %v1477_v8, %v3718_v7  ;;  %v1494_v58 = vsel %vm883_vm3, %v1478_v42, %v3719_v18  ;;  %v3744_v42 = vunpack.i.h.bf16 %v3742_v61  ;;  %v3743_v8 = vunpack.i.l.bf16 %v3742_v61 }
 0x6ac   :  { %v3727_v44 = vpop.permute.xlu1 %3726  ;;  %v1505_v12 = vpack.c.bf16 %v1494_v58, %v1493_v48 }
 0x6ad   :  { %v3729_v1 = vunpack.i.h.bf16 %v3727_v44  ;;  %v3728_v28 = vunpack.i.l.bf16 %v3727_v44  ;;  %v6028_v44 = vld [vmem:[#allocation45_spill] sm:$0xff] }
 0x6ae   :  { %3286 = vmatmul.mubr.msk.bf16.gmra.mrb[44].mxu0 %vm1581_vm4, %v1504_v45  ;;  %v1484_v43 = vsel %vm509_vm2, %v6028_v44, %v3744_v42 }
 0x6af   :  { %1678 = vmatprep.mubr.bf16.mxu0 %v6019_v47  ;;  %v1495_v10 = vsel %vm883_vm3, %v1479_v21, %v3728_v28  ;;  %v1496_v13 = vsel %vm883_vm3, %v1480_v14, %v3729_v1  ;;  %v4376_v21 = vld [vmem:[%s5930_s0] sm:$0xff]  }
 0x6b0   :  { %v3737_v15 = vpop.permute.xlu1 %3736  ;;  %v1506_v49 = vpack.c.bf16 %v1496_v13, %v1495_v10  ;;  %v3856_v10 = vld [vmem:[%s5939_s9 + $0x8] sm:$0xff]   ;;  %v3857_v13 = vld [vmem:[%s5939_s9 + $0x10] sm:$0xff]  }
 0x6b1   :  { %v3739_v19 = vunpack.i.h.bf16 %v3737_v15  ;;  %v3738_v59 = vunpack.i.l.bf16 %v3737_v15  ;;  %3535 = vmatprep.subr.bf16.mxu1 %v3856_v10  ;;  %v3858_v15 = vld [vmem:[%s5939_s9 + $0x18] sm:$0xff]  }
 0x6b2   :  { %3536 = vmatpush3.bf16.msra.mxu1 %v3856_v10  ;;  %v3859_v10 = vld [vmem:[%s5939_s9 + $0x20] sm:$0xff]  }
 0x6b3   :  { %v1497_v45 = vsel %vm883_vm3, %v1481_v17, %v3738_v59  ;;  %v1498_v18 = vsel %vm883_vm3, %v1482_v29, %v3739_v19  ;;  %3537 = vmatprep.subr.bf16.mxu1 %v3857_v13 }
 0x6b4   :  { %v1507_v50 = vpack.c.bf16 %v1498_v18, %v1497_v45 }
 0x6b6   :  { %3287 = vmatmul.mubr.msk.bf16.gmra.mrb[48].mxu0 %vm1581_vm4, %v1505_v12  ;;  %v3747_v7 = vpop.permute.xlu1 %3746  ;;  %v1483_v12 = vsel %vm509_vm2, %v6029_v23, %v3743_v8  ;;  %3538 = vmatpush3.bf16.msra.mxu1 %v3857_v13 }
 0x6b7   :  { %1688 = vmatprep.mubr.bf16.mxu0 %v6019_v47  ;;  %v3749_v48 = vunpack.i.h.bf16 %v3747_v7  ;;  %v3748_v58 = vunpack.i.l.bf16 %v3747_v7  ;;  %3539 = vmatprep.subr.bf16.mxu1 %v3858_v15 }
 0x6b9   :  { %v1499_v1 = vsel %vm883_vm3, %v1483_v12, %v3748_v58  ;;  %v1500_v28 = vsel %vm883_vm3, %v1484_v43, %v3749_v48 }
 0x6ba   :  { %v1508_v14 = vpack.c.bf16 %v1500_v28, %v1499_v1  ;;  %3540 = vmatpush3.bf16.msra.mxu1 %v3858_v15 }
 0x6bb   :  { %3541 = vmatprep.subr.bf16.mxu1 %v3859_v10 }
 0x6be   :  { %3288 = vmatmul.mubr.msk.bf16.gmra.mrb[52].mxu0 %vm1581_vm4, %v1506_v49  ;;  %3542 = vmatpush3.bf16.msra.mxu1 %v3859_v10 }
 0x6bf   :  { %1698 = vmatprep.mubr.bf16.mxu0 %v6019_v47 }
 0x6c6   :  { %3289 = vmatmul.mubr.msk.bf16.gmra.mrb[56].mxu0 %vm1581_vm4, %v1507_v50 }
 0x6c7   :  { %1708 = vmatprep.mubr.bf16.mxu0 %v6019_v47 }
 0x6ce   :  { %3290 = vmatmul.mubr.msk.bf16.gmra.mrb[60].mxu0 %vm1581_vm4, %v1508_v14 }
 0x6cf   :  { %3581 = vmatprep.mubr.bf16.mxu0 %v4376_v21 }
 0x760   :  { %v1640_v62 = vpop.f32.mrb[32].mxu0 }
 0x761   :  { %v1641_v49 = vadd.f32 %v1640_v62, %v6030_v2  ;;  %v1642_v19 = vpop.f32.mrb[33].mxu0 }
 0x762   :  { %v1644_v59 = vpop.f32.mrb[34].mxu0  ;;  %v5316_v18 = vadd.f32 %v1642_v19, %v4955_v37 }
 0x763   :  { %v3291_v29 = vmul.f32 -1.442695, %v1641_v49  ;;  %v1645_v17 = vadd.f32 %v1644_v59, %v6030_v2  ;;  %v1646_v61 = vpop.f32.mrb[35].mxu0 }
 0x764   :  { %v5320_v58 = vadd.f32 %v1646_v61, %v4955_v37 }
 0x765   :  { %4056 = vpow2.f32 %v3291_v29  ;;  %v3293_v45 = vmul.f32 -1.442695, %v1645_v17 }
 0x766   :  { %v3294_v4 = vmul.f32 -1.442695, %v5320_v58 }
 0x767   :  { %4058 = vpow2.f32 %v3293_v45 }
 0x768   :  { %4060 = vtanh.f32 %v5316_v18 }
 0x76b   :  { %v1650_v7 = vpop.f32.mrb[36].mxu0 }
 0x76c   :  { %v1651_v42 = vadd.f32 %v1650_v7, %v6030_v2  ;;  %v1652_v8 = vpop.f32.mrb[37].mxu0 }
 0x76d   :  { %v1654_v50 = vpop.f32.mrb[38].mxu0  ;;  %v5329_v13 = vadd.f32 %v1652_v8, %v4955_v37 }
 0x76e   :  { %v3295_v43 = vmul.f32 -1.442695, %v1651_v42  ;;  %v1655_v12 = vadd.f32 %v1654_v50, %v6030_v2  ;;  %v1656_v1 = vpop.f32.mrb[39].mxu0 }
 0x76f   :  { %v4057_v48 = vpop.eup %4056  ;;  %v3296_v11 = vmul.f32 -1.442695, %v5329_v13 }
 0x770   :  { %v1815_v28 = vadd.f32 1.0, %v4057_v48  ;;  %4062 = vpow2.f32 %v3295_v43  ;;  %v3297_v9 = vmul.f32 -1.442695, %v1655_v12  ;;  %v5340_v12 = vadd.f32 %v1656_v1, %v4955_v37 }
 0x771   :  { %v4059_v14 = vpop.eup %4058 }
 0x772   :  { %4064 = vrcp.f32 %v1815_v28  ;;  %v1817_v21 = vadd.f32 1.0, %v4059_v14  ;;  %v4061_v19 = vpop.eup %4060 }
 0x773   :  { %4066 = vtanh.f32 %v5320_v58  ;;  %v3298_v58 = vmul.f32 -1.442695, %v5340_v12 }
 0x774   :  { %4068 = vrcp.f32 %v1817_v21 }
 0x775   :  { %4070 = vpow2.f32 %v3297_v9 }
 0x776   :  { %4072 = vtanh.f32 %v5329_v13 }
 0x779   :  { %v1660_v15 = vpop.f32.mrb[40].mxu0 }
 0x77a   :  { %v1661_v62 = vadd.f32 %v1660_v15, %v6030_v2  ;;  %v1662_v49 = vpop.f32.mrb[41].mxu0  ;;  %v4063_v29 = vpop.eup %4062 }
 0x77b   :  { %v1664_v59 = vpop.f32.mrb[42].mxu0  ;;  %v1819_v42 = vadd.f32 1.0, %v4063_v29  ;;  %v5349_v29 = vadd.f32 %v1662_v49, %v4955_v37 }
 0x77c   :  { %v3299_v17 = vmul.f32 -1.442695, %v1661_v62  ;;  %v1665_v61 = vadd.f32 %v1664_v59, %v6030_v2  ;;  %v1666_v45 = vpop.f32.mrb[43].mxu0  ;;  %v5333_v7 = vpop.eup %4064 }
 0x77d   :  { %v4067_v8 = vpop.eup %4066  ;;  %v2007_v48 = vmul.f32 %v5333_v7, %v4061_v19 }
 0x77e   :  { %4074 = vpow2.f32 %v3299_v17  ;;  %v3301_v50 = vmul.f32 -1.442695, %v1665_v61  ;;  %v5337_v43 = vpop.eup %4068 }
 0x77f   :  { %4076 = vrcp.f32 %v1819_v42  ;;  %2039 = vrot.lane.b32.xlu0 %v2007_v48, %s4528_s2  ;;  %v2008_v28 = vmul.f32 %v5337_v43, %v4067_v8  ;;  %v4071_v21 = vpop.eup %4070  ;;  %v5355_v48 = vadd.f32 %v1666_v45, %v4955_v37 }
 0x780   :  { %4078 = vpow2.f32 %v3301_v50  ;;  %v1821_v15 = vadd.f32 1.0, %v4071_v21  ;;  %v4073_v61 = vpop.eup %4072 }
 0x781   :  { %v1670_v14 = vpop.f32.mrb[44].mxu0  ;;  %2041 = vrot.lane.b32.xlu1 %v2008_v28, %s4528_s2  ;;  %4080 = vtanh.f32 %v5340_v12  ;;  %v3302_v12 = vmul.f32 -1.442695, %v5355_v48 }
 0x782   :  { %v1671_v9 = vadd.f32 %v1670_v14, %v6030_v2  ;;  %v1672_v10 = vpop.f32.mrb[45].mxu0  ;;  %4082 = vrcp.f32 %v1821_v15 }
 0x783   :  { %v1674_v62 = vpop.f32.mrb[46].mxu0 }
 0x784   :  { %v3303_v19 = vmul.f32 -1.442695, %v1671_v9  ;;  %v1675_v1 = vadd.f32 %v1674_v62, %v6030_v2  ;;  %v1676_v59 = vpop.f32.mrb[47].mxu0 }
 0x786   :  { %v3305_v17 = vmul.f32 -1.442695, %v1675_v1  ;;  %4084 = vpow2.f32 %v3303_v19 }
 0x787   :  { %4086 = vtanh.f32 %v5349_v29 }
 0x788   :  { %v4075_v42 = vpop.eup %4074  ;;  %4088 = vpow2.f32 %v3305_v17 }
 0x789   :  { %v5351_v8 = vpop.eup %4076  ;;  %v1823_v50 = vadd.f32 1.0, %v4075_v42  ;;  %v1680_v28 = vpop.f32.mrb[48].mxu0 }
 0x78a   :  { %v1681_v14 = vadd.f32 %v1680_v28, %v6030_v2  ;;  %v1682_v21 = vpop.f32.mrb[49].mxu0  ;;  %v2009_v49 = vmul.f32 %v5351_v8, %v4073_v61  ;;  %v4079_v9 = vpop.eup %4078  ;;  %v5365_v28 = vadd.f32 %v1672_v10, %v4955_v37  ;;  %v3861_v10 = vld [vmem:[%s5939_s9 + $0x30] sm:$0xff]  }
 0x78b   :  { %4090 = vrcp.f32 %v1823_v50  ;;  %v1684_v15 = vpop.f32.mrb[50].mxu0  ;;  %v1825_v62 = vadd.f32 1.0, %v4079_v9  ;;  %v4081_v42 = vpop.eup %4080  ;;  %v5369_v9 = vadd.f32 %v1676_v59, %v4955_v37 }
 0x78c   :  { %v1686_v19 = vpop.f32.mrb[51].mxu0  ;;  %2043 = vrot.lane.b32.xlu0 %v2009_v49, %s4528_s2  ;;  %4092 = vtanh.f32 %v5355_v48  ;;  %v3307_v1 = vmul.f32 -1.442695, %v1681_v14  ;;  %v1685_v45 = vadd.f32 %v1684_v15, %v6030_v2  ;;  %v5362_v17 = vpop.eup %4082  ;;  %v3860_v15 = vld [vmem:[%s5939_s9 + $0x28] sm:$0xff]  }
 0x78d   :  { %4094 = vrcp.f32 %v1825_v62  ;;  %v2010_v61 = vmul.f32 %v5362_v17, %v4081_v42  ;;  %3543 = vmatprep.subr.bf16.mxu1 %v3860_v15 }
 0x78e   :  { %4096 = vpow2.f32 %v3307_v1  ;;  %v3309_v38 = vmul.f32 -1.442695, %v1685_v45  ;;  %3544 = vmatpush3.bf16.msra.mxu1 %v3860_v15 }
 0x78f   :  { %2045 = vrot.lane.b32.xlu1 %v2010_v61, %s4528_s2  ;;  %4098 = vtanh.f32 %v5365_v28  ;;  %3545 = vmatprep.subr.bf16.mxu1 %v3861_v10 }
 0x790   :  { %v4085_v50 = vpop.eup %4084 }
 0x791   :  { %v1690_v49 = vpop.f32.mrb[52].mxu0  ;;  %v1827_v44 = vadd.f32 1.0, %v4085_v50  ;;  %v4087_v62 = vpop.eup %4086 }
 0x792   :  { %v1692_v14 = vpop.f32.mrb[53].mxu0  ;;  %v1691_v59 = vadd.f32 %v1690_v49, %v6030_v2  ;;  %v4089_v42 = vpop.eup %4088  ;;  %v3862_v49 = vld [vmem:[%s5939_s9 + $0x38] sm:$0xff]   ;;  %3546 = vmatpush3.bf16.msra.mxu1 %v3861_v10 }
 0x793   :  { %v1694_v1 = vpop.f32.mrb[54].mxu0  ;;  %4100 = vrcp.f32 %v1827_v44  ;;  %v1829_v50 = vadd.f32 1.0, %v4089_v42  ;;  %v5394_v42 = vadd.f32 %v1682_v21, %v4955_v37  ;;  %3547 = vmatprep.subr.bf16.mxu1 %v3862_v49  ;;  %v5413_v24 = vadd.f32 %v1692_v14, %v4955_v37 }
 0x794   :  { %v5380_v45 = vpop.f32.mrb[55].mxu0  ;;  %4102 = vtanh.f32 %v5369_v9  ;;  %v3311_v44 = vmul.f32 -1.442695, %v1691_v59  ;;  %v1695_v39 = vadd.f32 %v1694_v1, %v6030_v2 }
 0x795   :  { %v5382_v61 = vpop.eup %4090  ;;  %4104 = vpow2.f32 %v3309_v38  ;;  %v5422_v14 = vadd.f32 %v5380_v45, %v4955_v37 }
 0x796   :  { %v2011_v41 = vmul.f32 %v5382_v61, %v4087_v62  ;;  %v4093_v23 = vpop.eup %4092  ;;  %4106 = vrcp.f32 %v1829_v50  ;;  %v3313_v20 = vmul.f32 -1.442695, %v1695_v39  ;;  %3548 = vmatpush3.bf16.msra.mxu1 %v3862_v49 }
 0x797   :  { %v5389_v52 = vpop.eup %4094  ;;  %4108 = vpow2.f32 %v3311_v44 }
 0x798   :  { %2047 = vrot.lane.b32.xlu0 %v2011_v41, %s4528_s2  ;;  %v2012_v15 = vmul.f32 %v5389_v52, %v4093_v23  ;;  %v4097_v40 = vpop.eup %4096  ;;  %4110 = vtanh.f32 %v5394_v42  ;;  %v5403_v23 = vadd.f32 %v1686_v19, %v4955_v37 }
 0x799   :  { %v1700_v38 = vpop.f32.mrb[56].mxu0  ;;  %v1831_v50 = vadd.f32 1.0, %v4097_v40  ;;  %v4099_v41 = vpop.eup %4098 }
 0x79a   :  { %v1702_v62 = vpop.f32.mrb[57].mxu0  ;;  %2049 = vrot.lane.b32.xlu1 %v2012_v15, %s4528_s2  ;;  %v1701_v1 = vadd.f32 %v1700_v38, %v6030_v2 }
 0x79b   :  { %v1704_v59 = vpop.f32.mrb[58].mxu0  ;;  %4112 = vrcp.f32 %v1831_v50 }
 0x79c   :  { %v1706_v27 = vpop.f32.mrb[59].mxu0  ;;  %4114 = vpow2.f32 %v3313_v20  ;;  %v3315_v40 = vmul.f32 -1.442695, %v1701_v1  ;;  %v1705_v49 = vadd.f32 %v1704_v59, %v6030_v2 }
 0x79d   :  { %v5400_v21 = vpop.eup %4100  ;;  %4116 = vtanh.f32 %v5403_v23 }
 0x79e   :  { %v4103_v10 = vpop.eup %4102  ;;  %v2013_v44 = vmul.f32 %v5400_v21, %v4099_v41 }
 0x79f   :  { %v4105_v15 = vpop.eup %4104 }
 0x7a0   :  { %v5406_v39 = vpop.eup %4106  ;;  %v1833_v38 = vadd.f32 1.0, %v4105_v15  ;;  %2051 = vrot.lane.b32.xlu0 %v2013_v44, %s4528_s2  ;;  %v3317_v44 = vmul.f32 -1.442695, %v1705_v49 }
 0x7a1   :  { %v1710_v60 = vpop.f32.mrb[60].mxu0  ;;  %v2014_v19 = vmul.f32 %v5406_v39, %v4103_v10  ;;  %v4109_v1 = vpop.eup %4108 }
 0x7a2   :  { %v1712_v50 = vpop.f32.mrb[61].mxu0  ;;  %4118 = vrcp.f32 %v1833_v38  ;;  %v1835_v15 = vadd.f32 1.0, %v4109_v1  ;;  %v4111_v26 = vpop.eup %4110  ;;  %v1711_v59 = vadd.f32 %v1710_v60, %v6030_v2  ;;  %v5428_v60 = vadd.f32 %v1702_v62, %v4955_v37 }
 0x7a3   :  { %v1714_v41 = vpop.f32.mrb[62].mxu0  ;;  %4120 = vpow2.f32 %v3315_v40  ;;  %2053 = vrot.lane.b32.xlu1 %v2014_v19, %s4528_s2  ;;  %v5439_v62 = vadd.f32 %v1706_v27, %v4955_v37 }
 0x7a4   :  { %v1716_v20 = vpop.f32.mrb[63].mxu0  ;;  %4122 = vtanh.f32 %v5413_v24  ;;  %v3319_v19 = vmul.f32 -1.442695, %v1711_v59  ;;  %v1715_v1 = vadd.f32 %v1714_v41, %v6030_v2 }
 0x7a5   :  { %v5418_v0 = vpop.eup %4112  ;;  %4124 = vrcp.f32 %v1835_v15 }
 0x7a6   :  { %v2015_v10 = vmul.f32 %v5418_v0, %v4111_v26  ;;  %v4115_v40 = vpop.eup %4114  ;;  %4126 = vpow2.f32 %v3317_v44  ;;  %v3321_v44 = vmul.f32 -1.442695, %v1715_v1 }
 0x7a7   :  { %v1837_v38 = vadd.f32 1.0, %v4115_v40  ;;  %v4117_v49 = vpop.eup %4116  ;;  %4128 = vtanh.f32 %v5422_v14 }
 0x7a8   :  { %2055 = vrot.lane.b32.xlu1 %v2015_v10, %s4528_s2 }
 0x7a9   :  { %4130 = vrcp.f32 %v1837_v38 }
 0x7aa   :  { %4132 = vpow2.f32 %v3319_v19 }
 0x7ab   :  { %4134 = vtanh.f32 %v5428_v60 }
 0x7ac   :  { %v5431_v15 = vpop.eup %4118 }
 0x7ad   :  { %v4121_v45 = vpop.eup %4120  ;;  %v2016_v26 = vmul.f32 %v5431_v15, %v4117_v49 }
 0x7ae   :  { %v1839_v25 = vadd.f32 1.0, %v4121_v45  ;;  %v4123_v59 = vpop.eup %4122  ;;  %v5450_v45 = vpop.permute.xlu1 %1945 }
 0x7af   :  { %2057 = vrot.lane.b32.xlu0 %v2016_v26, %s4528_s2  ;;  %v5436_v10 = vpop.eup %4124  ;;  %v1992_v36 = vmul.f32 %v5337_v43, %v5450_v45 }
 0x7b0   :  { %4136 = vrcp.f32 %v1839_v25  ;;  %v2017_v2 = vmul.f32 %v5436_v10, %v4123_v59  ;;  %v4127_v41 = vpop.eup %4126  ;;  %v5447_v25 = vadd.f32 %v1712_v50, %v4955_v37  ;;  %v1944_v59 = vpop.permute.xlu0 %1943 }
 0x7b1   :  { %4138 = vpow2.f32 %v3321_v44  ;;  %v1841_v40 = vadd.f32 1.0, %v4127_v41  ;;  %v4129_v38 = vpop.eup %4128 }
 0x7b2   :  { %4140 = vtanh.f32 %v5439_v62  ;;  %v5461_v34 = vpop.permute.xlu1 %1949 }
 0x7b3   :  { %2059 = vrot.lane.b32.xlu0 %v2017_v2, %s4528_s2  ;;  %v5444_v19 = vpop.eup %4130  ;;  %4142 = vrcp.f32 %v1841_v40  ;;  %v5457_v2 = vadd.f32 %v1716_v20, %v4955_v37 }
 0x7b4   :  { %v2018_v49 = vmul.f32 %v5444_v19, %v4129_v38  ;;  %v4133_v27 = vpop.eup %4132  ;;  %4144 = vtanh.f32 %v5447_v25 }
 0x7b5   :  { %v4135_v1 = vpop.eup %4134  ;;  %v1843_v26 = vadd.f32 1.0, %v4133_v27  ;;  %v1948_v27 = vpop.permute.xlu0 %1947 }
 0x7b6   :  { %2061 = vrot.lane.b32.xlu1 %v2018_v49, %s4528_s2 }
 0x7b7   :  { %4146 = vrcp.f32 %v1843_v26 }
 0x7b8   :  { %4148 = vtanh.f32 %v5457_v2 }
 0x7ba   :  { %v5453_v44 = vpop.eup %4136 }
 0x7bb   :  { %v2019_v50 = vmul.f32 %v5453_v44, %v4135_v1  ;;  %v4139_v41 = vpop.eup %4138  ;;  %v5470_v1 = vpop.permute.xlu1 %1953 }
 0x7bc   :  { %v1845_v40 = vadd.f32 1.0, %v4139_v41  ;;  %v4141_v38 = vpop.eup %4140  ;;  %v5473_v41 = vpop.permute.xlu0 %1951 }
 0x7bd   :  { %2063 = vrot.lane.b32.xlu1 %v2019_v50, %s4528_s2  ;;  %v5464_v49 = vpop.eup %4142 }
 0x7be   :  { %4150 = vrcp.f32 %v1845_v40  ;;  %v2020_v26 = vmul.f32 %v5464_v49, %v4141_v38  ;;  %v4145_v37 = vpop.eup %4144 }
 0x7bf   :  { %v5478_v40 = vpop.permute.xlu1 %1957 }
 0x7c0   :  { %2065 = vrot.lane.b32.xlu0 %v2020_v26, %s4528_s2  ;;  %v5483_v26 = vpop.permute.xlu0 %1955 }
 0x7c1   :  { %v5468_v20 = vpop.eup %4146 }
 0x7c2   :  { %v2021_v50 = vmul.f32 %v5468_v20, %v4145_v37  ;;  %v4149_v35 = vpop.eup %4148 }
 0x7c3   :  { %v5488_v37 = vpop.permute.xlu1 %1961 }
 0x7c4   :  { %2067 = vrot.lane.b32.xlu0 %v2021_v50, %s4528_s2  ;;  %v3323_v50 = vld [vmem:[#allocation2] ss:$0 sm:$0xff]  ;;  %v5492_v51 = vpop.permute.xlu0 %1959 }
 0x7c8   :  { %v5476_v6 = vpop.eup %4150  ;;  %3771 = vrot.lane.b32.xlu0 %v5200_v63, %s4528_s2  ;;  %v5496_v63 = vpop.permute.xlu1 %1965 }
 0x7c9   :  { %v2022_v38 = vmul.f32 %v5476_v6, %v4149_v35  ;;  %v5498_v35 = vpop.permute.xlu0 %1963 }
 0x7cb   :  { %2069 = vrot.lane.b32.xlu1 %v2022_v38, %s4528_s2 }
 0x7cc   :  { %3781 = vrot.lane.b32.xlu0 %v5208_v16, %s4528_s2  ;;  %v5500_v3 = vpop.permute.xlu1 %3756  ;;  %v3292_v16 = vmul.f32 -1.442695, %v5316_v18 }
 0x7cd   :  { %v3752_v38 = vpop.permute.xlu0 %3751 }
 0x7ce   :  { %4152 = vpow2.f32 %v3292_v16  ;;  %v1991_v16 = vmul.f32 %v5333_v7, %v1944_v59  ;;  %v3753_v48 = vunpack.i.l.bf16 %v3752_v38 }
 0x7cf   :  { %3776 = vrot.lane.b32.xlu1 %v5204_v33, %s4528_s2  ;;  %4154 = vpow2.f32 %v3294_v4 }
 0x7d0   :  { %2231 = vperm.xlu0 %3790, %v3323_v50   ;;  %v5506_v5 = vpop.permute.xlu1 %1969  ;;  %4156 = vpow2.f32 %v3296_v11 }
 0x7d1   :  { %v5504_v33 = vpop.permute.xlu0 %1967 }
 0x7d3   :  { %3786 = vrot.lane.b32.xlu1 %v5212_v22, %s4528_s2 }
 0x7d4   :  { %v5510_v22 = vpop.permute.xlu1 %1973 }
 0x7d5   :  { %v5508_v50 = vpop.permute.xlu0 %1971 }
 0x7d8   :  { %v4153_v57 = vpop.eup %4152  ;;  %v5515_v18 = vpop.permute.xlu1 %3766 }
 0x7d9   :  { %v5513_v46 = vpop.permute.xlu0 %3761  ;;  %v4155_v56 = vpop.eup %4154  ;;  %v1816_v31 = vadd.f32 1.0, %v4153_v57  ;;  %v3300_v57 = vmul.f32 -1.442695, %v5349_v29  ;;  %v3754_v29 = vunpack.i.h.bf16 %v3752_v38 }
 0x7da   :  { %v1818_v53 = vadd.f32 1.0, %v4155_v56  ;;  %v4157_v11 = vpop.eup %4156 }
 0x7db   :  { %4158 = vrcp.f32 %v1816_v31  ;;  %v1820_v7 = vadd.f32 1.0, %v4157_v11  ;;  %v1993_v31 = vmul.f32 %v5351_v8, %v1948_v27  ;;  %v1994_v8 = vmul.f32 %v5362_v17, %v5461_v34 }
 0x7dc   :  { %4160 = vpow2.f32 %v3298_v58  ;;  %v3308_v34 = vmul.f32 -1.442695, %v5394_v42 }
 0x7e5   :  { %v4159_v56 = vpop.eup %4158 }
 0x7e6   :  { %v4161_v59 = vpop.eup %4160 }
 0x7f1   :  { %v2040_v4 = vpop.permute.xlu0 %2039 }
 0x7f2   :  { %v2087_v55 = vadd.f32 %v2040_v4, %v1991_v16  ;;  %v3306_v4 = vmul.f32 -1.442695, %v5369_v9  ;;  %v1995_v9 = vmul.f32 %v5382_v61, %v5473_v41  ;;  %v3310_v61 = vmul.f32 -1.442695, %v5403_v23 }
 0x7f3   :  { %v2042_v13 = vpop.permute.xlu1 %2041 }
 0x7f4   :  { %4162 = vtanh.f32 %v2087_v55  ;;  %v2088_v54 = vadd.f32 %v2042_v13, %v1992_v36 }
 0x7f5   :  { %4164 = vrcp.f32 %v1818_v53  ;;  %v3304_v53 = vmul.f32 -1.442695, %v5365_v28 }
 0x7f6   :  { %4166 = vtanh.f32 %v2088_v54  ;;  %v1822_v54 = vadd.f32 1.0, %v4161_v59 }
 0x7f7   :  { %4168 = vpow2.f32 %v3300_v57 }
 0x7f8   :  { %4170 = vpow2.f32 %v3302_v12 }
 0x7f9   :  { %4172 = vrcp.f32 %v1820_v7 }
 0x7fe   :  { %v2044_v16 = vpop.permute.xlu0 %2043  ;;  %v4163_v43 = vpop.eup %4162 }
 0x7ff   :  { %v2089_v45 = vadd.f32 %v2044_v16, %v1993_v31  ;;  %v4165_v58 = vpop.eup %4164  ;;  %v2119_v55 = vmul.f32 %v4163_v43, %v4159_v56 }
 0x800   :  { %v4167_v36 = vpop.eup %4166 }
 0x801   :  { %4174 = vtanh.f32 %v2089_v45  ;;  %v2120_v13 = vmul.f32 %v4167_v36, %v4165_v58  ;;  %v2046_v27 = vpop.permute.xlu1 %2045  ;;  %v2184_v57 = vsel %vm2183_vm5, %v3753_v48, %v2119_v55  ;;  %v4169_v28 = vpop.eup %4168  ;;  %v1996_v58 = vmul.f32 %v5389_v52, %v5470_v1 }
 0x802   :  { %4176 = vpow2.f32 %v3304_v53  ;;  %v2090_v12 = vadd.f32 %v2046_v27, %v1994_v8  ;;  %v4171_v38 = vpop.eup %4170  ;;  %v1824_v56 = vadd.f32 1.0, %v4169_v28  ;;  %v3759_v48 = vunpack.i.h.bf16 %v5500_v3 }
 0x803   :  { %v2185_v11 = vsel %vm2183_vm5, %v3754_v29, %v2120_v13  ;;  %4178 = vrcp.f32 %v1822_v54  ;;  %v4173_v31 = vpop.eup %4172  ;;  %v1826_v16 = vadd.f32 1.0, %v4171_v38  ;;  %v1997_v52 = vmul.f32 %v5400_v21, %v5483_v26 }
 0x804   :  { %v2200_v7 = vpack.c.bf16 %v2185_v11, %v2184_v57  ;;  %4180 = vpow2.f32 %v3306_v4  ;;  %v3758_v4 = vunpack.i.l.bf16 %v5500_v3  ;;  %v3312_v27 = vmul.f32 -1.442695, %v5413_v24 }
 0x805   :  { %4182 = vtanh.f32 %v2090_v12  ;;  %v1998_v28 = vmul.f32 %v5406_v39, %v5478_v40  ;;  %v3763_v39 = vunpack.i.l.bf16 %v5513_v46 }
 0x806   :  { %3549 = vmatprep.mubr.bf16.mxu1 %v2200_v7  ;;  %4184 = vrcp.f32 %v1824_v56 }
 0x80a   :  { %v2048_v17 = vpop.permute.xlu0 %2047 }
 0x80b   :  { %v4175_v59 = vpop.eup %4174  ;;  %v2091_v43 = vadd.f32 %v2048_v17, %v1995_v9  ;;  %v3314_v9 = vmul.f32 -1.442695, %v5422_v14 }
 0x80c   :  { %v2121_v45 = vmul.f32 %v4175_v59, %v4173_v31  ;;  %v2050_v53 = vpop.permute.xlu1 %2049  ;;  %v4177_v55 = vpop.eup %4176  ;;  %v1999_v59 = vmul.f32 %v5418_v0, %v5492_v51  ;;  %v2000_v51 = vmul.f32 %v5431_v15, %v5488_v37 }
 0x80d   :  { %4186 = vtanh.f32 %v2091_v43  ;;  %v2092_v36 = vadd.f32 %v2050_v53, %v1996_v58  ;;  %v4179_v54 = vpop.eup %4178  ;;  %v1828_v29 = vadd.f32 1.0, %v4177_v55  ;;  %v3316_v43 = vmul.f32 -1.442695, %v5428_v60 }
 0x80e   :  { %4188 = vpow2.f32 %v3308_v34  ;;  %v4181_v41 = vpop.eup %4180  ;;  %v2186_v23 = vsel %vm2183_vm5, %v3758_v4, %v2121_v45  ;;  %v3764_v34 = vunpack.i.h.bf16 %v5513_v46  ;;  %v3769_v4 = vunpack.i.h.bf16 %v5515_v18 }
 0x80f   :  { %4190 = vrcp.f32 %v1826_v16  ;;  %v4183_v42 = vpop.eup %4182  ;;  %v1830_v1 = vadd.f32 1.0, %v4181_v41 }
 0x810   :  { %4192 = vtanh.f32 %v2092_v36  ;;  %v2122_v13 = vmul.f32 %v4183_v42, %v4179_v54  ;;  %v4185_v3 = vpop.eup %4184 }
 0x811   :  { %4194 = vpow2.f32 %v3310_v61 }
 0x812   :  { %v2052_v8 = vpop.permute.xlu0 %2051  ;;  %v2187_v11 = vsel %vm2183_vm5, %v3759_v48, %v2122_v13  ;;  %4196 = vrcp.f32 %v1828_v29  ;;  %v3318_v29 = vmul.f32 -1.442695, %v5439_v62  ;;  %v3768_v13 = vunpack.i.l.bf16 %v5515_v18 }
 0x813   :  { %v2093_v57 = vadd.f32 %v2052_v8, %v1997_v52  ;;  %v2201_v12 = vpack.c.bf16 %v2187_v11, %v2186_v23  ;;  %v2001_v8 = vmul.f32 %v5436_v10, %v5498_v35  ;;  %v3320_v23 = vmul.f32 -1.442695, %v5447_v25 }
 0x814   :  { %v2002_v10 = vmul.f32 %v5444_v19, %v5496_v63 }
 0x815   :  { %4198 = vtanh.f32 %v2093_v57  ;;  %v2054_v7 = vpop.permute.xlu1 %2053  ;;  %3550 = vmatmul.mubr.bf16.vlgmr.msra.gmra.mrb[64].mxu1 %v2201_v12 }
 0x816   :  { %4200 = vrcp.f32 %v1830_v1  ;;  %v2094_v21 = vadd.f32 %v2054_v7, %v1998_v28 }
 0x817   :  { %v4187_v38 = vpop.eup %4186  ;;  %4202 = vpow2.f32 %v3312_v27 }
 0x818   :  { %v4189_v26 = vpop.eup %4188  ;;  %v2123_v24 = vmul.f32 %v4187_v38, %v4185_v3  ;;  %4204 = vtanh.f32 %v2094_v21  ;;  %v3322_v38 = vmul.f32 -1.442695, %v5457_v2  ;;  %v2004_v2 = vmul.f32 %v5464_v49, %v5506_v5 }
 0x819   :  { %v4191_v56 = vpop.eup %4190  ;;  %v1832_v40 = vadd.f32 1.0, %v4189_v26  ;;  %4206 = vpow2.f32 %v3314_v9 }
 0x81a   :  { %v4193_v31 = vpop.eup %4192  ;;  %v2056_v45 = vpop.permute.xlu1 %2055  ;;  %v2188_v58 = vsel %vm2183_vm5, %v3763_v39, %v2123_v24 }
 0x81b   :  { %v2124_v17 = vmul.f32 %v4193_v31, %v4191_v56  ;;  %v4195_v16 = vpop.eup %4194  ;;  %v2095_v53 = vadd.f32 %v2056_v45, %v1999_v59  ;;  %4208 = vrcp.f32 %v1832_v40  ;;  %v2003_v56 = vmul.f32 %v5453_v44, %v5504_v33 }
 0x81c   :  { %v4197_v36 = vpop.eup %4196  ;;  %v1834_v46 = vadd.f32 1.0, %v4195_v16 }
 0x81d   :  { %v2189_v14 = vsel %vm2183_vm5, %v3764_v34, %v2124_v17  ;;  %4210 = vtanh.f32 %v2095_v53 }
 0x81e   :  { %v2202_v55 = vpack.c.bf16 %v2189_v14, %v2188_v58  ;;  %4212 = vpow2.f32 %v3316_v43  ;;  %v2005_v58 = vmul.f32 %v5468_v20, %v5508_v50 }
 0x81f   :  { %v4199_v54 = vpop.eup %4198  ;;  %4214 = vrcp.f32 %v1834_v46 }
 0x820   :  { %3553 = vmatprep.mubr.bf16.mxu1 %v2202_v55  ;;  %v4201_v61 = vpop.eup %4200  ;;  %v2125_v0 = vmul.f32 %v4199_v54, %v4197_v36 }
 0x821   :  { %v4203_v60 = vpop.eup %4202  ;;  %v2058_v41 = vpop.permute.xlu0 %2057 }
 0x822   :  { %v4205_v42 = vpop.eup %4204  ;;  %v2096_v48 = vadd.f32 %v2058_v41, %v2000_v51  ;;  %v1836_v1 = vadd.f32 1.0, %v4203_v60  ;;  %v2190_v15 = vsel %vm2183_vm5, %v3768_v13, %v2125_v0 }
 0x823   :  { %v2126_v52 = vmul.f32 %v4205_v42, %v4201_v61  ;;  %v4207_v27 = vpop.eup %4206  ;;  %v2006_v61 = vmul.f32 %v5476_v6, %v5510_v22 }
 0x824   :  { %4216 = vtanh.f32 %v2096_v48  ;;  %v1838_v12 = vadd.f32 1.0, %v4207_v27 }
 0x825   :  { %v2191_v37 = vsel %vm2183_vm5, %v3769_v4, %v2126_v52  ;;  %4218 = vpow2.f32 %v3318_v29  ;;  %v2060_v57 = vpop.permute.xlu0 %2059  ;;  %v4209_v28 = vpop.eup %4208 }
 0x826   :  { %v2203_v62 = vpack.c.bf16 %v2191_v37, %v2190_v15  ;;  %v2097_v11 = vadd.f32 %v2060_v57, %v2001_v8  ;;  %4220 = vrcp.f32 %v1836_v1 }
 0x827   :  { %v4211_v18 = vpop.eup %4210 }
 0x828   :  { %3554 = vmatmul.mubr.bf16.gmra.mrb[68].mxu1 %v2203_v62  ;;  %4222 = vtanh.f32 %v2097_v11  ;;  %v4213_v3 = vpop.eup %4212  ;;  %v2127_v35 = vmul.f32 %v4211_v18, %v4209_v28  ;;  %v2062_v7 = vpop.permute.xlu1 %2061 }
 0x829   :  { %4224 = vpow2.f32 %v3320_v23  ;;  %v2098_v21 = vadd.f32 %v2062_v7, %v2002_v10  ;;  %v4215_v26 = vpop.eup %4214  ;;  %v1840_v25 = vadd.f32 1.0, %v4213_v3 }
 0x82a   :  { %4226 = vrcp.f32 %v1838_v12 }
 0x82b   :  { %4228 = vtanh.f32 %v2098_v21 }
 0x82c   :  { %4230 = vpow2.f32 %v3322_v38 }
 0x82d   :  { %4232 = vrcp.f32 %v1840_v25 }
 0x82e   :  { %v4217_v24 = vpop.eup %4216 }
 0x82f   :  { %v2064_v9 = vpop.permute.xlu1 %2063  ;;  %v2128_v31 = vmul.f32 %v4217_v24, %v4215_v26  ;;  %v4219_v34 = vpop.eup %4218 }
 0x830   :  { %v2099_v39 = vadd.f32 %v2064_v9, %v2003_v56  ;;  %v4221_v19 = vpop.eup %4220  ;;  %v1842_v40 = vadd.f32 1.0, %v4219_v34 }
 0x832   :  { %4234 = vtanh.f32 %v2099_v39  ;;  %v4223_v63 = vpop.eup %4222  ;;  %v2066_v16 = vpop.permute.xlu0 %2065 }
 0x833   :  { %v2129_v17 = vmul.f32 %v4223_v63, %v4221_v19  ;;  %v4225_v59 = vpop.eup %4224  ;;  %v2100_v43 = vadd.f32 %v2066_v16, %v2004_v2  ;;  %4236 = vrcp.f32 %v1842_v40 }
 0x834   :  { %v4227_v45 = vpop.eup %4226  ;;  %v1844_v33 = vadd.f32 1.0, %v4225_v59 }
 0x835   :  { %v4229_v44 = vpop.eup %4228  ;;  %4238 = vtanh.f32 %v2100_v43 }
 0x836   :  { %v2130_v14 = vmul.f32 %v4229_v44, %v4227_v45  ;;  %v4231_v53 = vpop.eup %4230  ;;  %v2068_v55 = vpop.permute.xlu0 %2067  ;;  %4240 = vrcp.f32 %v1844_v33 }
 0x837   :  { %v4233_v36 = vpop.eup %4232  ;;  %v2101_v54 = vadd.f32 %v2068_v55, %v2005_v58  ;;  %v1846_v5 = vadd.f32 1.0, %v4231_v53 }
 0x839   :  { %4242 = vtanh.f32 %v2101_v54 }
 0x83a   :  { %v3772_v51 = vpop.permute.xlu0 %3771  ;;  %4244 = vrcp.f32 %v1846_v5 }
 0x83b   :  { %v3774_v60 = vunpack.i.h.bf16 %v3772_v51  ;;  %v3773_v41 = vunpack.i.l.bf16 %v3772_v51 }
 0x83c   :  { %v4235_v46 = vpop.eup %4234 }
 0x83d   :  { %v2131_v49 = vmul.f32 %v4235_v46, %v4233_v36  ;;  %v2070_v0 = vpop.permute.xlu1 %2069  ;;  %v4237_v29 = vpop.eup %4236  ;;  %v2192_v20 = vsel %vm2183_vm5, %v3773_v41, %v2127_v35  ;;  %v2193_v50 = vsel %vm2183_vm5, %v3774_v60, %v2128_v31 }
 0x83e   :  { %v2102_v42 = vadd.f32 %v2070_v0, %v2006_v61  ;;  %v3782_v4 = vpop.permute.xlu0 %3781  ;;  %v2204_v13 = vpack.c.bf16 %v2193_v50, %v2192_v20 }
 0x83f   :  { %v4239_v48 = vpop.eup %4238  ;;  %v3784_v1 = vunpack.i.h.bf16 %v3782_v4  ;;  %v3783_v8 = vunpack.i.l.bf16 %v3782_v4 }
 0x840   :  { %4246 = vtanh.f32 %v2102_v42  ;;  %v2132_v15 = vmul.f32 %v4239_v48, %v4237_v29  ;;  %3557 = vmatprep.mubr.bf16.mxu1 %v2204_v13  ;;  %v4241_v57 = vpop.eup %4240 }
 0x841   :  { %v3777_v52 = vpop.permute.xlu1 %3776  ;;  %v2196_v37 = vsel %vm2183_vm5, %v3783_v8, %v2131_v49 }
 0x842   :  { %v3779_v6 = vunpack.i.h.bf16 %v3777_v52  ;;  %v3778_v22 = vunpack.i.l.bf16 %v3777_v52  ;;  %v2197_v27 = vsel %vm2183_vm5, %v3784_v1, %v2132_v15 }
 0x843   :  { %v2206_v11 = vpack.c.bf16 %v2197_v27, %v2196_v37  ;;  %v4243_v28 = vpop.eup %4242 }
 0x844   :  { %v2194_v62 = vsel %vm2183_vm5, %v3778_v22, %v2129_v17  ;;  %v2195_v23 = vsel %vm2183_vm5, %v3779_v6, %v2130_v14  ;;  %v2133_v12 = vmul.f32 %v4243_v28, %v4241_v57  ;;  %v4245_v10 = vpop.eup %4244 }
 0x845   :  { %v2205_v18 = vpack.c.bf16 %v2195_v23, %v2194_v62  ;;  %v3787_v3 = vpop.permute.xlu1 %3786 }
 0x846   :  { %v3789_v7 = vunpack.i.h.bf16 %v3787_v3  ;;  %v3788_v38 = vunpack.i.l.bf16 %v3787_v3 }
 0x847   :  { %3558 = vmatmul.mubr.bf16.gmra.mrb[72].mxu1 %v2205_v18 }
 0x848   :  { %3561 = vmatprep.mubr.bf16.mxu1 %v2206_v11  ;;  %v2198_v26 = vsel %vm2183_vm5, %v3788_v38, %v2133_v12 }
 0x84a   :  { %v4247_v35 = vpop.eup %4246 }
 0x84b   :  { %v2134_v21 = vmul.f32 %v4247_v35, %v4245_v10 }
 0x84d   :  { %v2199_v25 = vsel %vm2183_vm5, %v3789_v7, %v2134_v21 }
 0x84e   :  { %v2207_v24 = vpack.c.bf16 %v2199_v25, %v2198_v26 }
 0x84f   :  { %v2232_v56 = vpop.permute.xlu0 %2231 }
 0x850   :  { %3562 = vmatmul.mubr.bf16.gmra.mrb[76].mxu1 %v2207_v24 }
 0x8e8   :  { %v3551_v9 = vpop.f32.mrb[64].mxu1 }
 0x8e9   :  { %v2316_v31 = vpop.f32.mrb[65].mxu1  ;;  %v5584_v63 = vadd.f32 %v3551_v9, %v2232_v56 }
 0x8ea   :  { %v5582_v34 = vadd.f32 %v2316_v31, %v2232_v56  ;;  %v3552_v39 = vpop.f32.mrb[66].mxu1 }
 0x8eb   :  { %v2319_v19 = vpop.f32.mrb[67].mxu1  ;;  %v5590_v17 = vadd.f32 %v3552_v39, %v2232_v56  ;;  %v2386_v16 = vsel %vm2379_vm6, %v5584_v63, -inf }
 0x8ec   :  { %v5586_v40 = vadd.f32 %v2319_v19, %v2232_v56  ;;  %v2380_v2 = vsel %vm2379_vm6, %v5582_v34, -inf }
 0x8ed   :  { %2381 = vmax.xlane.f32.xlu1 %v2380_v2  ;;  %v2389_v43 = vsel %vm2379_vm6, %v5590_v17, -inf }
 0x8ee   :  { %v2383_v59 = vsel %vm2379_vm6, %v5586_v40, -inf }
 0x8ef   :  { %2384 = vmax.xlane.f32.xlu0 %v2383_v59 }
 0x8f1   :  { %2387 = vmax.xlane.f32.xlu1 %v2386_v16 }
 0x8f3   :  { %2390 = vmax.xlane.f32.xlu0 %v2389_v43 }
 0x8fb   :  { %v3555_v45 = vpop.f32.mrb[68].mxu1 }
 0x8fc   :  { %v2332_v44 = vpop.f32.mrb[69].mxu1  ;;  %v5600_v53 = vadd.f32 %v3555_v45, %v2232_v56 }
 0x8fd   :  { %v5598_v33 = vadd.f32 %v2332_v44, %v2232_v56  ;;  %v3556_v58 = vpop.f32.mrb[70].mxu1 }
 0x8fe   :  { %v2335_v14 = vpop.f32.mrb[71].mxu1  ;;  %v5606_v54 = vadd.f32 %v3556_v58, %v2232_v56  ;;  %v2398_v5 = vsel %vm2379_vm6, %v5600_v53, -inf }
 0x8ff   :  { %v5602_v55 = vadd.f32 %v2335_v14, %v2232_v56  ;;  %v2392_v36 = vsel %vm2379_vm6, %v5598_v33, -inf }
 0x900   :  { %2393 = vmax.xlane.f32.xlu1 %v2392_v36  ;;  %v2401_v49 = vsel %vm2379_vm6, %v5606_v54, -inf }
 0x901   :  { %v2395_v46 = vsel %vm2379_vm6, %v5602_v55, -inf }
 0x902   :  { %2396 = vmax.xlane.f32.xlu0 %v2395_v46 }
 0x904   :  { %2399 = vmax.xlane.f32.xlu1 %v2398_v5 }
 0x906   :  { %2402 = vmax.xlane.f32.xlu0 %v2401_v49 }
 0x91a   :  { %v3559_v61 = vpop.f32.mrb[72].mxu1 }
 0x91b   :  { %v2348_v51 = vpop.f32.mrb[73].mxu1  ;;  %v5616_v42 = vadd.f32 %v3559_v61, %v2232_v56 }
 0x91c   :  { %v5614_v0 = vadd.f32 %v2348_v51, %v2232_v56  ;;  %v3560_v60 = vpop.f32.mrb[74].mxu1 }
 0x91d   :  { %v2351_v41 = vpop.f32.mrb[75].mxu1  ;;  %v5622_v50 = vadd.f32 %v3560_v60, %v2232_v56  ;;  %v2410_v4 = vsel %vm2379_vm6, %v5616_v42, -inf }
 0x91e   :  { %v5618_v29 = vadd.f32 %v2351_v41, %v2232_v56  ;;  %v2404_v20 = vsel %vm2379_vm6, %v5614_v0, -inf }
 0x91f   :  { %2405 = vmax.xlane.f32.xlu1 %v2404_v20  ;;  %v2413_v1 = vsel %vm2379_vm6, %v5622_v50, -inf }
 0x920   :  { %v2407_v48 = vsel %vm2379_vm6, %v5618_v29, -inf }
 0x921   :  { %2408 = vmax.xlane.f32.xlu0 %v2407_v48 }
 0x923   :  { %v3563_v13 = vpop.f32.mrb[76].mxu1  ;;  %2411 = vmax.xlane.f32.xlu1 %v2410_v4 }
 0x924   :  { %v2364_v52 = vpop.f32.mrb[77].mxu1  ;;  %v5632_v22 = vadd.f32 %v3563_v13, %v2232_v56 }
 0x925   :  { %v5630_v8 = vadd.f32 %v2364_v52, %v2232_v56  ;;  %v3564_v15 = vpop.f32.mrb[78].mxu1  ;;  %2414 = vmax.xlane.f32.xlu0 %v2413_v1 }
 0x926   :  { %v2367_v6 = vpop.f32.mrb[79].mxu1  ;;  %v5638_v57 = vadd.f32 %v3564_v15, %v2232_v56  ;;  %v2422_v23 = vsel %vm2379_vm6, %v5632_v22, -inf }
 0x927   :  { %v5634_v37 = vadd.f32 %v2367_v6, %v2232_v56  ;;  %v2416_v27 = vsel %vm2379_vm6, %v5630_v8, -inf }
 0x928   :  { %2417 = vmax.xlane.f32.xlu1 %v2416_v27  ;;  %v2425_v11 = vsel %vm2379_vm6, %v5638_v57, -inf }
 0x929   :  { %v2419_v62 = vsel %vm2379_vm6, %v5634_v37, -inf }
 0x92a   :  { %2420 = vmax.xlane.f32.xlu0 %v2419_v62 }
 0x92c   :  { %2423 = vmax.xlane.f32.xlu1 %v2422_v23 }
 0x92e   :  { %2426 = vmax.xlane.f32.xlu0 %v2425_v11 }
 0x97a   :  { %v2382_v28 = vpop.xlane.xlu1 %2381 }
 0x97b   :  { %v2428_v18 = vsub.f32 %v5582_v34, %v2382_v28 }
 0x97c   :  { %v2385_v12 = vpop.xlane.xlu0 %2384 }
 0x97d   :  { %v2429_v10 = vsub.f32 %v5586_v40, %v2385_v12  ;;  %v2444_v7 = vmul.f32 1.442695, %v2428_v18 }
 0x97e   :  { %v2388_v3 = vpop.xlane.xlu1 %2387 }
 0x97f   :  { %v2430_v35 = vsub.f32 %v5584_v63, %v2388_v3  ;;  %v2446_v25 = vmul.f32 1.442695, %v2429_v10 }
 0x980   :  { %v2391_v38 = vpop.xlane.xlu0 %2390 }
 0x981   :  { %v2448_v21 = vmul.f32 1.442695, %v2430_v35  ;;  %v2431_v26 = vsub.f32 %v5590_v17, %v2391_v38 }
 0x983   :  { %4248 = vpow2.f32 %v2448_v21  ;;  %v2450_v24 = vmul.f32 1.442695, %v2431_v26 }
 0x984   :  { %4250 = vpow2.f32 %v2444_v7 }
 0x985   :  { %4252 = vpow2.f32 %v2450_v24 }
 0x986   :  { %4254 = vpow2.f32 %v2446_v25 }
 0x98d   :  { %v2394_v56 = vpop.xlane.xlu1 %2393  ;;  %v5650_v9 = vpop.eup %4248 }
 0x98e   :  { %v5652_v31 = vpop.eup %4250  ;;  %v2432_v34 = vsub.f32 %v5598_v33, %v2394_v56  ;;  %v2482_v19 = vsel %vm2379_vm6, %v5650_v9, 0.0 }
 0x98f   :  { %v2397_v39 = vpop.xlane.xlu0 %2396  ;;  %v5657_v63 = vpop.eup %4252  ;;  %2483 = vadd.xlane.f32.xlu1 %v2482_v19  ;;  %v2476_v44 = vsel %vm2379_vm6, %v5652_v31, 0.0 }
 0x990   :  { %v2485_v2 = vsel %vm2379_vm6, %v5657_v63, 0.0  ;;  %v5661_v17 = vpop.eup %4254  ;;  %v2433_v59 = vsub.f32 %v5602_v55, %v2397_v39  ;;  %v2452_v43 = vmul.f32 1.442695, %v2432_v34 }
 0x991   :  { %v2400_v40 = vpop.xlane.xlu1 %2399  ;;  %2486 = vadd.xlane.f32.xlu0 %v2485_v2  ;;  %v2479_v14 = vsel %vm2379_vm6, %v5661_v17, 0.0 }
 0x992   :  { %v2434_v16 = vsub.f32 %v5600_v53, %v2400_v40  ;;  %v2454_v36 = vmul.f32 1.442695, %v2433_v59 }
 0x993   :  { %v2403_v45 = vpop.xlane.xlu0 %2402  ;;  %2477 = vadd.xlane.f32.xlu1 %v2476_v44 }
 0x994   :  { %v2456_v33 = vmul.f32 1.442695, %v2434_v16  ;;  %v2435_v58 = vsub.f32 %v5606_v54, %v2403_v45 }
 0x995   :  { %2480 = vadd.xlane.f32.xlu0 %v2479_v14 }
 0x996   :  { %4256 = vpow2.f32 %v2456_v33  ;;  %v2458_v46 = vmul.f32 1.442695, %v2435_v58 }
 0x997   :  { %4258 = vpow2.f32 %v2452_v43 }
 0x998   :  { %4260 = vpow2.f32 %v2458_v46 }
 0x999   :  { %4262 = vpow2.f32 %v2454_v36 }
 0x9a0   :  { %v5670_v53 = vpop.eup %4256 }
 0x9a1   :  { %v5672_v55 = vpop.eup %4258  ;;  %v2494_v5 = vsel %vm2379_vm6, %v5670_v53, 0.0 }
 0x9a2   :  { %v5676_v49 = vpop.eup %4260  ;;  %2495 = vadd.xlane.f32.xlu1 %v2494_v5  ;;  %v2488_v51 = vsel %vm2379_vm6, %v5672_v55, 0.0  ;;  %v4536_v5 = vmov 1  }
 0x9a3   :  { %v2497_v54 = vsel %vm2379_vm6, %v5676_v49, 0.0  ;;  %v5680_v61 = vpop.eup %4262 }
 0x9a4   :  { %2498 = vadd.xlane.f32.xlu0 %v2497_v54  ;;  %v2491_v60 = vsel %vm2379_vm6, %v5680_v61, 0.0 }
 0x9a6   :  { %2489 = vadd.xlane.f32.xlu1 %v2488_v51 }
 0x9a8   :  { %2492 = vadd.xlane.f32.xlu0 %v2491_v60 }
 0x9ac   :  { %v2406_v41 = vpop.xlane.xlu1 %2405 }
 0x9ad   :  { %v2436_v20 = vsub.f32 %v5614_v0, %v2406_v41 }
 0x9ae   :  { %v2409_v48 = vpop.xlane.xlu0 %2408 }
 0x9af   :  { %v2437_v13 = vsub.f32 %v5618_v29, %v2409_v48  ;;  %v2460_v1 = vmul.f32 1.442695, %v2436_v20 }
 0x9b0   :  { %v2412_v4 = vpop.xlane.xlu1 %2411 }
 0x9b1   :  { %v2438_v52 = vsub.f32 %v5616_v42, %v2412_v4  ;;  %v2462_v62 = vmul.f32 1.442695, %v2437_v13 }
 0x9b2   :  { %v2415_v15 = vpop.xlane.xlu0 %2414 }
 0x9b3   :  { %v2464_v6 = vmul.f32 1.442695, %v2438_v52  ;;  %v2439_v27 = vsub.f32 %v5622_v50, %v2415_v15 }
 0x9b5   :  { %4264 = vpow2.f32 %v2464_v6  ;;  %v2466_v23 = vmul.f32 1.442695, %v2439_v27  ;;  %v2418_v11 = vpop.xlane.xlu1 %2417 }
 0x9b6   :  { %4266 = vpow2.f32 %v2460_v1  ;;  %v2440_v28 = vsub.f32 %v5630_v8, %v2418_v11 }
 0x9b7   :  { %4268 = vpow2.f32 %v2466_v23  ;;  %v2421_v0 = vpop.xlane.xlu0 %2420 }
 0x9b8   :  { %4270 = vpow2.f32 %v2462_v62  ;;  %v2441_v29 = vsub.f32 %v5634_v37, %v2421_v0  ;;  %v2468_v12 = vmul.f32 1.442695, %v2440_v28 }
 0x9b9   :  { %v2424_v18 = vpop.xlane.xlu1 %2423 }
 0x9ba   :  { %v2442_v42 = vsub.f32 %v5632_v22, %v2424_v18  ;;  %v2470_v35 = vmul.f32 1.442695, %v2441_v29 }
 0x9bb   :  { %v2427_v3 = vpop.xlane.xlu0 %2426 }
 0x9bc   :  { %v2472_v10 = vmul.f32 1.442695, %v2442_v42  ;;  %v2443_v50 = vsub.f32 %v5638_v57, %v2427_v3 }
 0x9be   :  { %4272 = vpow2.f32 %v2472_v10  ;;  %v2474_v7 = vmul.f32 1.442695, %v2443_v50 }
 0x9bf   :  { %v5694_v38 = vpop.eup %4264  ;;  %4274 = vpow2.f32 %v2468_v12 }
 0x9c0   :  { %v5696_v21 = vpop.eup %4266  ;;  %4276 = vpow2.f32 %v2474_v7  ;;  %v2506_v8 = vsel %vm2379_vm6, %v5694_v38, 0.0 }
 0x9c1   :  { %v5700_v37 = vpop.eup %4268  ;;  %2507 = vadd.xlane.f32.xlu1 %v2506_v8  ;;  %4278 = vpow2.f32 %v2470_v35  ;;  %v2500_v26 = vsel %vm2379_vm6, %v5696_v21, 0.0 }
 0x9c2   :  { %v2509_v22 = vsel %vm2379_vm6, %v5700_v37, 0.0  ;;  %v5704_v57 = vpop.eup %4270 }
 0x9c3   :  { %2510 = vadd.xlane.f32.xlu0 %v2509_v22  ;;  %v2503_v25 = vsel %vm2379_vm6, %v5704_v57, 0.0 }
 0x9c5   :  { %2501 = vadd.xlane.f32.xlu1 %v2500_v26 }
 0x9c7   :  { %2504 = vadd.xlane.f32.xlu0 %v2503_v25 }
 0x9c8   :  { %v5710_v24 = vpop.eup %4272 }
 0x9c9   :  { %v5712_v56 = vpop.eup %4274  ;;  %v2518_v34 = vsel %vm2379_vm6, %v5710_v24, 0.0 }
 0x9ca   :  { %v5716_v39 = vpop.eup %4276  ;;  %2519 = vadd.xlane.f32.xlu1 %v2518_v34  ;;  %v2512_v2 = vsel %vm2379_vm6, %v5712_v56, 0.0 }
 0x9cb   :  { %v2521_v19 = vsel %vm2379_vm6, %v5716_v39, 0.0  ;;  %v5720_v40 = vpop.eup %4278 }
 0x9cc   :  { %2522 = vadd.xlane.f32.xlu0 %v2521_v19  ;;  %v2515_v59 = vsel %vm2379_vm6, %v5720_v40, 0.0 }
 0x9ce   :  { %2513 = vadd.xlane.f32.xlu1 %v2512_v2 }
 0x9d0   :  { %2516 = vadd.xlane.f32.xlu0 %v2515_v59 }
 0xa1c   :  { %v2484_v16 = vpop.xlane.xlu1 %2483 }
 0xa1d   :  { %4280 = vrcp.f32 %v2484_v16  ;;  %v6032_v16 = vld [vmem:[#allocation34_spill] sm:$0xff] }
 0xa1e   :  { %v2487_v43 = vpop.xlane.xlu0 %2486 }
 0xa20   :  { %v2478_v45 = vpop.xlane.xlu1 %2477 }
 0xa21   :  { %4282 = vrcp.f32 %v2478_v45  ;;  %v6033_v45 = vld [vmem:[#allocation19_spill] sm:$0xff] }
 0xa22   :  { %v2481_v44 = vpop.xlane.xlu0 %2480 }
 0xa23   :  { %4284 = vrcp.f32 %v2481_v44 }
 0xa24   :  { %4286 = vrcp.f32 %v2487_v43 }
 0xa27   :  { %v4281_v33 = vpop.eup %4280 }
 0xa28   :  { %v2542_v58 = vmul.f32 %v4281_v33, %v5650_v9  ;;  %v6034_v33 = vld [vmem:[#allocation17_spill] sm:$0xff] }
 0xa2a   :  { %2568 = vperm.xlu0 %3790, %v2542_v58  }
 0xa2b   :  { %v4283_v14 = vpop.eup %4282 }
 0xa2c   :  { %v2540_v36 = vmul.f32 %v4283_v14, %v5652_v31  ;;  %v6035_v14 = vld [vmem:[#allocation33_spill] sm:$0xff] }
 0xa2d   :  { %v4285_v54 = vpop.eup %4284 }
 0xa2e   :  { %3791 = vset.pattern.permute.xlu0 %v4536_v5  ;;  %2558 = vperm.xlu1 %3792, %v2540_v36   ;;  %v2541_v60 = vmul.f32 %v4285_v54, %v5661_v17  ;;  %v4287_v41 = vpop.eup %4286 }
 0xa2f   :  { %v2496_v46 = vpop.xlane.xlu1 %2495  ;;  %2661 = vperm.xlu0 %3791, %v2542_v58   ;;  %v2543_v31 = vmul.f32 %v4287_v41, %v5657_v63 }
 0xa30   :  { %4288 = vrcp.f32 %v2496_v46  ;;  %v6036_v46 = vld [vmem:[#allocation20_spill] sm:$0xff] }
 0xa31   :  { %v2499_v51 = vpop.xlane.xlu0 %2498 }
 0xa32   :  { %3793 = vset.pattern.permute.xlu1 %v4536_v5 }
 0xa33   :  { %v2490_v9 = vpop.xlane.xlu1 %2489  ;;  %3796 = vset.pattern.permute.xlu0 %v6019_v47  ;;  %2653 = vperm.xlu1 %3793, %v2540_v36  }
 0xa34   :  { %2563 = vperm.xlu0 %3796, %v2541_v60   ;;  %4290 = vrcp.f32 %v2490_v9 }
 0xa35   :  { %v2493_v20 = vpop.xlane.xlu0 %2492 }
 0xa36   :  { %4292 = vrcp.f32 %v2493_v20 }
 0xa37   :  { %3794 = vset.pattern.permute.xlu1 %v6019_v47  ;;  %4294 = vrcp.f32 %v2499_v51 }
 0xa38   :  { %2573 = vperm.xlu1 %3794, %v2543_v31  }
 0xa3a   :  { %v4289_v48 = vpop.eup %4288 }
 0xa3b   :  { %v2546_v4 = vmul.f32 %v4289_v48, %v5670_v53 }
 0xa3c   :  { %3795 = vset.pattern.permute.xlu1 %v4536_v5 }
 0xa3d   :  { %2588 = vperm.xlu0 %3796, %v2546_v4   ;;  %2665 = vperm.xlu1 %3795, %v2543_v31  }
 0xa3e   :  { %v4291_v17 = vpop.eup %4290 }
 0xa3f   :  { %v2544_v52 = vmul.f32 %v4291_v17, %v5672_v55 }
 0xa40   :  { %v4293_v13 = vpop.eup %4292 }
 0xa41   :  { %3797 = vset.pattern.permute.xlu0 %v4536_v5  ;;  %2657 = vperm.xlu1 %3795, %v2541_v60   ;;  %v2545_v63 = vmul.f32 %v4293_v13, %v5680_v61  ;;  %v4295_v53 = vpop.eup %4294 }
 0xa42   :  { %2677 = vperm.xlu0 %3797, %v2546_v4   ;;  %v2547_v1 = vmul.f32 %v4295_v53, %v5676_v49  ;;  %v6038_v53 = vld [vmem:[#allocation37_spill] sm:$0xff] }
 0xa45   :  { %3798 = vset.pattern.permute.xlu1 %v6019_v47 }
 0xa46   :  { %3802 = vset.pattern.permute.xlu0 %v6019_v47  ;;  %2578 = vperm.xlu1 %3798, %v2544_v52  }
 0xa47   :  { %2583 = vperm.xlu0 %3802, %v2545_v63  }
 0xa4a   :  { %3799 = vset.pattern.permute.xlu1 %v4536_v5 }
 0xa4b   :  { %2669 = vperm.xlu1 %3799, %v2544_v52  }
 0xa4e   :  { %v2508_v15 = vpop.xlane.xlu1 %2507 }
 0xa4f   :  { %3800 = vset.pattern.permute.xlu1 %v6019_v47  ;;  %4296 = vrcp.f32 %v2508_v15  ;;  %v6039_v15 = vld [vmem:[#allocation36_spill] sm:$0xff] }
 0xa50   :  { %2593 = vperm.xlu1 %3800, %v2547_v1   ;;  %v2511_v61 = vpop.xlane.xlu0 %2510 }
 0xa52   :  { %v2502_v6 = vpop.xlane.xlu1 %2501 }
 0xa53   :  { %4298 = vrcp.f32 %v2502_v6 }
 0xa54   :  { %3801 = vset.pattern.permute.xlu1 %v4536_v5  ;;  %v2505_v55 = vpop.xlane.xlu0 %2504 }
 0xa55   :  { %2681 = vperm.xlu1 %3801, %v2547_v1   ;;  %4300 = vrcp.f32 %v2505_v55  ;;  %v6040_v55 = vld [vmem:[#allocation23_spill] sm:$0xff] }
 0xa56   :  { %4302 = vrcp.f32 %v2511_v61 }
 0xa57   :  { %v2520_v27 = vpop.xlane.xlu1 %2519 }
 0xa58   :  { %4304 = vrcp.f32 %v2520_v27 }
 0xa59   :  { %2673 = vperm.xlu1 %3801, %v2545_v63   ;;  %v4297_v62 = vpop.eup %4296  ;;  %v2523_v23 = vpop.xlane.xlu0 %2522  ;;  %v6037_v63 = vld [vmem:[#allocation35_spill] sm:$0xff] }
 0xa5a   :  { %v2550_v49 = vmul.f32 %v4297_v62, %v5694_v38  ;;  %v6041_v62 = vld [vmem:[#allocation22_spill] sm:$0xff] }
 0xa5b   :  { %v2514_v3 = vpop.xlane.xlu1 %2513 }
 0xa5c   :  { %2608 = vperm.xlu0 %3802, %v2550_v49  }
 0xa5d   :  { %3804 = vset.pattern.permute.xlu1 %v6019_v47  ;;  %v4299_v11 = vpop.eup %4298  ;;  %v2517_v28 = vpop.xlane.xlu0 %2516 }
 0xa5e   :  { %v2548_v0 = vmul.f32 %v4299_v11, %v5696_v21  ;;  %4306 = vrcp.f32 %v2517_v28  ;;  %v6043_v28 = vld [vmem:[#allocation38_spill] sm:$0xff] }
 0xa5f   :  { %v4301_v18 = vpop.eup %4300  ;;  %4308 = vrcp.f32 %v2514_v3 }
 0xa60   :  { %3803 = vset.pattern.permute.xlu0 %v4536_v5  ;;  %2598 = vperm.xlu1 %3804, %v2548_v0   ;;  %v4303_v29 = vpop.eup %4302  ;;  %v2549_v42 = vmul.f32 %v4301_v18, %v5704_v57  ;;  %4310 = vrcp.f32 %v2523_v23  ;;  %v3863_v57 = vld [vmem:[%s5941_s11] sm:$0xff]   ;;  %v6044_v18 = vld [vmem:[#allocation24_spill] sm:$0xff] }
 0xa61   :  { %2693 = vperm.xlu0 %3803, %v2550_v49   ;;  %v2551_v50 = vmul.f32 %v4303_v29, %v5700_v37  ;;  %3597 = vmatprep.subr.bf16.mxu1 %v3863_v57  ;;  %v6042_v49 = vld [vmem:[#allocation21_spill] sm:$0xff] }
 0xa62   :  { %v4305_v12 = vpop.eup %4304  ;;  %3598 = vmatpush3.bf16.msra.mxu1 %v3863_v57 }
 0xa63   :  { %v2554_v10 = vmul.f32 %v4305_v12, %v5710_v24 }
 0xa64   :  { %3805 = vset.pattern.permute.xlu1 %v4536_v5 }
 0xa65   :  { %3808 = vset.pattern.permute.xlu0 %v6019_v47  ;;  %2685 = vperm.xlu1 %3805, %v2548_v0  }
 0xa66   :  { %2603 = vperm.xlu0 %3808, %v2549_v42  }
 0xa68   :  { %v4307_v35 = vpop.eup %4306 }
 0xa69   :  { %3806 = vset.pattern.permute.xlu1 %v6019_v47  ;;  %v2553_v7 = vmul.f32 %v4307_v35, %v5720_v40  ;;  %v4309_v38 = vpop.eup %4308  ;;  %v6031_v40 = vld [vmem:[#allocation18_spill] sm:$0xff] }
 0xa6a   :  { %2628 = vperm.xlu0 %3808, %v2554_v10   ;;  %2613 = vperm.xlu1 %3806, %v2551_v50   ;;  %v2552_v21 = vmul.f32 %v4309_v38, %v5712_v56  ;;  %v4311_v8 = vpop.eup %4310 }
 0xa6b   :  { %v2555_v37 = vmul.f32 %v4311_v8, %v5716_v39 }
 0xa6e   :  { %2623 = vperm.xlu0 %3808, %v2553_v7   ;;  %3807 = vset.pattern.permute.xlu1 %v4536_v5 }
 0xa6f   :  { %2697 = vperm.xlu1 %3807, %v2551_v50  }
 0xa72   :  { %3812 = vset.pattern.permute.xlu0 %v4536_v5 }
 0xa73   :  { %2709 = vperm.xlu0 %3812, %v2554_v10   ;;  %2689 = vperm.xlu1 %3807, %v2549_v42  }
 0xa77   :  { %3809 = vset.pattern.permute.xlu1 %v6019_v47 }
 0xa78   :  { %2618 = vperm.xlu1 %3809, %v2552_v21  }
 0xa7c   :  { %3810 = vset.pattern.permute.xlu1 %v4536_v5 }
 0xa7d   :  { %2701 = vperm.xlu1 %3810, %v2552_v21  }
 0xa81   :  { %3811 = vset.pattern.permute.xlu1 %v6019_v47 }
 0xa82   :  { %2633 = vperm.xlu1 %3811, %v2555_v37  }
 0xa86   :  { %3813 = vset.pattern.permute.xlu1 %v4536_v5 }
 0xa87   :  { %2705 = vperm.xlu1 %3813, %v2553_v7  }
 0xa8b   :  { %2713 = vperm.xlu1 %3813, %v2555_v37  }
 0xaa9   :  { %v2569_v26 = vpop.permute.xlu0 %2568 }
 0xaaa   :  { %v2638_v5 = vmul.f32 %v2569_v26, %v6036_v46  ;;  %v6045_v26 = vld [vmem:[#allocation40_spill] sm:$0xff] }
 0xaad   :  { %v2559_v22 = vpop.permute.xlu1 %2558 }
 0xaae   :  { %v2662_v56 = vpop.permute.xlu0 %2661  ;;  %v2636_v2 = vmul.f32 %v2559_v22, %v6031_v40 }
 0xaaf   :  { %v2718_v43 = vmul.f32 %v2662_v56, %v6032_v16  ;;  %v6050_v16 = vld [vmem:[#allocation25_spill] sm:$0xff] }
 0xab1   :  { %v2734_v41 = vadd.f32 %v2718_v43, %v2638_v5 }
 0xab2   :  { %v2654_v25 = vpop.permute.xlu1 %2653 }
 0xab3   :  { %v2564_v39 = vpop.permute.xlu0 %2563  ;;  %v2716_v47 = vmul.f32 %v2654_v25, %v4833_v30 }
 0xab4   :  { %v2637_v44 = vmul.f32 %v2564_v39, %v6033_v45  ;;  %v6051_v45 = vld [vmem:[#allocation42_spill] sm:$0xff] }
 0xab5   :  { %v2732_v54 = vadd.f32 %v2716_v47, %v2636_v2  ;;  %v6049_v2 = vld [vmem:[#allocation27_spill] sm:$0xff] }
 0xab7   :  { %v2574_v24 = vpop.permute.xlu1 %2573 }
 0xab8   :  { %v2639_v58 = vmul.f32 %v2574_v24, %v6034_v33  ;;  %v6046_v24 = vld [vmem:[#allocation41_spill] sm:$0xff]  ;;  %v6052_v33 = vld [vmem:[#allocation28_spill] sm:$0xff] }
 0xabc   :  { %v2666_v34 = vpop.permute.xlu1 %2665  ;;  %v2589_v20 = vpop.permute.xlu0 %2588 }
 0xabd   :  { %v2719_v19 = vmul.f32 %v2666_v34, %v4837_v32  ;;  %v2642_v29 = vmul.f32 %v2589_v20, %v6044_v18  ;;  %v6047_v34 = vld [vmem:[#allocation26_spill] sm:$0xff]  ;;  %v6053_v20 = vld [vmem:[#allocation44_spill] sm:$0xff] }
 0xabf   :  { %v2735_v51 = vadd.f32 %v2719_v19, %v2639_v58  ;;  %v6048_v19 = vld [vmem:[#allocation39_spill] sm:$0xff] }
 0xac0   :  { %v2658_v59 = vpop.permute.xlu1 %2657 }
 0xac1   :  { %v2717_v36 = vmul.f32 %v2658_v59, %v6035_v14  ;;  %v2749_v32 = vpack.c.bf16 %v2735_v51, %v2734_v41  ;;  %v2678_v4 = vpop.permute.xlu0 %2677 }
 0xac2   :  { %v2722_v61 = vmul.f32 %v2678_v4, %v6039_v15  ;;  %v6057_v15 = vld [vmem:[#allocation43_spill] sm:$0xff] }
 0xac3   :  { %v2733_v60 = vadd.f32 %v2717_v36, %v2637_v44 }
 0xac4   :  { %v2738_v10 = vadd.f32 %v2722_v61, %v2642_v29 }
 0xac5   :  { %v2579_v30 = vpop.permute.xlu1 %2578  ;;  %v2748_v9 = vpack.c.bf16 %v2733_v60, %v2732_v54 }
 0xac6   :  { %v2584_v13 = vpop.permute.xlu0 %2583  ;;  %v2640_v23 = vmul.f32 %v2579_v30, %v6041_v62  ;;  %v6058_v62 = vld [vmem:[#allocation32_spill] sm:$0xff] }
 0xac7   :  { %3565 = vmatprep.subr.bf16.mxu0 %v2748_v9  ;;  %v2641_v27 = vmul.f32 %v2584_v13, %v6040_v55 }
 0xac8   :  { %3566 = vmatpush3.bf16.msra.mxu0 %v2748_v9 }
 0xac9   :  { %3567 = vmatprep.subr.bf16.mxu0 %v2749_v32 }
 0xaca   :  { %v2670_v31 = vpop.permute.xlu1 %2669 }
 0xacb   :  { %v2720_v52 = vmul.f32 %v2670_v31, %v6037_v63  ;;  %v6055_v63 = vld [vmem:[#allocation30_spill] sm:$0xff] }
 0xacc   :  { %3568 = vmatpush3.bf16.msra.mxu0 %v2749_v32 }
 0xacd   :  { %v2736_v42 = vadd.f32 %v2720_v52, %v2640_v23 }
 0xacf   :  { %v2594_v48 = vpop.permute.xlu1 %2593 }
 0xad0   :  { %v2643_v11 = vmul.f32 %v2594_v48, %v6042_v49  ;;  %v6059_v49 = vld [vmem:[#allocation29_spill] sm:$0xff] }
 0xad4   :  { %v2682_v17 = vpop.permute.xlu1 %2681 }
 0xad5   :  { %v2723_v1 = vmul.f32 %v2682_v17, %v6038_v53  ;;  %v6054_v17 = vld [vmem:[#allocation31_spill] sm:$0xff]  ;;  %v6056_v53 = vld [vmem:[#allocation46_spill] sm:$0xff] }
 0xad7   :  { %v2739_v12 = vadd.f32 %v2723_v1, %v2643_v11 }
 0xad8   :  { %v2674_v6 = vpop.permute.xlu1 %2673 }
 0xad9   :  { %v2721_v0 = vmul.f32 %v2674_v6, %v6043_v28  ;;  %v2751_v35 = vpack.c.bf16 %v2739_v12, %v2738_v10  ;;  %v6060_v28 = vld [vmem:[#allocation45_spill] sm:$0xff] }
 0xada   :  { %v4378_v10 = vld [vmem:[%s5930_s0 + $0x10] sm:$0xff]  }
 0xadb   :  { %v2737_v3 = vadd.f32 %v2721_v0, %v2641_v27  ;;  %v2609_v38 = vpop.permute.xlu0 %2608 }
 0xadc   :  { %v2646_v58 = vmul.f32 %v2609_v38, %v6052_v33  ;;  %v4382_v38 = vld [vmem:[%s5930_s0 + $0x30] sm:$0xff]  }
 0xadd   :  { %v2750_v50 = vpack.c.bf16 %v2737_v3, %v2736_v42  ;;  %v4377_v3 = vld [vmem:[%s5930_s0 + $0x8] sm:$0xff]  }
 0xadf   :  { %3569 = vmatprep.subr.bf16.mxu0 %v2750_v50  ;;  %v2599_v7 = vpop.permute.xlu1 %2598 }
 0xae0   :  { %3570 = vmatpush3.bf16.msra.mxu0 %v2750_v50  ;;  %v2694_v37 = vpop.permute.xlu0 %2693  ;;  %v2644_v39 = vmul.f32 %v2599_v7, %v6047_v34  ;;  %v4379_v50 = vld [vmem:[%s5930_s0 + $0x18] sm:$0xff]   ;;  %v4381_v7 = vld [vmem:[%s5930_s0 + $0x28] sm:$0xff]  }
 0xae1   :  { %3571 = vmatprep.subr.bf16.mxu0 %v2751_v35  ;;  %v2726_v40 = vmul.f32 %v2694_v37, %v6048_v19 }
 0xae3   :  { %v2742_v5 = vadd.f32 %v2726_v40, %v2646_v58 }
 0xae4   :  { %3572 = vmatpush3.bf16.msra.mxu0 %v2751_v35  ;;  %v2686_v21 = vpop.permute.xlu1 %2685  ;;  %v4380_v35 = vld [vmem:[%s5930_s0 + $0x20] sm:$0xff]  }
 0xae5   :  { %v2604_v57 = vpop.permute.xlu0 %2603  ;;  %v2724_v25 = vmul.f32 %v2686_v21, %v6045_v26  ;;  %v4383_v21 = vld [vmem:[%s5930_s0 + $0x38] sm:$0xff]  }
 0xae6   :  { %v2645_v59 = vmul.f32 %v2604_v57, %v6049_v2 }
 0xae7   :  { %v2740_v14 = vadd.f32 %v2724_v25, %v2644_v39 }
 0xae9   :  { %v2614_v8 = vpop.permute.xlu1 %2613  ;;  %v2629_v41 = vpop.permute.xlu0 %2628 }
 0xaea   :  { %v2647_v43 = vmul.f32 %v2614_v8, %v6050_v16  ;;  %v2650_v23 = vmul.f32 %v2629_v41, %v6058_v62 }
 0xaed   :  { %v2624_v9 = vpop.permute.xlu0 %2623 }
 0xaee   :  { %v2698_v22 = vpop.permute.xlu1 %2697  ;;  %v2649_v13 = vmul.f32 %v2624_v9, %v6054_v17 }
 0xaef   :  { %v2727_v56 = vmul.f32 %v2698_v22, %v6046_v24 }
 0xaf1   :  { %v2743_v36 = vadd.f32 %v2727_v56, %v2647_v43 }
 0xaf2   :  { %v2690_v47 = vpop.permute.xlu1 %2689  ;;  %v2710_v48 = vpop.permute.xlu0 %2709 }
 0xaf3   :  { %v2725_v44 = vmul.f32 %v2690_v47, %v6051_v45  ;;  %v2753_v60 = vpack.c.bf16 %v2743_v36, %v2742_v5  ;;  %v2730_v61 = vmul.f32 %v2710_v48, %v6057_v15  ;;  %v3332_v5 = vld [vmem:[%s5942_s12] ss:$0 sm:$0xff]  ;;  %s4537_s12 = smov [#allocation12]  }
 0xaf4   :  { %s3178_s19 = sshll.u32 %s4537_s12, 4  ;;  %s3179_s19 = int_to_ptr.vmem [resolvable:$true] %s3178_s19 }
 0xaf5   :  { %v2741_v46 = vadd.f32 %v2725_v44, %v2645_v59  ;;  %v2746_v29 = vadd.f32 %v2730_v61, %v2650_v23  ;;  %s4494_s10 = scalar_lea.vmem %s3179_s19, 2048  ;;  %p4499_p13 = scmp.lt.s32.totalorder %s3179_s19, %s3179_s19 }
 0xaf6   :  { %p4495_p12 = scmp.ne.s32.totalorder %s3179_s19, %s4494_s10  ;;  %p4500_p0 = scmp.lt.s32.totalorder %s4494_s10, %s4494_s10 }
 0xaf7   :  { %v2619_v54 = vpop.permute.xlu1 %2618  ;;  %v2752_v51 = vpack.c.bf16 %v2741_v46, %v2740_v14 }
 0xaf8   :  { %v2648_v52 = vmul.f32 %v2619_v54, %v6055_v63  ;;  %p4501_p1 = por %p4500_p0, %p4499_p13 }
 0xaf9   :  { %3573 = vmatprep.subr.bf16.mxu0 %v2752_v51 }
 0xafa   :  { %3574 = vmatpush3.bf16.msra.mxu0 %v2752_v51  ;;  %p4502_p2 = pnand %p4501_p1, %p4495_p12 }
 0xafb   :  { %3575 = vmatprep.subr.bf16.mxu0 %v2753_v60 }
 0xafc   :  { %v2702_v30 = vpop.permute.xlu1 %2701 }
 0xafd   :  { %v2728_v31 = vmul.f32 %v2702_v30, %v6053_v20 }
 0xafe   :  { %3576 = vmatpush3.bf16.msra.mxu0 %v2753_v60 }
 0xaff   :  { %v2744_v6 = vadd.f32 %v2728_v31, %v2648_v52 }
 0xb01   :  { %v2634_v32 = vpop.permute.xlu1 %2633 }
 0xb02   :  { %v2651_v11 = vmul.f32 %v2634_v32, %v6059_v49 }
 0xb06   :  { %v2706_v4 = vpop.permute.xlu1 %2705 }
 0xb07   :  { %v2729_v1 = vmul.f32 %v2706_v4, %v6056_v53 }
 0xb09   :  { %v2745_v55 = vadd.f32 %v2729_v1, %v2649_v13 }
 0xb0a   :  { %v2714_v27 = vpop.permute.xlu1 %2713 }
 0xb0b   :  { %v2731_v0 = vmul.f32 %v2714_v27, %v6060_v28  ;;  %v2754_v18 = vpack.c.bf16 %v2745_v55, %v2744_v6 }
 0xb0d   :  { %v2747_v42 = vadd.f32 %v2731_v0, %v2651_v11  ;;  %3577 = vmatprep.subr.bf16.mxu0 %v2754_v18 }
 0xb0e   :  { %3578 = vmatpush3.bf16.msra.mxu0 %v2754_v18 }
 0xb0f   :  { %v2755_v12 = vpack.c.bf16 %v2747_v42, %v2746_v29 }
 0xb11   :  { %3579 = vmatprep.subr.bf16.mxu0 %v2755_v12 }
 0xb12   :  { %3580 = vmatpush3.bf16.msra.mxu0 %v2755_v12 }
 0xb15   :  { %3582 = vmatmul.mubr.bf16.vlgmr.msra.gmra.mrb[64].mxu0 %v4377_v3 }
 0xb16   :  { %3585 = vmatprep.mubr.bf16.mxu0 %v4378_v10 }
 0xb1d   :  { %3586 = vmatmul.mubr.bf16.gmra.mrb[68].mxu0 %v4379_v50 }
 0xb1e   :  { %3589 = vmatprep.mubr.bf16.mxu0 %v4380_v35 }
 0xb25   :  { %3590 = vmatmul.mubr.bf16.gmra.mrb[72].mxu0 %v4381_v7 }
 0xb26   :  { %3593 = vmatprep.mubr.bf16.mxu0 %v4382_v38 }
 0xb2d   :  { %3594 = vmatmul.mubr.bf16.gmra.mrb[76].mxu0 %v4383_v21 }
 0xbe8   :  { %v3583_v8 = vpop.f32.mrb[64].mxu0 }
 0xbe9   :  { %v2790_v37 = vpop.f32.mrb[65].mxu0 }
 0xbea   :  { %v3584_v22 = vpop.f32.mrb[66].mxu0 }
 0xbeb   :  { %v2854_v57 = vpack.c.bf16 %v3584_v22, %v3583_v8  ;;  %v2793_v26 = vpop.f32.mrb[67].mxu0 }
 0xbec   :  { %v2853_v25 = vpack.c.bf16 %v2793_v26, %v2790_v37 }
 0xbee   :  { %3599 = vmatprep.mubr.msk.bf16.mxu1 %vm509_vm2, %v2853_v25 }
 0xbef   :  { %3600 = vmatmul.mubr.msk.bf16.vlgmr.msra.gmra.mrb[80].mxu1 %vm509_vm2, %v2854_v57 }
 0xbf0   :  { %v3587_v24 = vpop.f32.mrb[68].mxu0 }
 0xbf1   :  { %v2806_v56 = vpop.f32.mrb[69].mxu0 }
 0xbf2   :  { %v3588_v34 = vpop.f32.mrb[70].mxu0 }
 0xbf3   :  { %v2856_v39 = vpack.c.bf16 %v3588_v34, %v3587_v24  ;;  %v2809_v47 = vpop.f32.mrb[71].mxu0 }
 0xbf4   :  { %v2855_v19 = vpack.c.bf16 %v2809_v47, %v2806_v56 }
 0xbf6   :  { %3603 = vmatprep.mubr.msk.bf16.mxu1 %vm509_vm2, %v2855_v19 }
 0xbf7   :  { %3604 = vmatmul.mubr.msk.bf16.gmra.mrb[84].mxu1 %vm509_vm2, %v2856_v39 }
 0xbf8   :  { %v3591_v40 = vpop.f32.mrb[72].mxu0 }
 0xbf9   :  { %v2822_v2 = vpop.f32.mrb[73].mxu0 }
 0xbfa   :  { %v3592_v59 = vpop.f32.mrb[74].mxu0 }
 0xbfb   :  { %v2858_v16 = vpack.c.bf16 %v3592_v59, %v3591_v40  ;;  %v2825_v43 = vpop.f32.mrb[75].mxu0 }
 0xbfc   :  { %v2857_v45 = vpack.c.bf16 %v2825_v43, %v2822_v2 }
 0xbfe   :  { %3607 = vmatprep.mubr.msk.bf16.mxu1 %vm509_vm2, %v2857_v45 }
 0xbff   :  { %3608 = vmatmul.mubr.msk.bf16.gmra.mrb[88].mxu1 %vm509_vm2, %v2858_v16 }
 0xc00   :  { %v3595_v44 = vpop.f32.mrb[76].mxu0 }
 0xc01   :  { %v2838_v33 = vpop.f32.mrb[77].mxu0 }
 0xc02   :  { %v3596_v58 = vpop.f32.mrb[78].mxu0 }
 0xc03   :  { %v2860_v14 = vpack.c.bf16 %v3596_v58, %v3595_v44  ;;  %v2841_v36 = vpop.f32.mrb[79].mxu0 }
 0xc04   :  { %v2859_v46 = vpack.c.bf16 %v2841_v36, %v2838_v33 }
 0xc06   :  { %3611 = vmatprep.mubr.msk.bf16.mxu1 %vm509_vm2, %v2859_v46 }
 0xc07   :  { %3612 = vmatmul.mubr.msk.bf16.gmra.mrb[92].mxu1 %vm509_vm2, %v2860_v14 }
 0xcc2   :  { %v3601_v54 = vpop.f32.mrb[80].mxu1 }
 0xcc3   :  { %v2943_v51 = vadd.f32 %v3601_v54, %v3332_v5  ;;  %v2934_v60 = vpop.f32.mrb[81].mxu1 }
 0xcc4   :  { %v2935_v41 = vadd.f32 %v3332_v5, %v2934_v60  ;;  %v3602_v30 = vpop.f32.mrb[82].mxu1 }
 0xcc5   :  { %3001 = vmax.xlane.f32.xlu0 %v2943_v51  ;;  %v2937_v9 = vpop.f32.mrb[83].mxu1  ;;  %v2946_v20 = vadd.f32 %v3602_v30, %v3332_v5 }
 0xcc6   :  { %v2938_v32 = vadd.f32 %v3332_v5, %v2937_v9  ;;  %2997 = vmax.xlane.f32.xlu1 %v2935_v41 }
 0xcc9   :  { %2999 = vmax.xlane.f32.xlu0 %v2938_v32 }
 0xcca   :  { %3003 = vmax.xlane.f32.xlu1 %v2946_v20  ;;  %v3605_v31 = vpop.f32.mrb[84].mxu1 }
 0xccb   :  { %v2959_v48 = vadd.f32 %v3605_v31, %v3332_v5  ;;  %v2950_v4 = vpop.f32.mrb[85].mxu1 }
 0xccc   :  { %v3606_v17 = vpop.f32.mrb[86].mxu1  ;;  %v2951_v52 = vadd.f32 %v3332_v5, %v2950_v4 }
 0xccd   :  { %v2962_v13 = vadd.f32 %v3606_v17, %v3332_v5  ;;  %3009 = vmax.xlane.f32.xlu0 %v2959_v48  ;;  %v2953_v63 = vpop.f32.mrb[87].mxu1 }
 0xcce   :  { %v2954_v53 = vadd.f32 %v3332_v5, %v2953_v63 }
 0xccf   :  { %3011 = vmax.xlane.f32.xlu1 %v2962_v13 }
 0xcd1   :  { %3005 = vmax.xlane.f32.xlu0 %v2951_v52 }
 0xcd2   :  { %v3609_v1 = vpop.f32.mrb[88].mxu1 }
 0xcd3   :  { %v2975_v15 = vadd.f32 %v3609_v1, %v3332_v5  ;;  %3007 = vmax.xlane.f32.xlu1 %v2954_v53  ;;  %v2966_v61 = vpop.f32.mrb[89].mxu1 }
 0xcd4   :  { %v3610_v6 = vpop.f32.mrb[90].mxu1  ;;  %v2967_v62 = vadd.f32 %v3332_v5, %v2966_v61 }
 0xcd5   :  { %v2978_v55 = vadd.f32 %v3610_v6, %v3332_v5  ;;  %3017 = vmax.xlane.f32.xlu0 %v2975_v15  ;;  %v2969_v27 = vpop.f32.mrb[91].mxu1 }
 0xcd6   :  { %v5831_v23 = vadd.f32 %v3332_v5, %v2969_v27 }
 0xcd7   :  { %3019 = vmax.xlane.f32.xlu1 %v2978_v55 }
 0xcd9   :  { %3013 = vmax.xlane.f32.xlu0 %v2967_v62 }
 0xcda   :  { %v3613_v49 = vpop.f32.mrb[92].mxu1 }
 0xcdb   :  { %3015 = vmax.xlane.f32.xlu1 %v5831_v23  ;;  %v2982_v11 = vpop.f32.mrb[93].mxu1  ;;  %v5839_v42 = vadd.f32 %v3613_v49, %v3332_v5 }
 0xcdc   :  { %v5834_v28 = vadd.f32 %v3332_v5, %v2982_v11  ;;  %v3614_v0 = vpop.f32.mrb[94].mxu1 }
 0xcdd   :  { %v2985_v18 = vpop.f32.mrb[95].mxu1  ;;  %v5842_v12 = vadd.f32 %v3614_v0, %v3332_v5 }
 0xcde   :  { %v5836_v29 = vadd.f32 %v3332_v5, %v2985_v18  ;;  %3021 = vmax.xlane.f32.xlu0 %v5834_v28 }
 0xce0   :  { %3023 = vmax.xlane.f32.xlu1 %v5836_v29 }
 0xce2   :  { %3025 = vmax.xlane.f32.xlu0 %v5839_v42 }
 0xce4   :  { %3027 = vmax.xlane.f32.xlu1 %v5842_v12 }
 0xd52   :  { %v3002_v3 = vpop.xlane.xlu0 %3001 }
 0xd53   :  { %v5846_v10 = vsub.f32 %v2943_v51, %v3002_v3  ;;  %v2998_v50 = vpop.xlane.xlu1 %2997 }
 0xd54   :  { %v5848_v35 = vsub.f32 %v2935_v41, %v2998_v50 }
 0xd55   :  { %v3049_v7 = vmul.f32 1.442695, %v5846_v10 }
 0xd56   :  { %v3000_v38 = vpop.xlane.xlu0 %2999  ;;  %v3045_v21 = vmul.f32 1.442695, %v5848_v35 }
 0xd57   :  { %4312 = vpow2.f32 %v3049_v7  ;;  %v3004_v8 = vpop.xlane.xlu1 %3003  ;;  %v5852_v37 = vsub.f32 %v2938_v32, %v3000_v38 }
 0xd58   :  { %v5854_v22 = vsub.f32 %v2946_v20, %v3004_v8  ;;  %4314 = vpow2.f32 %v3045_v21 }
 0xd59   :  { %v3047_v24 = vmul.f32 1.442695, %v5852_v37 }
 0xd5a   :  { %v3051_v57 = vmul.f32 1.442695, %v5854_v22  ;;  %v3010_v26 = vpop.xlane.xlu0 %3009 }
 0xd5b   :  { %v5857_v25 = vsub.f32 %v2959_v48, %v3010_v26 }
 0xd5c   :  { %4316 = vpow2.f32 %v3051_v57  ;;  %v3012_v56 = vpop.xlane.xlu1 %3011 }
 0xd5d   :  { %v3057_v34 = vmul.f32 1.442695, %v5857_v25  ;;  %v5861_v39 = vsub.f32 %v2962_v13, %v3012_v56 }
 0xd5e   :  { %v3006_v47 = vpop.xlane.xlu0 %3005 }
 0xd5f   :  { %4318 = vpow2.f32 %v3057_v34  ;;  %v5863_v19 = vsub.f32 %v2951_v52, %v3006_v47  ;;  %v3059_v40 = vmul.f32 1.442695, %v5861_v39 }
 0xd60   :  { %4320 = vpow2.f32 %v3047_v24  ;;  %v3008_v2 = vpop.xlane.xlu1 %3007 }
 0xd61   :  { %v4313_v59 = vpop.eup %4312  ;;  %v3053_v16 = vmul.f32 1.442695, %v5863_v19  ;;  %v5867_v43 = vsub.f32 %v2954_v53, %v3008_v2 }
 0xd62   :  { %v3018_v45 = vpop.xlane.xlu0 %3017  ;;  %3081 = vadd.xlane.f32.xlu0 %v4313_v59  ;;  %v4315_v14 = vpop.eup %4314 }
 0xd63   :  { %4322 = vpow2.f32 %v3053_v16  ;;  %v5869_v44 = vsub.f32 %v2975_v15, %v3018_v45  ;;  %v3055_v33 = vmul.f32 1.442695, %v5867_v43 }
 0xd64   :  { %4324 = vpow2.f32 %v3059_v40  ;;  %v3020_v58 = vpop.xlane.xlu1 %3019 }
 0xd65   :  { %v3065_v36 = vmul.f32 1.442695, %v5869_v44  ;;  %v5873_v46 = vsub.f32 %v2978_v55, %v3020_v58 }
 0xd66   :  { %v4317_v5 = vpop.eup %4316  ;;  %v3014_v54 = vpop.xlane.xlu0 %3013  ;;  %3077 = vadd.xlane.f32.xlu0 %v4315_v14 }
 0xd67   :  { %4326 = vpow2.f32 %v3065_v36  ;;  %v5875_v51 = vsub.f32 %v2967_v62, %v3014_v54  ;;  %3083 = vadd.xlane.f32.xlu1 %v4317_v5  ;;  %v3067_v60 = vmul.f32 1.442695, %v5873_v46 }
 0xd68   :  { %4328 = vpow2.f32 %v3055_v33  ;;  %v3016_v41 = vpop.xlane.xlu1 %3015 }
 0xd69   :  { %v4319_v30 = vpop.eup %4318  ;;  %v3061_v9 = vmul.f32 1.442695, %v5875_v51  ;;  %v5880_v32 = vsub.f32 %v5831_v23, %v3016_v41 }
 0xd6a   :  { %v4321_v20 = vpop.eup %4320  ;;  %3089 = vadd.xlane.f32.xlu0 %v4319_v30 }
 0xd6b   :  { %4330 = vpow2.f32 %v3061_v9  ;;  %v3063_v31 = vmul.f32 1.442695, %v5880_v32  ;;  %3079 = vadd.xlane.f32.xlu1 %v4321_v20  ;;  %v3022_v48 = vpop.xlane.xlu0 %3021 }
 0xd6c   :  { %4332 = vpow2.f32 %v3067_v60  ;;  %v5884_v4 = vsub.f32 %v5834_v28, %v3022_v48 }
 0xd6d   :  { %v4323_v17 = vpop.eup %4322  ;;  %v3024_v13 = vpop.xlane.xlu1 %3023  ;;  %4334 = vpow2.f32 %v3063_v31 }
 0xd6e   :  { %v4325_v63 = vpop.eup %4324  ;;  %v3069_v52 = vmul.f32 1.442695, %v5884_v4  ;;  %v5888_v53 = vsub.f32 %v5836_v29, %v3024_v13  ;;  %3085 = vadd.xlane.f32.xlu0 %v4323_v17 }
 0xd6f   :  { %3091 = vadd.xlane.f32.xlu1 %v4325_v63  ;;  %v3026_v1 = vpop.xlane.xlu0 %3025 }
 0xd70   :  { %4336 = vpow2.f32 %v3069_v52  ;;  %v3071_v15 = vmul.f32 1.442695, %v5888_v53  ;;  %v5892_v61 = vsub.f32 %v5839_v42, %v3026_v1 }
 0xd71   :  { %v4327_v6 = vpop.eup %4326  ;;  %v3028_v55 = vpop.xlane.xlu1 %3027 }
 0xd72   :  { %v4329_v27 = vpop.eup %4328  ;;  %v3073_v62 = vmul.f32 1.442695, %v5892_v61  ;;  %v5896_v23 = vsub.f32 %v5842_v12, %v3028_v55  ;;  %3097 = vadd.xlane.f32.xlu0 %v4327_v6  ;;  %4338 = vpow2.f32 %v3071_v15 }
 0xd73   :  { %3087 = vadd.xlane.f32.xlu1 %v4329_v27 }
 0xd74   :  { %4340 = vpow2.f32 %v3073_v62  ;;  %v3075_v49 = vmul.f32 1.442695, %v5896_v23 }
 0xd75   :  { %v4331_v11 = vpop.eup %4330 }
 0xd76   :  { %v4333_v28 = vpop.eup %4332  ;;  %3093 = vadd.xlane.f32.xlu0 %v4331_v11  ;;  %4342 = vpow2.f32 %v3075_v49 }
 0xd77   :  { %3099 = vadd.xlane.f32.xlu1 %v4333_v28  ;;  %v4335_v0 = vpop.eup %4334 }
 0xd7a   :  { %v4337_v18 = vpop.eup %4336 }
 0xd7b   :  { %3095 = vadd.xlane.f32.xlu1 %v4335_v0  ;;  %3101 = vadd.xlane.f32.xlu0 %v4337_v18 }
 0xd7c   :  { %v4339_v29 = vpop.eup %4338 }
 0xd7e   :  { %v4341_v42 = vpop.eup %4340 }
 0xd7f   :  { %3103 = vadd.xlane.f32.xlu1 %v4339_v29  ;;  %3105 = vadd.xlane.f32.xlu0 %v4341_v42 }
 0xd80   :  { %v4343_v12 = vpop.eup %4342 }
 0xd83   :  { %3107 = vadd.xlane.f32.xlu1 %v4343_v12 }
 0xdef   :  { %v3082_v3 = vpop.xlane.xlu0 %3081 }
 0xdf0   :  { %4344 = vlog2.f32 %v3082_v3 }
 0xdf3   :  { %v3078_v50 = vpop.xlane.xlu0 %3077 }
 0xdf4   :  { %4346 = vlog2.f32 %v3078_v50  ;;  %v3084_v7 = vpop.xlane.xlu1 %3083 }
 0xdf5   :  { %4348 = vlog2.f32 %v3084_v7 }
 0xdf7   :  { %v3090_v38 = vpop.xlane.xlu0 %3089 }
 0xdf8   :  { %4350 = vlog2.f32 %v3090_v38  ;;  %v3080_v21 = vpop.xlane.xlu1 %3079 }
 0xdf9   :  { %4352 = vlog2.f32 %v3080_v21 }
 0xdfa   :  { %v4345_v8 = vpop.eup %4344 }
 0xdfb   :  { %v3114_v57 = vmul.f32 0.6931472, %v4345_v8  ;;  %v3086_v26 = vpop.xlane.xlu0 %3085 }
 0xdfc   :  { %4354 = vlog2.f32 %v3086_v26  ;;  %v3092_v24 = vpop.xlane.xlu1 %3091 }
 0xdfd   :  { %v3143_v56 = vsub.f32 %v5846_v10, %v3114_v57  ;;  %4356 = vlog2.f32 %v3092_v24 }
 0xdfe   :  { %v4347_v34 = vpop.eup %4346 }
 0xdff   :  { %v4349_v47 = vpop.eup %4348  ;;  %3159 = vst [vmem:[#allocation12 + $0x10] sm:$0xff] %v3143_v56  ;;  %v3110_v40 = vmul.f32 0.6931472, %v4347_v34  ;;  %v3098_v2 = vpop.xlane.xlu0 %3097 }
 0xe00   :  { %v3116_v59 = vmul.f32 0.6931472, %v4349_v47  ;;  %4358 = vlog2.f32 %v3098_v2  ;;  %v3088_v16 = vpop.xlane.xlu1 %3087 }
 0xe01   :  { %v3141_v45 = vsub.f32 %v5848_v35, %v3110_v40  ;;  %4360 = vlog2.f32 %v3088_v16 }
 0xe02   :  { %v4351_v33 = vpop.eup %4350  ;;  %v3144_v58 = vsub.f32 %v5854_v22, %v3116_v59 }
 0xe03   :  { %v4353_v14 = vpop.eup %4352  ;;  %3157 = vst [vmem:[#allocation12] sm:$0xff] %v3141_v45  ;;  %v3122_v36 = vmul.f32 0.6931472, %v4351_v33  ;;  %v3094_v5 = vpop.xlane.xlu0 %3093 }
 0xe04   :  { %3160 = vst [vmem:[#allocation12 + $0x18] sm:$0xff] %v3144_v58  ;;  %v3112_v10 = vmul.f32 0.6931472, %v4353_v14  ;;  %4362 = vlog2.f32 %v3094_v5  ;;  %v3100_v54 = vpop.xlane.xlu1 %3099 }
 0xe05   :  { %v3147_v60 = vsub.f32 %v5857_v25, %v3122_v36  ;;  %4364 = vlog2.f32 %v3100_v54 }
 0xe06   :  { %v4355_v41 = vpop.eup %4354  ;;  %v3142_v30 = vsub.f32 %v5852_v37, %v3112_v10 }
 0xe07   :  { %v4357_v9 = vpop.eup %4356  ;;  %3163 = vst [vmem:[#allocation12 + $0x30] sm:$0xff] %v3147_v60  ;;  %v3118_v35 = vmul.f32 0.6931472, %v4355_v41 }
 0xe08   :  { %3158 = vst [vmem:[#allocation12 + $0x8] sm:$0xff] %v3142_v30  ;;  %v3124_v20 = vmul.f32 0.6931472, %v4357_v9  ;;  %v3096_v22 = vpop.xlane.xlu1 %3095  ;;  %v3102_v31 = vpop.xlane.xlu0 %3101 }
 0xe09   :  { %v3145_v48 = vsub.f32 %v5863_v19, %v3118_v35  ;;  %4366 = vlog2.f32 %v3096_v22 }
 0xe0a   :  { %v4359_v17 = vpop.eup %4358  ;;  %v3148_v13 = vsub.f32 %v5861_v39, %v3124_v20  ;;  %4368 = vlog2.f32 %v3102_v31 }
 0xe0b   :  { %v4361_v63 = vpop.eup %4360  ;;  %3161 = vst [vmem:[#allocation12 + $0x20] sm:$0xff] %v3145_v48  ;;  %v3130_v25 = vmul.f32 0.6931472, %v4359_v17 }
 0xe0c   :  { %3164 = vst [vmem:[#allocation12 + $0x38] sm:$0xff] %v3148_v13  ;;  %v3120_v52 = vmul.f32 0.6931472, %v4361_v63  ;;  %v3104_v37 = vpop.xlane.xlu1 %3103  ;;  %v3106_v1 = vpop.xlane.xlu0 %3105 }
 0xe0d   :  { %v3151_v15 = vsub.f32 %v5869_v44, %v3130_v25  ;;  %4370 = vlog2.f32 %v3104_v37 }
 0xe0e   :  { %v4363_v6 = vpop.eup %4362  ;;  %v3146_v55 = vsub.f32 %v5867_v43, %v3120_v52  ;;  %4372 = vlog2.f32 %v3106_v1 }
 0xe0f   :  { %v4365_v19 = vpop.eup %4364  ;;  %3167 = vst [vmem:[#allocation12 + $0x50] sm:$0xff] %v3151_v15  ;;  %v3126_v27 = vmul.f32 0.6931472, %v4363_v6 }
 0xe10   :  { %3162 = vst [vmem:[#allocation12 + $0x28] sm:$0xff] %v3146_v55  ;;  %v3132_v39 = vmul.f32 0.6931472, %v4365_v19  ;;  %v3108_v62 = vpop.xlane.xlu1 %3107 }
 0xe11   :  { %v3149_v49 = vsub.f32 %v5875_v51, %v3126_v27  ;;  %4374 = vlog2.f32 %v3108_v62 }
 0xe12   :  { %v3152_v11 = vsub.f32 %v5873_v46, %v3132_v39 }
 0xe13   :  { %v4367_v28 = vpop.eup %4366  ;;  %3165 = vst [vmem:[#allocation12 + $0x40] sm:$0xff] %v3149_v49 }
 0xe14   :  { %v4369_v0 = vpop.eup %4368  ;;  %3168 = vst [vmem:[#allocation12 + $0x58] sm:$0xff] %v3152_v11  ;;  %v3128_v44 = vmul.f32 0.6931472, %v4367_v28 }
 0xe15   :  { %v3134_v18 = vmul.f32 0.6931472, %v4369_v0 }
 0xe16   :  { %v3150_v43 = vsub.f32 %v5880_v32, %v3128_v44 }
 0xe17   :  { %v4371_v29 = vpop.eup %4370  ;;  %v3153_v42 = vsub.f32 %v5884_v4, %v3134_v18 }
 0xe18   :  { %v4373_v12 = vpop.eup %4372  ;;  %3166 = vst [vmem:[#allocation12 + $0x48] sm:$0xff] %v3150_v43  ;;  %v3136_v3 = vmul.f32 0.6931472, %v4371_v29 }
 0xe19   :  { %3169 = vst [vmem:[#allocation12 + $0x60] sm:$0xff] %v3153_v42  ;;  %v3138_v50 = vmul.f32 0.6931472, %v4373_v12 }
 0xe1a   :  { %v3154_v51 = vsub.f32 %v5888_v53, %v3136_v3 }
 0xe1b   :  { %v4375_v7 = vpop.eup %4374  ;;  %v3155_v46 = vsub.f32 %v5892_v61, %v3138_v50 }
 0xe1c   :  { %3170 = vst [vmem:[#allocation12 + $0x68] sm:$0xff] %v3154_v51  ;;  %v3140_v38 = vmul.f32 0.6931472, %v4375_v7 }
 0xe1d   :  { %3171 = vst [vmem:[#allocation12 + $0x70] sm:$0xff] %v3155_v46 }
 0xe1e   :  { %v3156_v32 = vsub.f32 %v5896_v23, %v3140_v38 }
 0xe20   :  { %3172 = vst [vmem:[#allocation12 + $0x78] sm:$0xff] %v3156_v32 }
 0xe21   :  { %4505 = shalt.err (!%p4502_p2)
}
 0xe22   :  { %s4506_s22 = scalar_lea.hbm %s5943_s13, 2048 }
 0xe23   :  { %p4507_p3 = scmp.ne.s32.totalorder %s5943_s13, %s4506_s22  ;;  %p4510_p4 = scmp.lt.u32.totalorder %s4506_s22, %s5943_s13 }
 0xe25   :  { %p4512_p5 = pnand %p4510_p4, %p4507_p3 }
 0xe27   :  { %4515 = shalt.err (!%p4512_p5)
}
 0xe28   :  { %3184 = dma.vmem_to_hbm [thread:$0]  %s3179_s19, 2048, %s5943_s13, [#allocation5], %s4531_s4, %s4531_s4, %s4532_s20  }
 0xe29   :  { %4522 = dma.done.wait [#allocation5], 2048  }
 0xe2a   :  { %4523 = vsyncadd [#allocation5], 4294965248 }
 0xe2b   :  { %3188 = vsyncpa [#allocation4], 1 }
 0xe2c   :  { %3189 = vsyncpa [#allocation7], 1 }
 0xe2d   :  { %3190 = vsyncpa [#allocation10], 1 }
 0xe2e   :  { %3191 = vsyncpa [#allocation5], 1 }

</bundles_post_ra>
